<compile_context>
chip_gen: v7x
topology: tpu7x:2x2x1
jax: 0.10.0
libtpu: 0.0.40
codegen_flags: <defaults>
</compile_context>

<pallas_src>
import functools

import jax
import jax.numpy as jnp
from jax.experimental import pallas as pl
from jax.experimental.pallas import tpu as pltpu


def _round_up(x, m):
    return ((x + m - 1) // m) * m


def _fused_conv_bn_relu_kernel(p_ref, w_ref, gamma_ref, beta_ref, o_ref, conv_ref,
                               *, true_m, eps):
    """Whole problem in one step: conv matmul -> BN batch stats -> scale/bias -> ReLU."""
    # ---- Conv: one MXU matmul over the full im2col matrix (bf16 in, f32 acc), kept in a
    #      VMEM scratch so it never goes back to HBM and never has to stay live in vregs. ----
    conv_ref[...] = jnp.dot(p_ref[...], w_ref[...], preferred_element_type=jnp.float32)

    mp = conv_ref.shape[0]
    inv_m = 1.0 / float(true_m)

    # ---- Training-mode BN batch statistics (biased variance), two-pass for numerical
    #      robustness.  Zero-padded patch rows produce all-zero conv rows -> contribute 0 to
    #      the sum; they are masked out of the variance (no-op when mp == true_m). ----
    conv = conv_ref[...]
    mean = jnp.sum(conv, axis=0, keepdims=True) * inv_m            # (1, Cout)
    centered = conv - mean
    if mp != true_m:
        row = jax.lax.broadcasted_iota(jnp.int32, centered.shape, 0)
        centered = jnp.where(row < true_m, centered, 0.0)
    var = jnp.sum(centered * centered, axis=0, keepdims=True) * inv_m

    # ---- Fold BN into a single per-channel scale/bias, apply + ReLU (one FMA + max). ----
    scale = gamma_ref[...] * jax.lax.rsqrt(var + eps)               # (1, Cout)
    bias = beta_ref[...] - mean * scale
    o_ref[...] = jnp.maximum(conv_ref[...] * scale + bias, 0.0).astype(o_ref.dtype)


def conv_bn_relu(x_nchw, w_oihw, gamma, beta, *, stride=2, pad=1, eps=1e-5):
    """Replicates M.forward: Conv2d(3x3, stride=2, pad=1, no bias) -> BN (train) -> ReLU.

    x_nchw: (N, Cin, H, W) f32; w_oihw: (Cout, Cin, 3, 3) f32; gamma/beta: (Cout,) f32.
    Returns (N, Cout, Ho, Wo) f32.
    """
    N, Cin, H, W = x_nchw.shape
    Cout, _, Kh, Kw = w_oihw.shape
    Ho = (H + 2 * pad - Kh) // stride + 1
    Wo = (W + 2 * pad - Kw) // stride + 1
    M = N * Ho * Wo
    K = Kh * Kw * Cin

    # --- XLA glue: cast to bf16 FIRST (halves all glue traffic; pad zeros / slices are
    #     exact), NCHW -> NHWC, spatial pad, im2col in (kh, kw, ci) patch order. ---
    x = jnp.transpose(x_nchw.astype(jnp.bfloat16), (0, 2, 3, 1))
    x = jnp.pad(x, ((0, 0), (pad, pad), (pad, pad), (0, 0)))
    taps = [x[:, kh:kh + stride * Ho:stride, kw:kw + stride * Wo:stride, :]
            for kh in range(Kh) for kw in range(Kw)]
    patches = jnp.concatenate(taps, axis=-1).reshape(M, K)

    # Weight OIHW -> (kh, kw, ci, co) -> (K, Cout), bf16.
    w_mat = jnp.transpose(w_oihw.astype(jnp.bfloat16), (2, 3, 1, 0)).reshape(K, Cout)

    # Pad K to a lane multiple (zeros are exact in the matmul) and M to a sublane multiple.
    Kp = _round_up(K, 128)
    Mp = _round_up(M, 8)
    if Kp != K:
        patches = jnp.pad(patches, ((0, 0), (0, Kp - K)))
        w_mat = jnp.pad(w_mat, ((0, Kp - K), (0, 0)))
    if Mp != M:
        patches = jnp.pad(patches, ((0, Mp - M), (0, 0)))

    gamma2 = gamma.reshape(1, Cout).astype(jnp.float32)
    beta2 = beta.reshape(1, Cout).astype(jnp.float32)

    kernel = functools.partial(_fused_conv_bn_relu_kernel, true_m=M, eps=eps)

    out_flat = pl.pallas_call(
        kernel,
        out_shape=jax.ShapeDtypeStruct((Mp, Cout), jnp.float32),
        grid=(1,),                                      # whole problem in one grid step
        in_specs=[
            pl.BlockSpec((Mp, Kp), lambda i: (0, 0)),   # im2col patches (bf16)
            pl.BlockSpec((Kp, Cout), lambda i: (0, 0)), # weight matrix (bf16)
            pl.BlockSpec((1, Cout), lambda i: (0, 0)),  # gamma
            pl.BlockSpec((1, Cout), lambda i: (0, 0)),  # beta
        ],
        out_specs=pl.BlockSpec((Mp, Cout), lambda i: (0, 0)),
        scratch_shapes=[pltpu.VMEM((Mp, Cout), jnp.float32)],   # conv block stays in VMEM
        compiler_params=pltpu.CompilerParams(
            dimension_semantics=("arbitrary",),
            vmem_limit_bytes=8 * 1024 * 1024,           # actual footprint < 4 MiB
        ),
    )(patches, w_mat, gamma2, beta2)

    out = out_flat[:M].reshape(N, Ho, Wo, Cout)
    # The PyTorch module returns NCHW; relayout here.  (If the consumer accepts NHWC, skip
    # this transpose — the kernel's natural output layout is lane-dense (M, Cout).)
    return jnp.transpose(out, (0, 3, 1, 2))


def _reference(x_nchw, w_oihw, gamma, beta, *, stride=2, pad=1, eps=1e-5):
    conv = jax.lax.conv_general_dilated(
        x_nchw, w_oihw, window_strides=(stride, stride),
        padding=((pad, pad), (pad, pad)),
        dimension_numbers=("NCHW", "OIHW", "NCHW"))
    mean = jnp.mean(conv, axis=(0, 2, 3), keepdims=True)
    var = jnp.mean(jnp.square(conv - mean), axis=(0, 2, 3), keepdims=True)
    y = (conv - mean) * jax.lax.rsqrt(var + eps)
    y = y * gamma.reshape(1, -1, 1, 1) + beta.reshape(1, -1, 1, 1)
    return jnp.maximum(y, 0.0)


if __name__ == "__main__":
    # Shapes match the PyTorch module's forward: x18 = (1, 64, 56, 56), Conv2d(64, 128, 3x3, s=2).
    N, Cin, H, W = 1, 64, 56, 56
    Cout, Kh, Kw = 128, 3, 3

    key = jax.random.PRNGKey(0)
    kx, kw, kg, kb = jax.random.split(key, 4)
    x = jax.random.normal(kx, (N, Cin, H, W), dtype=jnp.float32)
    w = jax.random.normal(kw, (Cout, Cin, Kh, Kw), dtype=jnp.float32) * 0.05
    gamma = 1.0 + 0.1 * jax.random.normal(kg, (Cout,), dtype=jnp.float32)
    beta = 0.1 * jax.random.normal(kb, (Cout,), dtype=jnp.float32)

    fused = jax.jit(conv_bn_relu)
    out = jax.block_until_ready(fused(x, w, gamma, beta))
    ref = jax.block_until_ready(_reference(x, w, gamma, beta))

    Ho = (H + 2 - 3) // 2 + 1
    assert out.shape == (N, Cout, Ho, Ho), out.shape
    # bf16 matmul inputs with f32 accumulation vs. pure-f32 reference -> tolerance ~1e-2.
    max_err = float(jnp.max(jnp.abs(out - ref)))
    assert jnp.allclose(out, ref, rtol=2e-2, atol=2e-2), max_err

    print("KERNEL_OK")
</pallas_src>

<mosaic_0001>
module attributes {stable_mosaic.version = 11 : i64} {
  func.func @_fused_conv_bn_relu_kernel(%arg0: i32, %arg1: memref<784x640xbf16, #tpu.memory_space<vmem>>, %arg2: memref<640x128xbf16, #tpu.memory_space<vmem>>, %arg3: memref<1x128xf32, #tpu.memory_space<vmem>>, %arg4: memref<1x128xf32, #tpu.memory_space<vmem>>, %arg5: memref<784x128xf32, #tpu.memory_space<vmem>>, %arg6: memref<784x128xf32, #tpu.memory_space<vmem>>) attributes {dimension_semantics = [#tpu.dimension_semantics<arbitrary>], iteration_bounds = array<i64: 1>, scalar_prefetch = 0 : i64, scratch_operands = 1 : i64, tpu.core_type = #tpu.core_type<tc>, window_params = [{pipeline_mode = #tpu.pipeline_mode<synchronous>, transform_indices = @transform_0, window_bounds = array<i64: 784, 640>}, {pipeline_mode = #tpu.pipeline_mode<synchronous>, transform_indices = @transform_1, window_bounds = array<i64: 640, 128>}, {pipeline_mode = #tpu.pipeline_mode<synchronous>, transform_indices = @transform_2, window_bounds = array<i64: 1, 128>}, {pipeline_mode = #tpu.pipeline_mode<synchronous>, transform_indices = @transform_3, window_bounds = array<i64: 1, 128>}, {pipeline_mode = #tpu.pipeline_mode<synchronous>, transform_indices = @transform_4, window_bounds = array<i64: 784, 128>}]} {
    %c0 = arith.constant 0 : index
    %c0_0 = arith.constant 0 : index
    %0 = vector.load %arg1[%c0, %c0_0] : memref<784x640xbf16, #tpu.memory_space<vmem>>, vector<784x640xbf16>
    %c0_1 = arith.constant 0 : index
    %c0_2 = arith.constant 0 : index
    %1 = vector.load %arg2[%c0_1, %c0_2] : memref<640x128xbf16, #tpu.memory_space<vmem>>, vector<640x128xbf16>
    %cst = arith.constant dense<0.000000e+00> : vector<784x128xf32>
    %2 = tpu.matmul %0, %1, %cst {dimension_numbers = #tpu.dot_dimension_numbers<[1], [0], [0], [1], [0, 0, 1, 1], [], []>} : vector<784x640xbf16>, vector<640x128xbf16>, vector<784x128xf32> -> vector<784x128xf32>
    %c0_3 = arith.constant 0 : index
    %c0_4 = arith.constant 0 : index
    %3 = vector.load %arg6[%c0_3, %c0_4] : memref<784x128xf32, #tpu.memory_space<vmem>>, vector<784x128xf32>
    tpu.vector_store %arg6[%c0_3, %c0_4], %2 {strides = array<i32>} : memref<784x128xf32, #tpu.memory_space<vmem>>, vector<784x128xf32>,
    %c0_5 = arith.constant 0 : index
    %c0_6 = arith.constant 0 : index
    %4 = vector.load %arg6[%c0_5, %c0_6] : memref<784x128xf32, #tpu.memory_space<vmem>>, vector<784x128xf32>
    %cst_7 = arith.constant dense<0.000000e+00> : vector<128xf32>
    %5 = vector.multi_reduction <add>, %4, %cst_7 [0] : vector<784x128xf32> to vector<128xf32>
    %6 = vector.shape_cast %5 : vector<128xf32> to vector<1x128xf32>
    %cst_8 = arith.constant 0.00127551018 : f32
    %7 = vector.broadcast %cst_8 : f32 to vector<1x128xf32>
    %8 = arith.mulf %6, %7 : vector<1x128xf32>
    %9 = vector.broadcast %8 : vector<1x128xf32> to vector<784x128xf32>
    %10 = arith.subf %4, %9 : vector<784x128xf32>
    %11 = arith.mulf %10, %10 : vector<784x128xf32>
    %cst_9 = arith.constant dense<0.000000e+00> : vector<128xf32>
    %12 = vector.multi_reduction <add>, %11, %cst_9 [0] : vector<784x128xf32> to vector<128xf32>
    %13 = vector.shape_cast %12 : vector<128xf32> to vector<1x128xf32>
    %cst_10 = arith.constant 0.00127551018 : f32
    %14 = vector.broadcast %cst_10 : f32 to vector<1x128xf32>
    %15 = arith.mulf %13, %14 : vector<1x128xf32>
    %c0_11 = arith.constant 0 : index
    %c0_12 = arith.constant 0 : index
    %16 = vector.load %arg3[%c0_11, %c0_12] : memref<1x128xf32, #tpu.memory_space<vmem>>, vector<1x128xf32>
    %cst_13 = arith.constant 9.99999974E-6 : f32
    %17 = vector.broadcast %cst_13 : f32 to vector<1x128xf32>
    %18 = arith.addf %15, %17 : vector<1x128xf32>
    %19 = math.rsqrt %18 : vector<1x128xf32>
    %20 = arith.mulf %16, %19 : vector<1x128xf32>
    %c0_14 = arith.constant 0 : index
    %c0_15 = arith.constant 0 : index
    %21 = vector.load %arg4[%c0_14, %c0_15] : memref<1x128xf32, #tpu.memory_space<vmem>>, vector<1x128xf32>
    %22 = arith.mulf %8, %20 : vector<1x128xf32>
    %23 = arith.subf %21, %22 : vector<1x128xf32>
    %c0_16 = arith.constant 0 : index
    %c0_17 = arith.constant 0 : index
    %24 = vector.load %arg6[%c0_16, %c0_17] : memref<784x128xf32, #tpu.memory_space<vmem>>, vector<784x128xf32>
    %25 = vector.broadcast %20 : vector<1x128xf32> to vector<784x128xf32>
    %26 = arith.mulf %24, %25 : vector<784x128xf32>
    %27 = vector.broadcast %23 : vector<1x128xf32> to vector<784x128xf32>
    %28 = arith.addf %26, %27 : vector<784x128xf32>
    %cst_18 = arith.constant 0.000000e+00 : f32
    %29 = vector.broadcast %cst_18 : f32 to vector<784x128xf32>
    %30 = arith.maximumf %28, %29 : vector<784x128xf32>
    %c0_19 = arith.constant 0 : index
    %c0_20 = arith.constant 0 : index
    %31 = vector.load %arg5[%c0_19, %c0_20] : memref<784x128xf32, #tpu.memory_space<vmem>>, vector<784x128xf32>
    tpu.vector_store %arg5[%c0_19, %c0_20], %30 {strides = array<i32>} : memref<784x128xf32, #tpu.memory_space<vmem>>, vector<784x128xf32>,
    return
  }
  func.func @transform_0(%arg0: i32) -> (i32, i32) {
    %c0_i32 = arith.constant 0 : i32
    %c0_i32_0 = arith.constant 0 : i32
    %c0_i32_1 = arith.constant 0 : i32
    return %c0_i32, %c0_i32_0 : i32, i32
  }
  func.func @transform_1(%arg0: i32) -> (i32, i32) {
    %c0_i32 = arith.constant 0 : i32
    %c0_i32_0 = arith.constant 0 : i32
    %c0_i32_1 = arith.constant 0 : i32
    return %c0_i32, %c0_i32_0 : i32, i32
  }
  func.func @transform_2(%arg0: i32) -> (i32, i32) {
    %c0_i32 = arith.constant 0 : i32
    %c0_i32_0 = arith.constant 0 : i32
    %c0_i32_1 = arith.constant 0 : i32
    return %c0_i32, %c0_i32_0 : i32, i32
  }
  func.func @transform_3(%arg0: i32) -> (i32, i32) {
    %c0_i32 = arith.constant 0 : i32
    %c0_i32_0 = arith.constant 0 : i32
    %c0_i32_1 = arith.constant 0 : i32
    return %c0_i32, %c0_i32_0 : i32, i32
  }
  func.func @transform_4(%arg0: i32) -> (i32, i32) {
    %c0_i32 = arith.constant 0 : i32
    %c0_i32_0 = arith.constant 0 : i32
    %c0_i32_1 = arith.constant 0 : i32
    return %c0_i32, %c0_i32_0 : i32, i32
  }
}

</mosaic_0001>

<bundles_post_ra>
// kernel: conv_bn_relu.1
= control target key start
LH: loop header
LB: loop body
LE: loop exit
PB: predicated region body
PF: predicated region fallthrough
CT: control target
= control target key end

     0   :  { %v5464_v0 = vmov 0   ;;  %v5465_v40 = vmov 0.0   ;;  %vm5466_vm0 = vmmov 0   ;;  %s8410_s1 = inlined_call_operand.vmem [shape: bf16[640,128], index: 1, kind: input, shape index: {}]   ;;  %s8411_s0 = inlined_call_operand.vmem [shape: bf16[784,640], index: 0, kind: input, shape index: {}]   ;;  %s8412_s2 = inlined_call_operand.vmem [shape: f32[1,128], index: 2, kind: input, shape index: {}]   ;;  %s8413_s3 = inlined_call_operand.vmem [shape: f32[1,128], index: 3, kind: input, shape index: {}]   ;;  %s8414_s4 = inlined_call_operand.vmem [shape: f32[784,128], index: 4, kind: output, shape index: {}]  }
   0x1   :  { %1906 = vmatprep.subr.bf16.mxu1 %v5464_v0  ;;  %2331 = vmatprep.subr.bf16.mxu0 %v5464_v0  ;;  %v5079_v1 = vld [vmem:[%s8410_s1] sm:$0xff]   ;;  %v5081_v3 = vld [vmem:[%s8410_s1 + $0x8] sm:$0xff]   ;;  %v5083_v5 = vld [vmem:[%s8410_s1 + $0x10] sm:$0xff]  }
   0x2   :  { %v5500_v2 = vld [vmem:[%s8410_s1 + $0x80] sm:$0xff]   ;;  %1907 = vmatpush1.bf16.msra.mxu1 %v5079_v1  ;;  %v5510_v4 = vld [vmem:[%s8410_s1 + $0x88] sm:$0xff]   ;;  %v5521_v6 = vld [vmem:[%s8410_s1 + $0x90] sm:$0xff]  }
   0x3   :  { %2332 = vmatpush1.bf16.msra.mxu0 %v5500_v2  ;;  %1908 = vmatprep.subr.bf16.mxu1 %v5464_v0  ;;  %v5085_v7 = vld [vmem:[%s8410_s1 + $0x18] sm:$0xff]   ;;  %v5087_v9 = vld [vmem:[%s8410_s1 + $0x20] sm:$0xff]   ;;  %v5089_v11 = vld [vmem:[%s8410_s1 + $0x28] sm:$0xff]  }
   0x4   :  { %2333 = vmatprep.subr.bf16.mxu0 %v5464_v0  ;;  %v5532_v8 = vld [vmem:[%s8410_s1 + $0x98] sm:$0xff]   ;;  %v5543_v10 = vld [vmem:[%s8410_s1 + $0xa0] sm:$0xff]   ;;  %v5554_v12 = vld [vmem:[%s8410_s1 + $0xa8] sm:$0xff]  }
   0x5   :  { %v5091_v13 = vld [vmem:[%s8410_s1 + $0x30] sm:$0xff]   ;;  %v5093_v15 = vld [vmem:[%s8410_s1 + $0x38] sm:$0xff]   ;;  %v5095_v17 = vld [vmem:[%s8410_s1 + $0x40] sm:$0xff]  }
   0x6   :  { %1909 = vmatpush1.bf16.msra.mxu1 %v5081_v3  ;;  %v5565_v14 = vld [vmem:[%s8410_s1 + $0xb0] sm:$0xff]   ;;  %v5576_v16 = vld [vmem:[%s8410_s1 + $0xb8] sm:$0xff]   ;;  %v5587_v18 = vld [vmem:[%s8410_s1 + $0xc0] sm:$0xff]  }
   0x7   :  { %2334 = vmatpush1.bf16.msra.mxu0 %v5510_v4  ;;  %1910 = vmatprep.subr.bf16.mxu1 %v5464_v0  ;;  %v5113_v19 = vld [vmem:[%s8411_s0 + $0x4] ss:$20 sps:$4 sm:$0xff]   ;;  %v5097_v20 = vld [vmem:[%s8410_s1 + $0x48] sm:$0xff]   ;;  %v5099_v23 = vld [vmem:[%s8410_s1 + $0x50] sm:$0xff]  }
   0x8   :  { %2335 = vmatprep.subr.bf16.mxu0 %v5464_v0  ;;  %v5116_v21 = vld [vmem:[%s8411_s0 + $0xc] ss:$20 sps:$4 sm:$0xff]   ;;  %1938 = vmatprep.mubr.bf16.mxu1 %v5113_v19  ;;  %v5615_v24 = vld [vmem:[%s8410_s1 + $0xd0] sm:$0xff]   ;;  %v5101_v25 = vld [vmem:[%s8410_s1 + $0x58] sm:$0xff]  }
   0x9   :  { %v5604_v22 = vld [vmem:[%s8410_s1 + $0xc8] sm:$0xff]   ;;  %2363 = vmatprep.mubr.bf16.mxu0 %v5116_v21  ;;  %v5626_v26 = vld [vmem:[%s8410_s1 + $0xd8] sm:$0xff]   ;;  %v5103_v27 = vld [vmem:[%s8410_s1 + $0x60] sm:$0xff]  }
   0xa   :  { %1911 = vmatpush1.bf16.msra.mxu1 %v5083_v5  ;;  %v5637_v28 = vld [vmem:[%s8410_s1 + $0xe0] sm:$0xff]   ;;  %v5105_v29 = vld [vmem:[%s8410_s1 + $0x68] sm:$0xff]   ;;  %v5107_v31 = vld [vmem:[%s8410_s1 + $0x70] sm:$0xff]  }
   0xb   :  { %2336 = vmatpush1.bf16.msra.mxu0 %v5521_v6  ;;  %1912 = vmatprep.subr.bf16.mxu1 %v5464_v0  ;;  %v5648_v30 = vld [vmem:[%s8410_s1 + $0xe8] sm:$0xff]   ;;  %v5659_v32 = vld [vmem:[%s8410_s1 + $0xf0] sm:$0xff]   ;;  %v5109_v33 = vld [vmem:[%s8410_s1 + $0x78] sm:$0xff]  }
   0xc   :  { %2337 = vmatprep.subr.bf16.mxu0 %v5464_v0  ;;  %v5670_v34 = vld [vmem:[%s8410_s1 + $0xf8] sm:$0xff]   ;;  %v5111_v35 = vld [vmem:[%s8411_s0] ss:$20 sps:$4 sm:$0xff]   ;;  %v5136_v41 = vld [vmem:[%s8410_s1 + $0x108] sm:$0xff]  }
   0xd   :  { %v5114_v36 = vld [vmem:[%s8411_s0 + $0x8] ss:$20 sps:$4 sm:$0xff]   ;;  %v5117_v37 = vld [vmem:[%s8410_s1 + $0x100] sm:$0xff]   ;;  %v5155_v46 = vld [vmem:[%s8410_s1 + $0x110] sm:$0xff]  }
   0xe   :  { %1913 = vmatpush1.bf16.msra.mxu1 %v5085_v7  ;;  %v5118_v38 = vld [vmem:[%s8411_s0 + $0x2c] ss:$20 sps:$4 sm:$0xff]   ;;  %v5120_v39 = vld [vmem:[%s8411_s0 + $0x34] ss:$20 sps:$4 sm:$0xff]   ;;  %v5123_v43 = vld [vmem:[%s8411_s0 + $0x30] ss:$20 sps:$4 sm:$0xff]  }
   0xf   :  { %2338 = vmatpush1.bf16.msra.mxu0 %v5532_v8  ;;  %1914 = vmatprep.subr.bf16.mxu1 %v5464_v0  ;;  %v5122_v42 = vld [vmem:[%s8411_s0 + $0x28] ss:$20 sps:$4 sm:$0xff]   ;;  %v5128_v48 = vld [vmem:[%s8411_s0 + $0x50] ss:$20 sps:$4 sm:$0xff]   ;;  %v5129_v49 = vld [vmem:[%s8411_s0 + $0x58] ss:$20 sps:$4 sm:$0xff]  }
  0x10   :  { %2339 = vmatprep.subr.bf16.mxu0 %v5464_v0  ;;  %v5124_v44 = vld [vmem:[%s8411_s0 + $0x54] ss:$20 sps:$4 sm:$0xff]   ;;  %v5126_v45 = vld [vmem:[%s8411_s0 + $0x5c] ss:$20 sps:$4 sm:$0xff]   ;;  %v5132_v51 = vld [vmem:[%s8411_s0 + $0x84] ss:$20 sps:$4 sm:$0xff]  }
  0x11   :  { %v5174_v47 = vld [vmem:[%s8410_s1 + $0x118] sm:$0xff]   ;;  %v5193_v52 = vld [vmem:[%s8410_s1 + $0x120] sm:$0xff]   ;;  %v5212_v53 = vld [vmem:[%s8410_s1 + $0x128] sm:$0xff]  }
  0x12   :  { %1915 = vmatpush1.bf16.msra.mxu1 %v5087_v9  ;;  %v5130_v50 = vld [vmem:[%s8411_s0 + $0x7c] ss:$20 sps:$4 sm:$0xff]   ;;  %v5134_v54 = vld [vmem:[%s8411_s0 + $0x78] ss:$20 sps:$4 sm:$0xff]   ;;  %v5135_v55 = vld [vmem:[%s8411_s0 + $0x80] ss:$20 sps:$4 sm:$0xff]  }
  0x13   :  { %2340 = vmatpush1.bf16.msra.mxu0 %v5543_v10  ;;  %1916 = vmatprep.subr.bf16.mxu1 %v5464_v0  ;;  %v5137_v56 = vld [vmem:[%s8411_s0 + $0xa4] ss:$20 sps:$4 sm:$0xff]   ;;  %v5139_v57 = vld [vmem:[%s8411_s0 + $0xac] ss:$20 sps:$4 sm:$0xff]   ;;  %v5235_v58 = vld [vmem:[%s8410_s1 + $0x130] sm:$0xff]  }
  0x14   :  { %2341 = vmatprep.subr.bf16.mxu0 %v5464_v0  ;;  %v5141_v59 = vld [vmem:[%s8411_s0 + $0xa0] ss:$20 sps:$4 sm:$0xff]   ;;  %v5142_v60 = vld [vmem:[%s8411_s0 + $0xa8] ss:$20 sps:$4 sm:$0xff]   ;;  %v5148_v1 = vld [vmem:[%s8411_s0 + $0xd0] ss:$20 sps:$4 sm:$0xff]  }
  0x15   :  { %v5143_v61 = vld [vmem:[%s8411_s0 + $0xcc] ss:$20 sps:$4 sm:$0xff]   ;;  %v5145_v62 = vld [vmem:[%s8411_s0 + $0xd4] ss:$20 sps:$4 sm:$0xff]   ;;  %v5151_v3 = vld [vmem:[%s8411_s0 + $0xfc] ss:$20 sps:$4 sm:$0xff]  }
  0x16   :  { %1917 = vmatpush1.bf16.msra.mxu1 %v5089_v11  ;;  %v5147_v63 = vld [vmem:[%s8411_s0 + $0xc8] ss:$20 sps:$4 sm:$0xff]   ;;  %v5154_v5 = vld [vmem:[%s8411_s0 + $0xf8] ss:$20 sps:$4 sm:$0xff]  }
  0x17   :  { %2342 = vmatpush1.bf16.msra.mxu0 %v5554_v12  ;;  %1918 = vmatprep.subr.bf16.mxu1 %v5464_v0  ;;  %v5158_v7 = vld [vmem:[%s8411_s0 + $0x124] ss:$20 sps:$4 sm:$0xff]   ;;  %v5175_v19 = vld [vmem:[%s8411_s0 + $0x194] ss:$20 sps:$4 sm:$0xff]  }
  0x18   :  { %2343 = vmatprep.subr.bf16.mxu0 %v5464_v0  ;;  %v5160_v9 = vld [vmem:[%s8411_s0 + $0x118] ss:$20 sps:$4 sm:$0xff]  }
  0x19   :  { %v5162_v11 = vld [vmem:[%s8411_s0 + $0x144] ss:$20 sps:$4 sm:$0xff]  }
  0x1a   :  { %1919 = vmatpush1.bf16.msra.mxu1 %v5091_v13  ;;  %v5166_v13 = vld [vmem:[%s8411_s0 + $0x140] ss:$20 sps:$4 sm:$0xff]   ;;  %v5180_v21 = vld [vmem:[%s8411_s0 + $0x198] ss:$20 sps:$4 sm:$0xff]  }
  0x1b   :  { %2344 = vmatpush1.bf16.msra.mxu0 %v5565_v14  ;;  %1920 = vmatprep.subr.bf16.mxu1 %v5464_v0 }
  0x1c   :  { %2345 = vmatprep.subr.bf16.mxu0 %v5464_v0 }
  0x1e   :  { %1921 = vmatpush1.bf16.msra.mxu1 %v5093_v15  ;;  %v5168_v15 = vld [vmem:[%s8411_s0 + $0x16c] ss:$20 sps:$4 sm:$0xff]  }
  0x1f   :  { %2346 = vmatpush1.bf16.msra.mxu0 %v5576_v16  ;;  %1922 = vmatprep.subr.bf16.mxu1 %v5464_v0 }
  0x20   :  { %2347 = vmatprep.subr.bf16.mxu0 %v5464_v0 }
  0x22   :  { %1923 = vmatpush1.bf16.msra.mxu1 %v5095_v17  ;;  %v5172_v17 = vld [vmem:[%s8411_s0 + $0x168] ss:$20 sps:$4 sm:$0xff]  }
  0x23   :  { %2348 = vmatpush1.bf16.msra.mxu0 %v5587_v18  ;;  %1924 = vmatprep.subr.bf16.mxu1 %v5464_v0 }
  0x24   :  { %2349 = vmatprep.subr.bf16.mxu0 %v5464_v0 }
  0x26   :  { %1925 = vmatpush1.bf16.msra.mxu1 %v5097_v20  ;;  %v5179_v20 = vld [vmem:[%s8411_s0 + $0x190] ss:$20 sps:$4 sm:$0xff]  }
  0x27   :  { %2350 = vmatpush1.bf16.msra.mxu0 %v5604_v22  ;;  %1926 = vmatprep.subr.bf16.mxu1 %v5464_v0 }
  0x28   :  { %2351 = vmatprep.subr.bf16.mxu0 %v5464_v0 }
  0x2a   :  { %1927 = vmatpush1.bf16.msra.mxu1 %v5099_v23  ;;  %v5183_v23 = vld [vmem:[%s8411_s0 + $0x1c4] ss:$20 sps:$4 sm:$0xff]  }
  0x2b   :  { %2352 = vmatpush1.bf16.msra.mxu0 %v5615_v24  ;;  %1928 = vmatprep.subr.bf16.mxu1 %v5464_v0 }
  0x2c   :  { %2353 = vmatprep.subr.bf16.mxu0 %v5464_v0 }
  0x2e   :  { %1929 = vmatpush1.bf16.msra.mxu1 %v5101_v25  ;;  %v5186_v25 = vld [vmem:[%s8411_s0 + $0x1c0] ss:$20 sps:$4 sm:$0xff]  }
  0x2f   :  { %2354 = vmatpush1.bf16.msra.mxu0 %v5626_v26  ;;  %1930 = vmatprep.subr.bf16.mxu1 %v5464_v0 }
  0x30   :  { %2355 = vmatprep.subr.bf16.mxu0 %v5464_v0 }
  0x32   :  { %1931 = vmatpush1.bf16.msra.mxu1 %v5103_v27  ;;  %v5189_v27 = vld [vmem:[%s8411_s0 + $0x1ec] ss:$20 sps:$4 sm:$0xff]  }
  0x33   :  { %2356 = vmatpush1.bf16.msra.mxu0 %v5637_v28  ;;  %1932 = vmatprep.subr.bf16.mxu1 %v5464_v0 }
  0x34   :  { %2357 = vmatprep.subr.bf16.mxu0 %v5464_v0 }
  0x36   :  { %1933 = vmatpush1.bf16.msra.mxu1 %v5105_v29  ;;  %v5192_v29 = vld [vmem:[%s8411_s0 + $0x1e8] ss:$20 sps:$4 sm:$0xff]  }
  0x37   :  { %2358 = vmatpush1.bf16.msra.mxu0 %v5648_v30  ;;  %1934 = vmatprep.subr.bf16.mxu1 %v5464_v0 }
  0x38   :  { %2359 = vmatprep.subr.bf16.mxu0 %v5464_v0 }
  0x3a   :  { %1935 = vmatpush1.bf16.msra.mxu1 %v5107_v31  ;;  %v5196_v31 = vld [vmem:[%s8411_s0 + $0x214] ss:$20 sps:$4 sm:$0xff]  }
  0x3b   :  { %2360 = vmatpush1.bf16.msra.mxu0 %v5659_v32  ;;  %1936 = vmatprep.subr.bf16.mxu1 %v5464_v0 }
  0x3c   :  { %2361 = vmatprep.subr.bf16.mxu0 %v5464_v0 }
  0x3e   :  { %1937 = vmatpush1.bf16.msra.mxu1 %v5109_v33  ;;  %v5199_v33 = vld [vmem:[%s8411_s0 + $0x210] ss:$20 sps:$4 sm:$0xff]  }
  0x3f   :  { %2362 = vmatpush1.bf16.msra.mxu0 %v5670_v34  ;;  %4750 = vmatprep.subr.bf16.mxu1 %v5464_v0 }
  0x40   :  { %4538 = vmatprep.subr.bf16.mxu0 %v5465_v40 }
  0x41   :  { %1939 = vmatmul.mubr.bf16.vlgmr.msra.gmra.mrb[0].mxu1 %v5111_v35  ;;  %v5202_v35 = vld [vmem:[%s8411_s0 + $0x23c] ss:$20 sps:$4 sm:$0xff]  }
  0x42   :  { %2364 = vmatmul.mubr.bf16.vlgmr.msra.gmra.mrb[0].mxu0 %v5114_v36  ;;  %1946 = vmatprep.mubr.bf16.mxu1 %v5118_v38  ;;  %v5204_v36 = vld [vmem:[%s8411_s0 + $0x230] ss:$20 sps:$4 sm:$0xff]  }
  0x43   :  { %4539 = vmatpush3.bf16.msra.mxu0 %v5117_v37  ;;  %2371 = vmatprep.mubr.bf16.mxu0 %v5120_v39  ;;  %v5205_v37 = vld [vmem:[%s8411_s0 + $0x238] ss:$20 sps:$4 sm:$0xff]   ;;  %v5206_v38 = vld [vmem:[%s8411_s0 + $0x25c] ss:$20 sps:$4 sm:$0xff]  }
  0x44   :  { %4766 = vmatpush1.bf16.msra.mxu1 %v5500_v2  ;;  %4540 = vmatprep.subr.bf16.mxu0 %v5465_v40  ;;  %v5149_v2 = vld [vmem:[%s8411_s0 + $0xf4] ss:$20 sps:$4 sm:$0xff]   ;;  %v5208_v39 = vld [vmem:[%s8411_s0 + $0x264] ss:$20 sps:$4 sm:$0xff]  }
  0x45   :  { %4751 = vmatprep.subr.bf16.mxu1 %v5464_v0 }
  0x47   :  { %4541 = vmatpush3.bf16.msra.mxu0 %v5136_v41  ;;  %v5210_v41 = vld [vmem:[%s8411_s0 + $0x258] ss:$20 sps:$4 sm:$0xff]  }
  0x48   :  { %4767 = vmatpush1.bf16.msra.mxu1 %v5510_v4  ;;  %4542 = vmatprep.subr.bf16.mxu0 %v5465_v40  ;;  %v5153_v4 = vld [vmem:[%s8411_s0 + $0xf0] ss:$20 sps:$4 sm:$0xff]  }
  0x49   :  { %1947 = vmatmul.mubr.bf16.gmra.mrb[4].mxu1 %v5122_v42  ;;  %4752 = vmatprep.subr.bf16.mxu1 %v5464_v0  ;;  %v5211_v42 = vld [vmem:[%s8411_s0 + $0x260] ss:$20 sps:$4 sm:$0xff]  }
  0x4a   :  { %2372 = vmatmul.mubr.bf16.gmra.mrb[4].mxu0 %v5123_v43  ;;  %1954 = vmatprep.mubr.bf16.mxu1 %v5124_v44  ;;  %v5213_v43 = vld [vmem:[%s8411_s0 + $0x284] ss:$20 sps:$4 sm:$0xff]   ;;  %v5215_v44 = vld [vmem:[%s8411_s0 + $0x28c] ss:$20 sps:$4 sm:$0xff]  }
  0x4b   :  { %2379 = vmatprep.mubr.bf16.mxu0 %v5126_v45  ;;  %4543 = vmatpush3.bf16.msra.mxu0 %v5155_v46  ;;  %v5217_v45 = vld [vmem:[%s8411_s0 + $0x280] ss:$20 sps:$4 sm:$0xff]   ;;  %v5218_v46 = vld [vmem:[%s8411_s0 + $0x288] ss:$20 sps:$4 sm:$0xff]  }
  0x4c   :  { %4768 = vmatpush1.bf16.msra.mxu1 %v5521_v6  ;;  %4544 = vmatprep.subr.bf16.mxu0 %v5465_v40  ;;  %v5156_v6 = vld [vmem:[%s8411_s0 + $0x11c] ss:$20 sps:$4 sm:$0xff]  }
  0x4d   :  { %4753 = vmatprep.subr.bf16.mxu1 %v5464_v0 }
  0x4f   :  { %4545 = vmatpush3.bf16.msra.mxu0 %v5174_v47  ;;  %v5219_v47 = vld [vmem:[%s8411_s0 + $0x2ac] ss:$20 sps:$4 sm:$0xff]  }
  0x50   :  { %4769 = vmatpush1.bf16.msra.mxu1 %v5532_v8  ;;  %4546 = vmatprep.subr.bf16.mxu0 %v5465_v40  ;;  %v5256_v8 = vld [vmem:[%s8410_s1 + $0x138] sm:$0xff]  }
  0x51   :  { %1955 = vmatmul.mubr.bf16.gmra.mrb[8].mxu1 %v5128_v48  ;;  %4754 = vmatprep.subr.bf16.mxu1 %v5464_v0  ;;  %v5221_v48 = vld [vmem:[%s8411_s0 + $0x2b4] ss:$20 sps:$4 sm:$0xff]  }
  0x52   :  { %2380 = vmatmul.mubr.bf16.gmra.mrb[8].mxu0 %v5129_v49  ;;  %1962 = vmatprep.mubr.bf16.mxu1 %v5130_v50  ;;  %v5223_v49 = vld [vmem:[%s8411_s0 + $0x2a8] ss:$20 sps:$4 sm:$0xff]   ;;  %v5224_v50 = vld [vmem:[%s8411_s0 + $0x2b0] ss:$20 sps:$4 sm:$0xff]  }
  0x53   :  { %2387 = vmatprep.mubr.bf16.mxu0 %v5132_v51  ;;  %4547 = vmatpush3.bf16.msra.mxu0 %v5193_v52  ;;  %v5225_v51 = vld [vmem:[%s8411_s0 + $0x2d4] ss:$20 sps:$4 sm:$0xff]   ;;  %v5227_v52 = vld [vmem:[%s8411_s0 + $0x2dc] ss:$20 sps:$4 sm:$0xff]  }
  0x54   :  { %4770 = vmatpush1.bf16.msra.mxu1 %v5543_v10  ;;  %4548 = vmatprep.subr.bf16.mxu0 %v5465_v40  ;;  %v5161_v10 = vld [vmem:[%s8411_s0 + $0x120] ss:$20 sps:$4 sm:$0xff]  }
  0x55   :  { %4755 = vmatprep.subr.bf16.mxu1 %v5464_v0 }
  0x57   :  { %4549 = vmatpush3.bf16.msra.mxu0 %v5212_v53  ;;  %v5229_v53 = vld [vmem:[%s8411_s0 + $0x2d0] ss:$20 sps:$4 sm:$0xff]  }
  0x58   :  { %4771 = vmatpush1.bf16.msra.mxu1 %v5554_v12  ;;  %4550 = vmatprep.subr.bf16.mxu0 %v5465_v40  ;;  %v5164_v12 = vld [vmem:[%s8411_s0 + $0x14c] ss:$20 sps:$4 sm:$0xff]  }
  0x59   :  { %1963 = vmatmul.mubr.bf16.gmra.mrb[12].mxu1 %v5134_v54  ;;  %4756 = vmatprep.subr.bf16.mxu1 %v5464_v0  ;;  %v5230_v54 = vld [vmem:[%s8411_s0 + $0x2d8] ss:$20 sps:$4 sm:$0xff]  }
  0x5a   :  { %2388 = vmatmul.mubr.bf16.gmra.mrb[12].mxu0 %v5135_v55  ;;  %1970 = vmatprep.mubr.bf16.mxu1 %v5137_v56  ;;  %v5231_v55 = vld [vmem:[%s8411_s0 + $0x2fc] ss:$20 sps:$4 sm:$0xff]   ;;  %v5233_v56 = vld [vmem:[%s8411_s0 + $0x304] ss:$20 sps:$4 sm:$0xff]  }
  0x5b   :  { %2395 = vmatprep.mubr.bf16.mxu0 %v5139_v57  ;;  %4551 = vmatpush3.bf16.msra.mxu0 %v5235_v58  ;;  %v5236_v57 = vld [vmem:[%s8411_s0 + $0x2f8] ss:$20 sps:$4 sm:$0xff]   ;;  %v5237_v58 = vld [vmem:[%s8411_s0 + $0x300] ss:$20 sps:$4 sm:$0xff]  }
  0x5c   :  { %4772 = vmatpush1.bf16.msra.mxu1 %v5565_v14  ;;  %4552 = vmatprep.subr.bf16.mxu0 %v5465_v40  ;;  %v5167_v14 = vld [vmem:[%s8411_s0 + $0x148] ss:$20 sps:$4 sm:$0xff]  }
  0x5d   :  { %4757 = vmatprep.subr.bf16.mxu1 %v5464_v0 }
  0x5f   :  { %4553 = vmatpush3.bf16.msra.mxu0 %v5256_v8  ;;  %v5257_v8 = vld [vmem:[%s8411_s0 + $0x39c] ss:$20 sps:$4 sm:$0xff]  }
  0x60   :  { %4773 = vmatpush1.bf16.msra.mxu1 %v5576_v16  ;;  %v5170_v16 = vld [vmem:[%s8411_s0 + $0x174] ss:$20 sps:$4 sm:$0xff]  }
  0x61   :  { %1971 = vmatmul.mubr.bf16.gmra.mrb[16].mxu1 %v5141_v59  ;;  %4758 = vmatprep.subr.bf16.mxu1 %v5464_v0  ;;  %v5238_v59 = vld [vmem:[%s8411_s0 + $0x324] ss:$20 sps:$4 sm:$0xff]  }
  0x62   :  { %2396 = vmatmul.mubr.bf16.gmra.mrb[16].mxu0 %v5142_v60  ;;  %1978 = vmatprep.mubr.bf16.mxu1 %v5143_v61  ;;  %v5240_v60 = vld [vmem:[%s8411_s0 + $0x32c] ss:$20 sps:$4 sm:$0xff]  }
  0x63   :  { %2403 = vmatprep.mubr.bf16.mxu0 %v5145_v62  ;;  %v5242_v61 = vld [vmem:[%s8411_s0 + $0x320] ss:$20 sps:$4 sm:$0xff]   ;;  %v5243_v62 = vld [vmem:[%s8411_s0 + $0x328] ss:$20 sps:$4 sm:$0xff]  }
  0x64   :  { %4774 = vmatpush1.bf16.msra.mxu1 %v5587_v18  ;;  %v5173_v18 = vld [vmem:[%s8411_s0 + $0x170] ss:$20 sps:$4 sm:$0xff]  }
  0x65   :  { %4759 = vmatprep.subr.bf16.mxu1 %v5464_v0 }
  0x68   :  { %4775 = vmatpush1.bf16.msra.mxu1 %v5604_v22  ;;  %v5181_v22 = vld [vmem:[%s8411_s0 + $0x1bc] ss:$20 sps:$4 sm:$0xff]  }
  0x69   :  { %1979 = vmatmul.mubr.bf16.gmra.mrb[20].mxu1 %v5147_v63  ;;  %4760 = vmatprep.subr.bf16.mxu1 %v5464_v0  ;;  %v5244_v63 = vld [vmem:[%s8411_s0 + $0x34c] ss:$20 sps:$4 sm:$0xff]  }
  0x6a   :  { %2404 = vmatmul.mubr.bf16.gmra.mrb[20].mxu0 %v5148_v1  ;;  %1986 = vmatprep.mubr.bf16.mxu1 %v5149_v2  ;;  %v5246_v1 = vld [vmem:[%s8411_s0 + $0x354] ss:$20 sps:$4 sm:$0xff]  }
  0x6b   :  { %2411 = vmatprep.mubr.bf16.mxu0 %v5151_v3  ;;  %v5248_v2 = vld [vmem:[%s8411_s0 + $0x348] ss:$20 sps:$4 sm:$0xff]   ;;  %v5249_v3 = vld [vmem:[%s8411_s0 + $0x350] ss:$20 sps:$4 sm:$0xff]  }
  0x6c   :  { %4776 = vmatpush1.bf16.msra.mxu1 %v5615_v24  ;;  %v5185_v24 = vld [vmem:[%s8411_s0 + $0x1b8] ss:$20 sps:$4 sm:$0xff]  }
  0x6d   :  { %4761 = vmatprep.subr.bf16.mxu1 %v5464_v0 }
  0x70   :  { %4777 = vmatpush1.bf16.msra.mxu1 %v5626_v26  ;;  %v5187_v26 = vld [vmem:[%s8411_s0 + $0x1e4] ss:$20 sps:$4 sm:$0xff]  }
  0x71   :  { %1987 = vmatmul.mubr.bf16.gmra.mrb[24].mxu1 %v5153_v4  ;;  %4762 = vmatprep.subr.bf16.mxu1 %v5464_v0  ;;  %v5250_v4 = vld [vmem:[%s8411_s0 + $0x374] ss:$20 sps:$4 sm:$0xff]  }
  0x72   :  { %2412 = vmatmul.mubr.bf16.gmra.mrb[24].mxu0 %v5154_v5  ;;  %1994 = vmatprep.mubr.bf16.mxu1 %v5156_v6  ;;  %v5252_v5 = vld [vmem:[%s8411_s0 + $0x37c] ss:$20 sps:$4 sm:$0xff]  }
  0x73   :  { %2419 = vmatprep.mubr.bf16.mxu0 %v5158_v7  ;;  %v5254_v6 = vld [vmem:[%s8411_s0 + $0x370] ss:$20 sps:$4 sm:$0xff]   ;;  %v5255_v7 = vld [vmem:[%s8411_s0 + $0x378] ss:$20 sps:$4 sm:$0xff]  }
  0x74   :  { %4778 = vmatpush1.bf16.msra.mxu1 %v5637_v28  ;;  %v5191_v28 = vld [vmem:[%s8411_s0 + $0x1e0] ss:$20 sps:$4 sm:$0xff]  }
  0x75   :  { %4763 = vmatprep.subr.bf16.mxu1 %v5464_v0 }
  0x78   :  { %4779 = vmatpush1.bf16.msra.mxu1 %v5648_v30  ;;  %v5194_v30 = vld [vmem:[%s8411_s0 + $0x20c] ss:$20 sps:$4 sm:$0xff]  }
  0x79   :  { %1995 = vmatmul.mubr.bf16.gmra.mrb[28].mxu1 %v5160_v9  ;;  %4764 = vmatprep.subr.bf16.mxu1 %v5464_v0  ;;  %v5259_v9 = vld [vmem:[%s8411_s0 + $0x3a4] ss:$20 sps:$4 sm:$0xff]  }
  0x7a   :  { %2420 = vmatmul.mubr.bf16.gmra.mrb[28].mxu0 %v5161_v10  ;;  %2002 = vmatprep.mubr.bf16.mxu1 %v5162_v11  ;;  %v5261_v10 = vld [vmem:[%s8411_s0 + $0x398] ss:$20 sps:$4 sm:$0xff]   ;;  %v5262_v11 = vld [vmem:[%s8411_s0 + $0x3a0] ss:$20 sps:$4 sm:$0xff]  }
  0x7b   :  { %2427 = vmatprep.mubr.bf16.mxu0 %v5164_v12  ;;  %v5263_v12 = vld [vmem:[%s8411_s0 + $0x3c4] ss:$20 sps:$4 sm:$0xff]  }
  0x7c   :  { %4780 = vmatpush1.bf16.msra.mxu1 %v5659_v32  ;;  %v5198_v32 = vld [vmem:[%s8411_s0 + $0x208] ss:$20 sps:$4 sm:$0xff]  }
  0x7d   :  { %4765 = vmatprep.subr.bf16.mxu1 %v5464_v0  ;;  %v5177_v0 = vld [vmem:[%s8411_s0 + $0x19c] ss:$20 sps:$4 sm:$0xff]  }
  0x80   :  { %4781 = vmatpush1.bf16.msra.mxu1 %v5670_v34  ;;  %v5200_v34 = vld [vmem:[%s8411_s0 + $0x234] ss:$20 sps:$4 sm:$0xff]  }
  0x81   :  { %2003 = vmatmul.mubr.bf16.gmra.mrb[32].mxu1 %v5166_v13  ;;  %v5265_v13 = vld [vmem:[%s8411_s0 + $0x3cc] ss:$20 sps:$4 sm:$0xff]  }
  0x82   :  { %2428 = vmatmul.mubr.bf16.gmra.mrb[32].mxu0 %v5167_v14  ;;  %2010 = vmatprep.mubr.bf16.mxu1 %v5168_v15  ;;  %v5267_v14 = vld [vmem:[%s8411_s0 + $0x3c0] ss:$20 sps:$4 sm:$0xff]   ;;  %v5268_v15 = vld [vmem:[%s8411_s0 + $0x3c8] ss:$20 sps:$4 sm:$0xff]  }
  0x83   :  { %2435 = vmatprep.mubr.bf16.mxu0 %v5170_v16  ;;  %v5269_v16 = vld [vmem:[%s8411_s0 + $0x3ec] ss:$20 sps:$4 sm:$0xff]  }
  0x89   :  { %2011 = vmatmul.mubr.bf16.gmra.mrb[36].mxu1 %v5172_v17  ;;  %v5271_v17 = vld [vmem:[%s8411_s0 + $0x3e8] ss:$20 sps:$4 sm:$0xff]  }
  0x8a   :  { %2436 = vmatmul.mubr.bf16.gmra.mrb[36].mxu0 %v5173_v18  ;;  %2018 = vmatprep.mubr.bf16.mxu1 %v5175_v19  ;;  %v5272_v18 = vld [vmem:[%s8411_s0 + $0x10] ss:$20 sps:$4 sm:$0xff]   ;;  %v5273_v19 = vld [vmem:[%s8411_s0 + $0x414] ss:$20 sps:$4 sm:$0xff]  }
  0x8b   :  { %2443 = vmatprep.mubr.bf16.mxu0 %v5177_v0  ;;  %v5275_v0 = vld [vmem:[%s8411_s0 + $0x410] ss:$20 sps:$4 sm:$0xff]  }
  0x91   :  { %2019 = vmatmul.mubr.bf16.gmra.mrb[40].mxu1 %v5179_v20  ;;  %v5276_v20 = vld [vmem:[%s8411_s0 + $0x38] ss:$20 sps:$4 sm:$0xff]  }
  0x92   :  { %2444 = vmatmul.mubr.bf16.gmra.mrb[40].mxu0 %v5180_v21  ;;  %2026 = vmatprep.mubr.bf16.mxu1 %v5181_v22  ;;  %v5277_v21 = vld [vmem:[%s8411_s0 + $0x43c] ss:$20 sps:$4 sm:$0xff]  }
  0x93   :  { %2451 = vmatprep.mubr.bf16.mxu0 %v5183_v23  ;;  %v5279_v23 = vld [vmem:[%s8411_s0 + $0x438] ss:$20 sps:$4 sm:$0xff]  }
  0x99   :  { %2027 = vmatmul.mubr.bf16.gmra.mrb[44].mxu1 %v5185_v24 }
  0x9a   :  { %2452 = vmatmul.mubr.bf16.gmra.mrb[44].mxu0 %v5186_v25  ;;  %2034 = vmatprep.mubr.bf16.mxu1 %v5187_v26  ;;  %v5280_v25 = vld [vmem:[%s8411_s0 + $0x60] ss:$20 sps:$4 sm:$0xff]  }
  0x9b   :  { %2459 = vmatprep.mubr.bf16.mxu0 %v5189_v27  ;;  %v5281_v27 = vld [vmem:[%s8411_s0 + $0x464] ss:$20 sps:$4 sm:$0xff]  }
  0xa1   :  { %2035 = vmatmul.mubr.bf16.gmra.mrb[48].mxu1 %v5191_v28 }
  0xa2   :  { %2460 = vmatmul.mubr.bf16.gmra.mrb[48].mxu0 %v5192_v29  ;;  %2042 = vmatprep.mubr.bf16.mxu1 %v5194_v30  ;;  %v5283_v30 = vld [vmem:[%s8411_s0 + $0x460] ss:$20 sps:$4 sm:$0xff]  }
  0xa3   :  { %2467 = vmatprep.mubr.bf16.mxu0 %v5196_v31 }
  0xa9   :  { %2043 = vmatmul.mubr.bf16.gmra.mrb[52].mxu1 %v5198_v32  ;;  %v5284_v32 = vld [vmem:[%s8411_s0 + $0x88] ss:$20 sps:$4 sm:$0xff]  }
  0xaa   :  { %2468 = vmatmul.mubr.bf16.gmra.mrb[52].mxu0 %v5199_v33  ;;  %2050 = vmatprep.mubr.bf16.mxu1 %v5200_v34  ;;  %v5285_v34 = vld [vmem:[%s8411_s0 + $0x48c] ss:$20 sps:$4 sm:$0xff]  }
  0xab   :  { %2475 = vmatprep.mubr.bf16.mxu0 %v5202_v35 }
  0xb1   :  { %2051 = vmatmul.mubr.bf16.gmra.mrb[56].mxu1 %v5204_v36 }
  0xb2   :  { %2476 = vmatmul.mubr.bf16.gmra.mrb[56].mxu0 %v5205_v37  ;;  %2058 = vmatprep.mubr.bf16.mxu1 %v5206_v38  ;;  %v5287_v37 = vld [vmem:[%s8411_s0 + $0x488] ss:$20 sps:$4 sm:$0xff]  }
  0xb3   :  { %2483 = vmatprep.mubr.bf16.mxu0 %v5208_v39  ;;  %v5288_v39 = vld [vmem:[%s8411_s0 + $0xb0] ss:$20 sps:$4 sm:$0xff]  }
  0xb9   :  { %2059 = vmatmul.mubr.bf16.gmra.mrb[60].mxu1 %v5210_v41 }
  0xba   :  { %2484 = vmatmul.mubr.bf16.gmra.mrb[60].mxu0 %v5211_v42  ;;  %2066 = vmatprep.mubr.bf16.mxu1 %v5213_v43  ;;  %v5289_v42 = vld [vmem:[%s8411_s0 + $0x4b4] ss:$20 sps:$4 sm:$0xff]  }
  0xbb   :  { %2491 = vmatprep.mubr.bf16.mxu0 %v5215_v44 }
  0xc1   :  { %2067 = vmatmul.mubr.bf16.gmra.mrb[64].mxu1 %v5217_v45  ;;  %v5291_v45 = vld [vmem:[%s8411_s0 + $0x4b0] ss:$20 sps:$4 sm:$0xff]  }
  0xc2   :  { %2492 = vmatmul.mubr.bf16.gmra.mrb[64].mxu0 %v5218_v46  ;;  %2074 = vmatprep.mubr.bf16.mxu1 %v5219_v47  ;;  %v5292_v47 = vld [vmem:[%s8411_s0 + $0xd8] ss:$20 sps:$4 sm:$0xff]  }
  0xc3   :  { %2499 = vmatprep.mubr.bf16.mxu0 %v5221_v48 }
  0xc9   :  { %2075 = vmatmul.mubr.bf16.gmra.mrb[68].mxu1 %v5223_v49  ;;  %v5293_v49 = vld [vmem:[%s8411_s0 + $0x4dc] ss:$20 sps:$4 sm:$0xff]  }
  0xca   :  { %2500 = vmatmul.mubr.bf16.gmra.mrb[68].mxu0 %v5224_v50  ;;  %2082 = vmatprep.mubr.bf16.mxu1 %v5225_v51 }
  0xcb   :  { %2507 = vmatprep.mubr.bf16.mxu0 %v5227_v52  ;;  %v5295_v52 = vld [vmem:[%s8411_s0 + $0x4d8] ss:$20 sps:$4 sm:$0xff]  }
  0xd1   :  { %2083 = vmatmul.mubr.bf16.gmra.mrb[72].mxu1 %v5229_v53 }
  0xd2   :  { %2508 = vmatmul.mubr.bf16.gmra.mrb[72].mxu0 %v5230_v54  ;;  %2090 = vmatprep.mubr.bf16.mxu1 %v5231_v55  ;;  %v5296_v54 = vld [vmem:[%s8411_s0 + $0x100] ss:$20 sps:$4 sm:$0xff]  }
  0xd3   :  { %2515 = vmatprep.mubr.bf16.mxu0 %v5233_v56  ;;  %v5297_v56 = vld [vmem:[%s8411_s0 + $0x504] ss:$20 sps:$4 sm:$0xff]  }
  0xd9   :  { %2091 = vmatmul.mubr.bf16.gmra.mrb[76].mxu1 %v5236_v57 }
  0xda   :  { %2516 = vmatmul.mubr.bf16.gmra.mrb[76].mxu0 %v5237_v58  ;;  %2098 = vmatprep.mubr.bf16.mxu1 %v5238_v59  ;;  %v5299_v59 = vld [vmem:[%s8411_s0 + $0x500] ss:$20 sps:$4 sm:$0xff]  }
  0xdb   :  { %2523 = vmatprep.mubr.bf16.mxu0 %v5240_v60 }
  0xe1   :  { %2099 = vmatmul.mubr.bf16.gmra.mrb[80].mxu1 %v5242_v61  ;;  %v5300_v61 = vld [vmem:[%s8411_s0 + $0x128] ss:$20 sps:$4 sm:$0xff]  }
  0xe2   :  { %2524 = vmatmul.mubr.bf16.gmra.mrb[80].mxu0 %v5243_v62  ;;  %2106 = vmatprep.mubr.bf16.mxu1 %v5244_v63  ;;  %v5301_v63 = vld [vmem:[%s8411_s0 + $0x52c] ss:$20 sps:$4 sm:$0xff]  }
  0xe3   :  { %2531 = vmatprep.mubr.bf16.mxu0 %v5246_v1 }
  0xe9   :  { %2107 = vmatmul.mubr.bf16.gmra.mrb[84].mxu1 %v5248_v2 }
  0xea   :  { %2532 = vmatmul.mubr.bf16.gmra.mrb[84].mxu0 %v5249_v3  ;;  %2114 = vmatprep.mubr.bf16.mxu1 %v5250_v4  ;;  %v5303_v3 = vld [vmem:[%s8411_s0 + $0x528] ss:$20 sps:$4 sm:$0xff]  }
  0xeb   :  { %2539 = vmatprep.mubr.bf16.mxu0 %v5252_v5  ;;  %v5304_v5 = vld [vmem:[%s8411_s0 + $0x150] ss:$20 sps:$4 sm:$0xff]  }
  0xf1   :  { %2115 = vmatmul.mubr.bf16.gmra.mrb[88].mxu1 %v5254_v6 }
  0xf2   :  { %2540 = vmatmul.mubr.bf16.gmra.mrb[88].mxu0 %v5255_v7  ;;  %2122 = vmatprep.mubr.bf16.mxu1 %v5257_v8  ;;  %v5305_v7 = vld [vmem:[%s8411_s0 + $0x554] ss:$20 sps:$4 sm:$0xff]  }
  0xf3   :  { %2547 = vmatprep.mubr.bf16.mxu0 %v5259_v9 }
  0xf9   :  { %2123 = vmatmul.mubr.bf16.gmra.mrb[92].mxu1 %v5261_v10  ;;  %v5307_v10 = vld [vmem:[%s8411_s0 + $0x550] ss:$20 sps:$4 sm:$0xff]  }
  0xfa   :  { %2548 = vmatmul.mubr.bf16.gmra.mrb[92].mxu0 %v5262_v11  ;;  %2130 = vmatprep.mubr.bf16.mxu1 %v5263_v12  ;;  %v5308_v12 = vld [vmem:[%s8411_s0 + $0x178] ss:$20 sps:$4 sm:$0xff]  }
  0xfb   :  { %2555 = vmatprep.mubr.bf16.mxu0 %v5265_v13 }
 0x101   :  { %2131 = vmatmul.mubr.bf16.gmra.mrb[96].mxu1 %v5267_v14  ;;  %v5309_v14 = vld [vmem:[%s8411_s0 + $0x57c] ss:$20 sps:$4 sm:$0xff]  }
 0x102   :  { %2556 = vmatmul.mubr.bf16.gmra.mrb[96].mxu0 %v5268_v15  ;;  %2138 = vmatprep.mubr.bf16.mxu1 %v5269_v16 }
 0x103   :  { %4554 = vmatprep.mubr.msk.bf16.mxu0 %vm5466_vm0, %v5465_v40 }
 0x109   :  { %2139 = vmatmul.mubr.bf16.gmra.mrb[100].mxu1 %v5271_v17  ;;  %v5311_v17 = vld [vmem:[%s8411_s0 + $0x578] ss:$20 sps:$4 sm:$0xff]  }
 0x10a   :  { %4555 = vmatmul.mubr.bf16.vlgmr.msra.gmra.mrb[0].mxu0 %v5272_v18  ;;  %2146 = vmatprep.mubr.bf16.mxu1 %v5273_v19  ;;  %v5312_v19 = vld [vmem:[%s8411_s0 + $0x1a0] ss:$20 sps:$4 sm:$0xff]  }
 0x10b   :  { %4558 = vmatprep.mubr.msk.bf16.mxu0 %vm5466_vm0, %v5465_v40 }
 0x111   :  { %2147 = vmatmul.mubr.bf16.gmra.mrb[104].mxu1 %v5275_v0 }
 0x112   :  { %4559 = vmatmul.mubr.bf16.gmra.mrb[4].mxu0 %v5276_v20  ;;  %2154 = vmatprep.mubr.bf16.mxu1 %v5277_v21  ;;  %v5313_v20 = vld [vmem:[%s8411_s0 + $0x5a4] ss:$20 sps:$4 sm:$0xff]  }
 0x113   :  { %4562 = vmatprep.mubr.msk.bf16.mxu0 %vm5466_vm0, %v5465_v40 }
 0x114   :  { %v6059_v22 = vpop.f32.mrb[0].mxu1 }
 0x115   :  { %v1942_v24 = vpop.f32.mrb[1].mxu1 }
 0x116   :  { %v6067_v26 = vpop.f32.mrb[2].mxu1  ;;  %v5315_v24 = vld [vmem:[%s8411_s0 + $0x5a0] ss:$20 sps:$4 sm:$0xff]  }
 0x117   :  { %v1945_v28 = vpop.f32.mrb[3].mxu1 }
 0x119   :  { %2155 = vmatmul.mubr.bf16.gmra.mrb[108].mxu1 %v5279_v23 }
 0x11a   :  { %4563 = vmatmul.mubr.bf16.gmra.mrb[8].mxu0 %v5280_v25  ;;  %2162 = vmatprep.mubr.bf16.mxu1 %v5281_v27  ;;  %v5316_v27 = vld [vmem:[%s8411_s0 + $0x1c8] ss:$20 sps:$4 sm:$0xff]  }
 0x11b   :  { %4566 = vmatprep.mubr.msk.bf16.mxu0 %vm5466_vm0, %v5465_v40 }
 0x11c   :  { %v6074_v29 = vpop.f32.mrb[4].mxu1 }
 0x11d   :  { %v1950_v31 = vpop.f32.mrb[5].mxu1 }
 0x11e   :  { %v6082_v33 = vpop.f32.mrb[6].mxu1 }
 0x11f   :  { %v1953_v35 = vpop.f32.mrb[7].mxu1 }
 0x121   :  { %2163 = vmatmul.mubr.bf16.gmra.mrb[112].mxu1 %v5283_v30  ;;  %v5317_v30 = vld [vmem:[%s8411_s0 + $0x5cc] ss:$20 sps:$4 sm:$0xff]  }
 0x122   :  { %4567 = vmatmul.mubr.bf16.gmra.mrb[12].mxu0 %v5284_v32  ;;  %2170 = vmatprep.mubr.bf16.mxu1 %v5285_v34  ;;  %v5319_v34 = vld [vmem:[%s8411_s0 + $0x5c8] ss:$20 sps:$4 sm:$0xff]  }
 0x123   :  { %4570 = vmatprep.mubr.msk.bf16.mxu0 %vm5466_vm0, %v5465_v40 }
 0x124   :  { %v6089_v36 = vpop.f32.mrb[8].mxu1 }
 0x125   :  { %v1958_v38 = vpop.f32.mrb[9].mxu1 }
 0x126   :  { %v6097_v41 = vpop.f32.mrb[10].mxu1 }
 0x127   :  { %v1961_v43 = vpop.f32.mrb[11].mxu1 }
 0x129   :  { %2171 = vmatmul.mubr.bf16.gmra.mrb[116].mxu1 %v5287_v37  ;;  %v5320_v37 = vld [vmem:[%s8411_s0 + $0x1f0] ss:$20 sps:$4 sm:$0xff]  }
 0x12a   :  { %4571 = vmatmul.mubr.bf16.gmra.mrb[16].mxu0 %v5288_v39  ;;  %2178 = vmatprep.mubr.bf16.mxu1 %v5289_v42  ;;  %v5321_v39 = vld [vmem:[%s8411_s0 + $0x5f4] ss:$20 sps:$4 sm:$0xff]  }
 0x12b   :  { %4574 = vmatprep.mubr.msk.bf16.mxu0 %vm5466_vm0, %v5465_v40 }
 0x12c   :  { %v6104_v44 = vpop.f32.mrb[12].mxu1 }
 0x12d   :  { %v1966_v46 = vpop.f32.mrb[13].mxu1 }
 0x12e   :  { %v6112_v48 = vpop.f32.mrb[14].mxu1 }
 0x12f   :  { %v1969_v50 = vpop.f32.mrb[15].mxu1 }
 0x130   :  { %v5325_v50 = vld [vmem:[%s8411_s0 + $0x61c] ss:$20 sps:$4 sm:$0xff]  }
 0x131   :  { %2179 = vmatmul.mubr.bf16.gmra.mrb[120].mxu1 %v5291_v45  ;;  %v5323_v45 = vld [vmem:[%s8411_s0 + $0x5f0] ss:$20 sps:$4 sm:$0xff]  }
 0x132   :  { %4575 = vmatmul.mubr.bf16.gmra.mrb[20].mxu0 %v5292_v47  ;;  %2186 = vmatprep.mubr.bf16.mxu1 %v5293_v49  ;;  %v5324_v47 = vld [vmem:[%s8411_s0 + $0x218] ss:$20 sps:$4 sm:$0xff]  }
 0x133   :  { %4578 = vmatprep.mubr.msk.bf16.mxu0 %vm5466_vm0, %v5465_v40 }
 0x134   :  { %v6119_v51 = vpop.f32.mrb[16].mxu1 }
 0x135   :  { %v1974_v53 = vpop.f32.mrb[17].mxu1 }
 0x136   :  { %v6127_v55 = vpop.f32.mrb[18].mxu1 }
 0x137   :  { %v1977_v57 = vpop.f32.mrb[19].mxu1 }
 0x138   :  { %v5328_v57 = vld [vmem:[%s8411_s0 + $0x240] ss:$20 sps:$4 sm:$0xff]  }
 0x139   :  { %2187 = vmatmul.mubr.bf16.gmra.mrb[124].mxu1 %v5295_v52 }
 0x13a   :  { %4579 = vmatmul.mubr.bf16.gmra.mrb[24].mxu0 %v5296_v54  ;;  %2194 = vmatprep.mubr.bf16.mxu1 %v5297_v56  ;;  %v5327_v54 = vld [vmem:[%s8411_s0 + $0x618] ss:$20 sps:$4 sm:$0xff]  }
 0x13b   :  { %4582 = vmatprep.mubr.msk.bf16.mxu0 %vm5466_vm0, %v5465_v40 }
 0x13c   :  { %v6134_v58 = vpop.f32.mrb[20].mxu1 }
 0x13d   :  { %v1982_v60 = vpop.f32.mrb[21].mxu1 }
 0x13e   :  { %v6142_v62 = vpop.f32.mrb[22].mxu1  ;;  %v5329_v60 = vld [vmem:[%s8411_s0 + $0x644] ss:$20 sps:$4 sm:$0xff]  }
 0x13f   :  { %v1985_v1 = vpop.f32.mrb[23].mxu1 }
 0x140   :  { %v5331_v1 = vld [vmem:[%s8411_s0 + $0x640] ss:$20 sps:$4 sm:$0xff]  }
 0x141   :  { %2195 = vmatmul.mubr.bf16.gmra.mrb[128].mxu1 %v5299_v59 }
 0x142   :  { %4583 = vmatmul.mubr.bf16.gmra.mrb[28].mxu0 %v5300_v61  ;;  %2202 = vmatprep.mubr.bf16.mxu1 %v5301_v63 }
 0x143   :  { %4586 = vmatprep.mubr.msk.bf16.mxu0 %vm5466_vm0, %v5465_v40 }
 0x144   :  { %v6149_v2 = vpop.f32.mrb[24].mxu1 }
 0x145   :  { %v1990_v4 = vpop.f32.mrb[25].mxu1 }
 0x146   :  { %v6157_v6 = vpop.f32.mrb[26].mxu1  ;;  %v5332_v4 = vld [vmem:[%s8411_s0 + $0x268] ss:$20 sps:$4 sm:$0xff]  }
 0x147   :  { %v1993_v8 = vpop.f32.mrb[27].mxu1 }
 0x149   :  { %2203 = vmatmul.mubr.bf16.gmra.mrb[132].mxu1 %v5303_v3 }
 0x14a   :  { %4587 = vmatmul.mubr.bf16.gmra.mrb[32].mxu0 %v5304_v5  ;;  %2210 = vmatprep.mubr.bf16.mxu1 %v5305_v7  ;;  %v5333_v7 = vld [vmem:[%s8411_s0 + $0x66c] ss:$20 sps:$4 sm:$0xff]  }
 0x14b   :  { %4590 = vmatprep.mubr.msk.bf16.mxu0 %vm5466_vm0, %v5465_v40 }
 0x14c   :  { %v6164_v9 = vpop.f32.mrb[28].mxu1 }
 0x14d   :  { %v1998_v11 = vpop.f32.mrb[29].mxu1 }
 0x14e   :  { %v6172_v13 = vpop.f32.mrb[30].mxu1  ;;  %v5335_v11 = vld [vmem:[%s8411_s0 + $0x668] ss:$20 sps:$4 sm:$0xff]  }
 0x14f   :  { %v2001_v15 = vpop.f32.mrb[31].mxu1 }
 0x151   :  { %2211 = vmatmul.mubr.bf16.gmra.mrb[136].mxu1 %v5307_v10 }
 0x152   :  { %4591 = vmatmul.mubr.bf16.gmra.mrb[36].mxu0 %v5308_v12  ;;  %2218 = vmatprep.mubr.bf16.mxu1 %v5309_v14  ;;  %v5336_v14 = vld [vmem:[%s8411_s0 + $0x290] ss:$20 sps:$4 sm:$0xff]  }
 0x153   :  { %4594 = vmatprep.mubr.msk.bf16.mxu0 %vm5466_vm0, %v5465_v40 }
 0x154   :  { %v6179_v16 = vpop.f32.mrb[32].mxu1 }
 0x155   :  { %v2006_v18 = vpop.f32.mrb[33].mxu1 }
 0x156   :  { %v6187_v0 = vpop.f32.mrb[34].mxu1 }
 0x157   :  { %v2009_v21 = vpop.f32.mrb[35].mxu1 }
 0x159   :  { %2219 = vmatmul.mubr.bf16.gmra.mrb[140].mxu1 %v5311_v17  ;;  %v5337_v17 = vld [vmem:[%s8411_s0 + $0x694] ss:$20 sps:$4 sm:$0xff]  }
 0x15a   :  { %4595 = vmatmul.mubr.bf16.gmra.mrb[40].mxu0 %v5312_v19  ;;  %2226 = vmatprep.mubr.bf16.mxu1 %v5313_v20  ;;  %v5339_v20 = vld [vmem:[%s8411_s0 + $0x690] ss:$20 sps:$4 sm:$0xff]  }
 0x15b   :  { %4598 = vmatprep.mubr.msk.bf16.mxu0 %vm5466_vm0, %v5465_v40 }
 0x15c   :  { %v6194_v23 = vpop.f32.mrb[36].mxu1 }
 0x15d   :  { %v2014_v25 = vpop.f32.mrb[37].mxu1 }
 0x15e   :  { %v6202_v28 = vpop.f32.mrb[38].mxu1 }
 0x15f   :  { %v2017_v31 = vpop.f32.mrb[39].mxu1 }
 0x161   :  { %2227 = vmatmul.mubr.bf16.gmra.mrb[144].mxu1 %v5315_v24  ;;  %v5340_v24 = vld [vmem:[%s8411_s0 + $0x2b8] ss:$20 sps:$4 sm:$0xff]  }
 0x162   :  { %4599 = vmatmul.mubr.bf16.gmra.mrb[44].mxu0 %v5316_v27  ;;  %2234 = vmatprep.mubr.bf16.mxu1 %v5317_v30  ;;  %v5341_v27 = vld [vmem:[%s8411_s0 + $0x6bc] ss:$20 sps:$4 sm:$0xff]  }
 0x163   :  { %4602 = vmatprep.mubr.msk.bf16.mxu0 %vm5466_vm0, %v5465_v40 }
 0x164   :  { %v6209_v32 = vpop.f32.mrb[40].mxu1 }
 0x165   :  { %v2022_v35 = vpop.f32.mrb[41].mxu1 }
 0x166   :  { %v6217_v38 = vpop.f32.mrb[42].mxu1 }
 0x167   :  { %v2025_v42 = vpop.f32.mrb[43].mxu1 }
 0x168   :  { %v5345_v42 = vld [vmem:[%s8411_s0 + $0x6e4] ss:$20 sps:$4 sm:$0xff]  }
 0x169   :  { %2235 = vmatmul.mubr.bf16.gmra.mrb[148].mxu1 %v5319_v34  ;;  %v5343_v34 = vld [vmem:[%s8411_s0 + $0x6b8] ss:$20 sps:$4 sm:$0xff]  }
 0x16a   :  { %4603 = vmatmul.mubr.bf16.gmra.mrb[48].mxu0 %v5320_v37  ;;  %2242 = vmatprep.mubr.bf16.mxu1 %v5321_v39  ;;  %v5344_v37 = vld [vmem:[%s8411_s0 + $0x2e0] ss:$20 sps:$4 sm:$0xff]  }
 0x16b   :  { %4606 = vmatprep.mubr.msk.bf16.mxu0 %vm5466_vm0, %v5465_v40 }
 0x16c   :  { %v6224_v43 = vpop.f32.mrb[44].mxu1 }
 0x16d   :  { %v2030_v46 = vpop.f32.mrb[45].mxu1 }
 0x16e   :  { %v6232_v49 = vpop.f32.mrb[46].mxu1 }
 0x16f   :  { %v2033_v52 = vpop.f32.mrb[47].mxu1 }
 0x170   :  { %v5348_v52 = vld [vmem:[%s8411_s0 + $0x308] ss:$20 sps:$4 sm:$0xff]  }
 0x171   :  { %2243 = vmatmul.mubr.bf16.gmra.mrb[152].mxu1 %v5323_v45 }
 0x172   :  { %4607 = vmatmul.mubr.bf16.gmra.mrb[52].mxu0 %v5324_v47  ;;  %2250 = vmatprep.mubr.bf16.mxu1 %v5325_v50  ;;  %v5347_v47 = vld [vmem:[%s8411_s0 + $0x6e0] ss:$20 sps:$4 sm:$0xff]  }
 0x173   :  { %4610 = vmatprep.mubr.msk.bf16.mxu0 %vm5466_vm0, %v5465_v40 }
 0x174   :  { %v6239_v53 = vpop.f32.mrb[48].mxu1 }
 0x175   :  { %v2038_v56 = vpop.f32.mrb[49].mxu1 }
 0x176   :  { %v6247_v59 = vpop.f32.mrb[50].mxu1  ;;  %v5349_v56 = vld [vmem:[%s8411_s0 + $0x70c] ss:$20 sps:$4 sm:$0xff]  }
 0x177   :  { %v2041_v61 = vpop.f32.mrb[51].mxu1 }
 0x178   :  { %v5351_v61 = vld [vmem:[%s8411_s0 + $0x708] ss:$20 sps:$4 sm:$0xff]  }
 0x179   :  { %2251 = vmatmul.mubr.bf16.gmra.mrb[156].mxu1 %v5327_v54 }
 0x17a   :  { %4611 = vmatmul.mubr.bf16.gmra.mrb[56].mxu0 %v5328_v57  ;;  %2258 = vmatprep.mubr.bf16.mxu1 %v5329_v60 }
 0x17b   :  { %4614 = vmatprep.mubr.msk.bf16.mxu0 %vm5466_vm0, %v5465_v40 }
 0x17c   :  { %v6254_v63 = vpop.f32.mrb[52].mxu1 }
 0x17d   :  { %v2046_v3 = vpop.f32.mrb[53].mxu1 }
 0x17e   :  { %v6262_v5 = vpop.f32.mrb[54].mxu1  ;;  %v5352_v3 = vld [vmem:[%s8411_s0 + $0x330] ss:$20 sps:$4 sm:$0xff]  }
 0x17f   :  { %v2049_v8 = vpop.f32.mrb[55].mxu1 }
 0x181   :  { %2259 = vmatmul.mubr.bf16.gmra.mrb[160].mxu1 %v5331_v1 }
 0x182   :  { %4615 = vmatmul.mubr.bf16.gmra.mrb[60].mxu0 %v5332_v4  ;;  %2266 = vmatprep.mubr.bf16.mxu1 %v5333_v7  ;;  %v5353_v7 = vld [vmem:[%s8411_s0 + $0x734] ss:$20 sps:$4 sm:$0xff]  }
 0x183   :  { %4618 = vmatprep.mubr.msk.bf16.mxu0 %vm5466_vm0, %v5465_v40 }
 0x184   :  { %v6269_v10 = vpop.f32.mrb[56].mxu1 }
 0x185   :  { %v2054_v12 = vpop.f32.mrb[57].mxu1 }
 0x186   :  { %v6277_v15 = vpop.f32.mrb[58].mxu1  ;;  %v5355_v12 = vld [vmem:[%s8411_s0 + $0x730] ss:$20 sps:$4 sm:$0xff]  }
 0x187   :  { %v2057_v18 = vpop.f32.mrb[59].mxu1 }
 0x189   :  { %2267 = vmatmul.mubr.bf16.gmra.mrb[164].mxu1 %v5335_v11 }
 0x18a   :  { %4619 = vmatmul.mubr.bf16.gmra.mrb[64].mxu0 %v5336_v14  ;;  %2274 = vmatprep.mubr.bf16.mxu1 %v5337_v17  ;;  %v5356_v17 = vld [vmem:[%s8411_s0 + $0x358] ss:$20 sps:$4 sm:$0xff]  }
 0x18b   :  { %4622 = vmatprep.mubr.msk.bf16.mxu0 %vm5466_vm0, %v5465_v40 }
 0x18c   :  { %v6284_v19 = vpop.f32.mrb[60].mxu1 }
 0x18d   :  { %v2062_v21 = vpop.f32.mrb[61].mxu1 }
 0x18e   :  { %v6292_v25 = vpop.f32.mrb[62].mxu1 }
 0x18f   :  { %v2065_v30 = vpop.f32.mrb[63].mxu1 }
 0x191   :  { %2275 = vmatmul.mubr.bf16.gmra.mrb[168].mxu1 %v5339_v20  ;;  %v5357_v20 = vld [vmem:[%s8411_s0 + $0x75c] ss:$20 sps:$4 sm:$0xff]  }
 0x192   :  { %4623 = vmatmul.mubr.bf16.gmra.mrb[68].mxu0 %v5340_v24  ;;  %2282 = vmatprep.mubr.bf16.mxu1 %v5341_v27  ;;  %v5359_v27 = vld [vmem:[%s8411_s0 + $0x758] ss:$20 sps:$4 sm:$0xff]  }
 0x193   :  { %4626 = vmatprep.mubr.msk.bf16.mxu0 %vm5466_vm0, %v5465_v40 }
 0x194   :  { %v6299_v31 = vpop.f32.mrb[64].mxu1 }
 0x195   :  { %v2070_v35 = vpop.f32.mrb[65].mxu1 }
 0x196   :  { %v6307_v39 = vpop.f32.mrb[66].mxu1 }
 0x197   :  { %v2073_v45 = vpop.f32.mrb[67].mxu1 }
 0x199   :  { %2283 = vmatmul.mubr.bf16.gmra.mrb[172].mxu1 %v5343_v34  ;;  %v5360_v34 = vld [vmem:[%s8411_s0 + $0x380] ss:$20 sps:$4 sm:$0xff]  }
 0x19a   :  { %4627 = vmatmul.mubr.bf16.gmra.mrb[72].mxu0 %v5344_v37  ;;  %2290 = vmatprep.mubr.bf16.mxu1 %v5345_v42  ;;  %v5361_v37 = vld [vmem:[%s8411_s0 + $0x784] ss:$20 sps:$4 sm:$0xff]  }
 0x19b   :  { %4630 = vmatprep.mubr.msk.bf16.mxu0 %vm5466_vm0, %v5465_v40 }
 0x19c   :  { %v6314_v46 = vpop.f32.mrb[68].mxu1 }
 0x19d   :  { %v2078_v50 = vpop.f32.mrb[69].mxu1 }
 0x19e   :  { %v6322_v54 = vpop.f32.mrb[70].mxu1 }
 0x19f   :  { %v2081_v57 = vpop.f32.mrb[71].mxu1 }
 0x1a0   :  { %v5367_v57 = vld [vmem:[%s8411_s0 + $0x3f4] ss:$20 sps:$4 sm:$0xff]  }
 0x1a1   :  { %2291 = vmatmul.mubr.bf16.gmra.mrb[176].mxu1 %v5347_v47  ;;  %v5363_v47 = vld [vmem:[%s8411_s0 + $0x780] ss:$20 sps:$4 sm:$0xff]  }
 0x1a2   :  { %4631 = vmatmul.mubr.bf16.gmra.mrb[76].mxu0 %v5348_v52  ;;  %2298 = vmatprep.mubr.bf16.mxu1 %v5349_v56  ;;  %v5364_v52 = vld [vmem:[%s8411_s0 + $0x3a8] ss:$20 sps:$4 sm:$0xff]  }
 0x1a3   :  { %4634 = vmatprep.mubr.msk.bf16.mxu0 %vm5466_vm0, %v5465_v40 }
 0x1a4   :  { %v6329_v60 = vpop.f32.mrb[72].mxu1 }
 0x1a5   :  { %v2086_v1 = vpop.f32.mrb[73].mxu1 }
 0x1a6   :  { %v6337_v4 = vpop.f32.mrb[74].mxu1 }
 0x1a7   :  { %v2089_v8 = vpop.f32.mrb[75].mxu1 }
 0x1a8   :  { %v5368_v8 = vld [vmem:[%s8411_s0 + $0x3d0] ss:$20 sps:$4 sm:$0xff]  }
 0x1a9   :  { %2299 = vmatmul.mubr.bf16.gmra.mrb[180].mxu1 %v5351_v61 }
 0x1aa   :  { %4635 = vmatmul.mubr.bf16.gmra.mrb[80].mxu0 %v5352_v3  ;;  %2306 = vmatprep.mubr.bf16.mxu1 %v5353_v7  ;;  %v5365_v3 = vld [vmem:[%s8411_s0 + $0x3f0] ss:$20 sps:$4 sm:$0xff]  }
 0x1ab   :  { %4638 = vmatprep.mubr.msk.bf16.mxu0 %vm5466_vm0, %v5465_v40 }
 0x1ac   :  { %v6344_v11 = vpop.f32.mrb[76].mxu1 }
 0x1ad   :  { %v2094_v14 = vpop.f32.mrb[77].mxu1 }
 0x1ae   :  { %v6352_v18 = vpop.f32.mrb[78].mxu1  ;;  %v5369_v14 = vld [vmem:[%s8411_s0 + $0x41c] ss:$20 sps:$4 sm:$0xff]  }
 0x1af   :  { %v2097_v21 = vpop.f32.mrb[79].mxu1 }
 0x1b0   :  { %v5371_v21 = vld [vmem:[%s8411_s0 + $0x418] ss:$20 sps:$4 sm:$0xff]  }
 0x1b1   :  { %2307 = vmatmul.mubr.bf16.gmra.mrb[184].mxu1 %v5355_v12 }
 0x1b2   :  { %4639 = vmatmul.mubr.bf16.gmra.mrb[84].mxu0 %v5356_v17  ;;  %2314 = vmatprep.mubr.bf16.mxu1 %v5357_v20 }
 0x1b3   :  { %4642 = vmatprep.mubr.msk.bf16.mxu0 %vm5466_vm0, %v5465_v40 }
 0x1b4   :  { %v6359_v24 = vpop.f32.mrb[80].mxu1 }
 0x1b5   :  { %v2102_v30 = vpop.f32.mrb[81].mxu1 }
 0x1b6   :  { %v6367_v35 = vpop.f32.mrb[82].mxu1  ;;  %v5372_v30 = vld [vmem:[%s8411_s0 + $0x3f8] ss:$20 sps:$4 sm:$0xff]  }
 0x1b7   :  { %v2105_v42 = vpop.f32.mrb[83].mxu1 }
 0x1b9   :  { %2315 = vmatmul.mubr.bf16.gmra.mrb[188].mxu1 %v5359_v27 }
 0x1ba   :  { %4643 = vmatmul.mubr.bf16.gmra.mrb[88].mxu0 %v5360_v34  ;;  %2322 = vmatprep.mubr.bf16.mxu1 %v5361_v37  ;;  %v5373_v37 = vld [vmem:[%s8411_s0 + $0x444] ss:$20 sps:$4 sm:$0xff]  }
 0x1bb   :  { %4646 = vmatprep.mubr.msk.bf16.mxu0 %vm5466_vm0, %v5465_v40 }
 0x1bc   :  { %v6374_v45 = vpop.f32.mrb[84].mxu1 }
 0x1bd   :  { %v2110_v50 = vpop.f32.mrb[85].mxu1 }
 0x1be   :  { %v6382_v56 = vpop.f32.mrb[86].mxu1  ;;  %v5375_v50 = vld [vmem:[%s8411_s0 + $0x440] ss:$20 sps:$4 sm:$0xff]  }
 0x1bf   :  { %v2113_v61 = vpop.f32.mrb[87].mxu1 }
 0x1c1   :  { %2323 = vmatmul.mubr.bf16.gmra.mrb[192].mxu1 %v5363_v47 }
 0x1c2   :  { %4647 = vmatmul.mubr.bf16.gmra.mrb[92].mxu0 %v5364_v52  ;;  %2563 = vmatprep.mubr.bf16.mxu1 %v5367_v57  ;;  %v5376_v57 = vld [vmem:[%s8411_s0 + $0x420] ss:$20 sps:$4 sm:$0xff]  }
 0x1c3   :  { %4650 = vmatprep.mubr.msk.bf16.mxu0 %vm5466_vm0, %v5465_v40 }
 0x1c4   :  { %v6389_v1 = vpop.f32.mrb[88].mxu1 }
 0x1c5   :  { %v2118_v7 = vpop.f32.mrb[89].mxu1 }
 0x1c6   :  { %v6397_v12 = vpop.f32.mrb[90].mxu1 }
 0x1c7   :  { %v2121_v17 = vpop.f32.mrb[91].mxu1 }
 0x1c9   :  { %2564 = vmatmul.mubr.bf16.vlgmr.msra.gmra.mrb[100].mxu1 %v5365_v3  ;;  %v5377_v3 = vld [vmem:[%s8411_s0 + $0x46c] ss:$20 sps:$4 sm:$0xff]  }
 0x1ca   :  { %4651 = vmatmul.mubr.bf16.gmra.mrb[96].mxu0 %v5368_v8  ;;  %2571 = vmatprep.mubr.bf16.mxu1 %v5369_v14  ;;  %v5379_v14 = vld [vmem:[%s8411_s0 + $0x468] ss:$20 sps:$4 sm:$0xff]  }
 0x1cb   :  { %4654 = vmatprep.mubr.msk.bf16.mxu0 %vm5466_vm0, %v5465_v40 }
 0x1cc   :  { %v6404_v20 = vpop.f32.mrb[92].mxu1 }
 0x1cd   :  { %v2126_v27 = vpop.f32.mrb[93].mxu1 }
 0x1ce   :  { %v6412_v34 = vpop.f32.mrb[94].mxu1  ;;  %v5380_v27 = vld [vmem:[%s8411_s0 + $0x448] ss:$20 sps:$4 sm:$0xff]  }
 0x1cf   :  { %v2129_v42 = vpop.f32.mrb[95].mxu1 }
 0x1d1   :  { %2572 = vmatmul.mubr.bf16.gmra.mrb[104].mxu1 %v5371_v21 }
 0x1d2   :  { %4655 = vmatmul.mubr.bf16.gmra.mrb[100].mxu0 %v5372_v30  ;;  %2579 = vmatprep.mubr.bf16.mxu1 %v5373_v37  ;;  %v5381_v30 = vld [vmem:[%s8411_s0 + $0x494] ss:$20 sps:$4 sm:$0xff]  }
 0x1d3   :  { %4658 = vmatprep.mubr.msk.bf16.mxu0 %vm5466_vm0, %v5465_v40 }
 0x1d4   :  { %v6419_v47 = vpop.f32.mrb[96].mxu1 }
 0x1d5   :  { %v2134_v52 = vpop.f32.mrb[97].mxu1 }
 0x1d6   :  { %v6427_v61 = vpop.f32.mrb[98].mxu1  ;;  %v5383_v52 = vld [vmem:[%s8411_s0 + $0x490] ss:$20 sps:$4 sm:$0xff]  }
 0x1d7   :  { %v2137_v7 = vpop.f32.mrb[99].mxu1 }
 0x1d8   :  { %v5385_v7 = vld [vmem:[%s8411_s0 + $0x4bc] ss:$20 sps:$4 sm:$0xff]  }
 0x1d9   :  { %2580 = vmatmul.mubr.bf16.gmra.mrb[108].mxu1 %v5375_v50 }
 0x1da   :  { %4659 = vmatmul.mubr.bf16.gmra.mrb[104].mxu0 %v5376_v57  ;;  %2587 = vmatprep.mubr.bf16.mxu1 %v5377_v3 }
 0x1db   :  { %4662 = vmatprep.mubr.msk.bf16.mxu0 %vm5466_vm0, %v5465_v40 }
 0x1dd   :  { %v2790_v8 = vpop.f32.mrb[0].mxu0 }
 0x1de   :  { %v6438_v17 = vadd.f32 %v2790_v8, %v6059_v22  ;;  %v4556_v21 = vpop.f32.mrb[1].mxu0 }
 0x1df   :  { %v2793_v37 = vpop.f32.mrb[2].mxu0 }
 0x1e0   :  { %v6447_v42 = vadd.f32 %v2793_v37, %v6067_v26  ;;  %v4557_v50 = vpop.f32.mrb[3].mxu0  ;;  %v5384_v26 = vld [vmem:[%s8411_s0 + $0x470] ss:$20 sps:$4 sm:$0xff]  }
 0x1e1   :  { %2588 = vmatmul.mubr.bf16.gmra.mrb[112].mxu1 %v5379_v14  ;;  %v5389_v50 = vld [vmem:[%s8411_s0 + $0x4e4] ss:$20 sps:$4 sm:$0xff]  }
 0x1e2   :  { %4663 = vmatmul.mubr.bf16.gmra.mrb[108].mxu0 %v5380_v27  ;;  %2595 = vmatprep.mubr.bf16.mxu1 %v5381_v30  ;;  %v5387_v27 = vld [vmem:[%s8411_s0 + $0x4b8] ss:$20 sps:$4 sm:$0xff]  }
 0x1e3   :  { %4666 = vmatprep.mubr.msk.bf16.mxu0 %vm5466_vm0, %v5465_v40 }
 0x1e5   :  { %v2798_v22 = vpop.f32.mrb[4].mxu0 }
 0x1e6   :  { %v6455_v57 = vadd.f32 %v2798_v22, %v6074_v29  ;;  %v4560_v3 = vpop.f32.mrb[5].mxu0 }
 0x1e7   :  { %v2801_v8 = vpop.f32.mrb[6].mxu0 }
 0x1e8   :  { %8540 = vst [vmem:[#allocation3_spill] sm:$0xff] %v6455_v57  ;;  %v6464_v14 = vadd.f32 %v2801_v8, %v6082_v33  ;;  %v4561_v21 = vpop.f32.mrb[7].mxu0  ;;  %v5388_v33 = vld [vmem:[%s8411_s0 + $0x498] ss:$20 sps:$4 sm:$0xff]  }
 0x1e9   :  { %2596 = vmatmul.mubr.bf16.gmra.mrb[116].mxu1 %v5383_v52  ;;  %v5393_v21 = vld [vmem:[%s8411_s0 + $0x50c] ss:$20 sps:$4 sm:$0xff]  }
 0x1ea   :  { %8541 = vst [vmem:[#allocation4_spill] sm:$0xff] %v6464_v14  ;;  %4667 = vmatmul.mubr.bf16.gmra.mrb[112].mxu0 %v5384_v26  ;;  %2603 = vmatprep.mubr.bf16.mxu1 %v5385_v7  ;;  %v5391_v26 = vld [vmem:[%s8411_s0 + $0x4e0] ss:$20 sps:$4 sm:$0xff]  }
 0x1eb   :  { %4670 = vmatprep.mubr.msk.bf16.mxu0 %vm5466_vm0, %v5465_v40 }
 0x1ed   :  { %v2806_v29 = vpop.f32.mrb[8].mxu0 }
 0x1ee   :  { %v6472_v30 = vadd.f32 %v2806_v29, %v6089_v36  ;;  %v4564_v37 = vpop.f32.mrb[9].mxu0 }
 0x1ef   :  { %v2809_v22 = vpop.f32.mrb[10].mxu0 }
 0x1f0   :  { %8542 = vst [vmem:[#allocation5_spill] sm:$0xff] %v6472_v30  ;;  %v6481_v52 = vadd.f32 %v2809_v22, %v6097_v41  ;;  %v4565_v3 = vpop.f32.mrb[11].mxu0  ;;  %v5392_v41 = vld [vmem:[%s8411_s0 + $0x4c0] ss:$20 sps:$4 sm:$0xff]  }
 0x1f1   :  { %2604 = vmatmul.mubr.bf16.gmra.mrb[120].mxu1 %v5387_v27  ;;  %v5397_v3 = vld [vmem:[%s8411_s0 + $0x534] ss:$20 sps:$4 sm:$0xff]  }
 0x1f2   :  { %4671 = vmatmul.mubr.bf16.gmra.mrb[116].mxu0 %v5388_v33  ;;  %2611 = vmatprep.mubr.bf16.mxu1 %v5389_v50  ;;  %v5395_v33 = vld [vmem:[%s8411_s0 + $0x508] ss:$20 sps:$4 sm:$0xff]  }
 0x1f3   :  { %4674 = vmatprep.mubr.msk.bf16.mxu0 %vm5466_vm0, %v5465_v40 }
 0x1f5   :  { %v2814_v36 = vpop.f32.mrb[12].mxu0 }
 0x1f6   :  { %v6489_v7 = vadd.f32 %v2814_v36, %v6104_v44  ;;  %v4568_v8 = vpop.f32.mrb[13].mxu0 }
 0x1f7   :  { %v2817_v29 = vpop.f32.mrb[14].mxu0 }
 0x1f8   :  { %v6498_v27 = vadd.f32 %v2817_v29, %v6112_v48  ;;  %v4569_v37 = vpop.f32.mrb[15].mxu0  ;;  %v5396_v48 = vld [vmem:[%s8411_s0 + $0x4e8] ss:$20 sps:$4 sm:$0xff]  }
 0x1f9   :  { %2612 = vmatmul.mubr.bf16.gmra.mrb[124].mxu1 %v5391_v26  ;;  %v5401_v37 = vld [vmem:[%s8411_s0 + $0x55c] ss:$20 sps:$4 sm:$0xff]  }
 0x1fa   :  { %4675 = vmatmul.mubr.bf16.gmra.mrb[120].mxu0 %v5392_v41  ;;  %2619 = vmatprep.mubr.bf16.mxu1 %v5393_v21  ;;  %v5399_v41 = vld [vmem:[%s8411_s0 + $0x530] ss:$20 sps:$4 sm:$0xff]  }
 0x1fb   :  { %4678 = vmatprep.mubr.msk.bf16.mxu0 %vm5466_vm0, %v5465_v40 }
 0x1fd   :  { %v2822_v44 = vpop.f32.mrb[16].mxu0 }
 0x1fe   :  { %v6506_v50 = vadd.f32 %v2822_v44, %v6119_v51  ;;  %v4572_v22 = vpop.f32.mrb[17].mxu0 }
 0x1ff   :  { %v2825_v36 = vpop.f32.mrb[18].mxu0 }
 0x200   :  { %v6515_v26 = vadd.f32 %v2825_v36, %v6127_v55  ;;  %v4573_v8 = vpop.f32.mrb[19].mxu0  ;;  %v5400_v55 = vld [vmem:[%s8411_s0 + $0x510] ss:$20 sps:$4 sm:$0xff]  }
 0x201   :  { %2620 = vmatmul.mubr.bf16.gmra.mrb[128].mxu1 %v5395_v33  ;;  %v5405_v8 = vld [vmem:[%s8411_s0 + $0x584] ss:$20 sps:$4 sm:$0xff]  }
 0x202   :  { %4679 = vmatmul.mubr.bf16.gmra.mrb[124].mxu0 %v5396_v48  ;;  %2627 = vmatprep.mubr.bf16.mxu1 %v5397_v3  ;;  %v5403_v48 = vld [vmem:[%s8411_s0 + $0x558] ss:$20 sps:$4 sm:$0xff]  }
 0x203   :  { %4682 = vmatprep.mubr.msk.bf16.mxu0 %vm5466_vm0, %v5465_v40 }
 0x205   :  { %v2830_v51 = vpop.f32.mrb[20].mxu0 }
 0x206   :  { %v6523_v21 = vadd.f32 %v2830_v51, %v6134_v58  ;;  %v4576_v29 = vpop.f32.mrb[21].mxu0 }
 0x207   :  { %v2833_v44 = vpop.f32.mrb[22].mxu0 }
 0x208   :  { %v6532_v33 = vadd.f32 %v2833_v44, %v6142_v62  ;;  %v4577_v22 = vpop.f32.mrb[23].mxu0  ;;  %v5404_v62 = vld [vmem:[%s8411_s0 + $0x538] ss:$20 sps:$4 sm:$0xff]  }
 0x209   :  { %2628 = vmatmul.mubr.bf16.gmra.mrb[132].mxu1 %v5399_v41  ;;  %v5409_v22 = vld [vmem:[%s8411_s0 + $0x5ac] ss:$20 sps:$4 sm:$0xff]  }
 0x20a   :  { %4683 = vmatmul.mubr.bf16.gmra.mrb[128].mxu0 %v5400_v55  ;;  %2635 = vmatprep.mubr.bf16.mxu1 %v5401_v37  ;;  %v5407_v55 = vld [vmem:[%s8411_s0 + $0x580] ss:$20 sps:$4 sm:$0xff]  }
 0x20b   :  { %4686 = vmatprep.mubr.msk.bf16.mxu0 %vm5466_vm0, %v5465_v40 }
 0x20d   :  { %v2838_v58 = vpop.f32.mrb[24].mxu0 }
 0x20e   :  { %v6540_v3 = vadd.f32 %v2838_v58, %v6149_v2  ;;  %v4580_v36 = vpop.f32.mrb[25].mxu0 }
 0x20f   :  { %v2841_v51 = vpop.f32.mrb[26].mxu0 }
 0x210   :  { %v6549_v41 = vadd.f32 %v2841_v51, %v6157_v6  ;;  %v4581_v29 = vpop.f32.mrb[27].mxu0  ;;  %v5408_v6 = vld [vmem:[%s8411_s0 + $0x560] ss:$20 sps:$4 sm:$0xff]  }
 0x211   :  { %2636 = vmatmul.mubr.bf16.gmra.mrb[136].mxu1 %v5403_v48  ;;  %v5413_v29 = vld [vmem:[%s8411_s0 + $0x5d4] ss:$20 sps:$4 sm:$0xff]  }
 0x212   :  { %4687 = vmatmul.mubr.bf16.gmra.mrb[132].mxu0 %v5404_v62  ;;  %2643 = vmatprep.mubr.bf16.mxu1 %v5405_v8  ;;  %v5411_v62 = vld [vmem:[%s8411_s0 + $0x5a8] ss:$20 sps:$4 sm:$0xff]  }
 0x213   :  { %4690 = vmatprep.mubr.msk.bf16.mxu0 %vm5466_vm0, %v5465_v40 }
 0x215   :  { %v2846_v2 = vpop.f32.mrb[28].mxu0 }
 0x216   :  { %v6557_v37 = vadd.f32 %v2846_v2, %v6164_v9  ;;  %v4584_v44 = vpop.f32.mrb[29].mxu0 }
 0x217   :  { %v2849_v58 = vpop.f32.mrb[30].mxu0 }
 0x218   :  { %v6566_v48 = vadd.f32 %v2849_v58, %v6172_v13  ;;  %v4585_v36 = vpop.f32.mrb[31].mxu0  ;;  %v5412_v13 = vld [vmem:[%s8411_s0 + $0x588] ss:$20 sps:$4 sm:$0xff]  }
 0x219   :  { %2644 = vmatmul.mubr.bf16.gmra.mrb[140].mxu1 %v5407_v55  ;;  %v5417_v36 = vld [vmem:[%s8411_s0 + $0x5fc] ss:$20 sps:$4 sm:$0xff]  }
 0x21a   :  { %4691 = vmatmul.mubr.bf16.gmra.mrb[136].mxu0 %v5408_v6  ;;  %2651 = vmatprep.mubr.bf16.mxu1 %v5409_v22  ;;  %v5415_v6 = vld [vmem:[%s8411_s0 + $0x5d0] ss:$20 sps:$4 sm:$0xff]  }
 0x21b   :  { %4694 = vmatprep.mubr.msk.bf16.mxu0 %vm5466_vm0, %v5465_v40 }
 0x21d   :  { %v2854_v9 = vpop.f32.mrb[32].mxu0 }
 0x21e   :  { %v6574_v8 = vadd.f32 %v2854_v9, %v6179_v16  ;;  %v4588_v51 = vpop.f32.mrb[33].mxu0 }
 0x21f   :  { %v2857_v2 = vpop.f32.mrb[34].mxu0 }
 0x220   :  { %8543 = vst [vmem:[#allocation6_spill] sm:$0xff] %v6574_v8  ;;  %v6583_v55 = vadd.f32 %v2857_v2, %v6187_v0  ;;  %v4589_v44 = vpop.f32.mrb[35].mxu0  ;;  %v5416_v0 = vld [vmem:[%s8411_s0 + $0x5b0] ss:$20 sps:$4 sm:$0xff]  }
 0x221   :  { %2652 = vmatmul.mubr.bf16.gmra.mrb[144].mxu1 %v5411_v62  ;;  %v5421_v44 = vld [vmem:[%s8411_s0 + $0x624] ss:$20 sps:$4 sm:$0xff]  }
 0x222   :  { %8544 = vst [vmem:[#allocation7_spill] sm:$0xff] %v6583_v55  ;;  %4695 = vmatmul.mubr.bf16.gmra.mrb[140].mxu0 %v5412_v13  ;;  %2659 = vmatprep.mubr.bf16.mxu1 %v5413_v29  ;;  %v5419_v13 = vld [vmem:[%s8411_s0 + $0x5f8] ss:$20 sps:$4 sm:$0xff]  }
 0x223   :  { %4698 = vmatprep.mubr.msk.bf16.mxu0 %vm5466_vm0, %v5465_v40 }
 0x225   :  { %v2862_v16 = vpop.f32.mrb[36].mxu0 }
 0x226   :  { %v6591_v22 = vadd.f32 %v2862_v16, %v6194_v23  ;;  %v4592_v58 = vpop.f32.mrb[37].mxu0 }
 0x227   :  { %v2865_v9 = vpop.f32.mrb[38].mxu0 }
 0x228   :  { %8545 = vst [vmem:[#allocation8_spill] sm:$0xff] %v6591_v22  ;;  %v6600_v62 = vadd.f32 %v2865_v9, %v6202_v28  ;;  %v4593_v51 = vpop.f32.mrb[39].mxu0  ;;  %v5420_v28 = vld [vmem:[%s8411_s0 + $0x5d8] ss:$20 sps:$4 sm:$0xff]  }
 0x229   :  { %2660 = vmatmul.mubr.bf16.gmra.mrb[148].mxu1 %v5415_v6  ;;  %v5425_v51 = vld [vmem:[%s8411_s0 + $0x64c] ss:$20 sps:$4 sm:$0xff]  }
 0x22a   :  { %8546 = vst [vmem:[#allocation9_spill] sm:$0xff] %v6600_v62  ;;  %4699 = vmatmul.mubr.bf16.gmra.mrb[144].mxu0 %v5416_v0  ;;  %2667 = vmatprep.mubr.bf16.mxu1 %v5417_v36  ;;  %v5423_v0 = vld [vmem:[%s8411_s0 + $0x620] ss:$20 sps:$4 sm:$0xff]  }
 0x22b   :  { %4702 = vmatprep.mubr.msk.bf16.mxu0 %vm5466_vm0, %v5465_v40 }
 0x22d   :  { %v2870_v23 = vpop.f32.mrb[40].mxu0 }
 0x22e   :  { %v6608_v29 = vadd.f32 %v2870_v23, %v6209_v32  ;;  %v4596_v2 = vpop.f32.mrb[41].mxu0 }
 0x22f   :  { %v2873_v16 = vpop.f32.mrb[42].mxu0 }
 0x230   :  { %8547 = vst [vmem:[#allocation10_spill] sm:$0xff] %v6608_v29  ;;  %v6617_v6 = vadd.f32 %v2873_v16, %v6217_v38  ;;  %v4597_v58 = vpop.f32.mrb[43].mxu0  ;;  %v5424_v38 = vld [vmem:[%s8411_s0 + $0x600] ss:$20 sps:$4 sm:$0xff]  }
 0x231   :  { %2668 = vmatmul.mubr.bf16.gmra.mrb[152].mxu1 %v5419_v13  ;;  %v5429_v58 = vld [vmem:[%s8411_s0 + $0x674] ss:$20 sps:$4 sm:$0xff]  }
 0x232   :  { %8548 = vst [vmem:[#allocation11_spill] sm:$0xff] %v6617_v6  ;;  %4703 = vmatmul.mubr.bf16.gmra.mrb[148].mxu0 %v5420_v28  ;;  %2675 = vmatprep.mubr.bf16.mxu1 %v5421_v44  ;;  %v5427_v28 = vld [vmem:[%s8411_s0 + $0x648] ss:$20 sps:$4 sm:$0xff]  }
 0x233   :  { %4706 = vmatprep.mubr.msk.bf16.mxu0 %vm5466_vm0, %v5465_v40 }
 0x235   :  { %v2878_v32 = vpop.f32.mrb[44].mxu0 }
 0x236   :  { %v6625_v36 = vadd.f32 %v2878_v32, %v6224_v43  ;;  %v4600_v9 = vpop.f32.mrb[45].mxu0 }
 0x237   :  { %v2881_v23 = vpop.f32.mrb[46].mxu0 }
 0x238   :  { %8549 = vst [vmem:[#allocation12_spill] sm:$0xff] %v6625_v36  ;;  %v6634_v13 = vadd.f32 %v2881_v23, %v6232_v49  ;;  %v4601_v2 = vpop.f32.mrb[47].mxu0  ;;  %v5428_v49 = vld [vmem:[%s8411_s0 + $0x628] ss:$20 sps:$4 sm:$0xff]  }
 0x239   :  { %2676 = vmatmul.mubr.bf16.gmra.mrb[156].mxu1 %v5423_v0  ;;  %v5433_v2 = vld [vmem:[%s8411_s0 + $0x69c] ss:$20 sps:$4 sm:$0xff]  }
 0x23a   :  { %8550 = vst [vmem:[#allocation13_spill] sm:$0xff] %v6634_v13  ;;  %4707 = vmatmul.mubr.bf16.gmra.mrb[152].mxu0 %v5424_v38  ;;  %2683 = vmatprep.mubr.bf16.mxu1 %v5425_v51  ;;  %v5431_v38 = vld [vmem:[%s8411_s0 + $0x670] ss:$20 sps:$4 sm:$0xff]  }
 0x23b   :  { %4710 = vmatprep.mubr.msk.bf16.mxu0 %vm5466_vm0, %v5465_v40 }
 0x23d   :  { %v2886_v43 = vpop.f32.mrb[48].mxu0 }
 0x23e   :  { %v6642_v44 = vadd.f32 %v2886_v43, %v6239_v53  ;;  %v4604_v16 = vpop.f32.mrb[49].mxu0 }
 0x23f   :  { %v2889_v32 = vpop.f32.mrb[50].mxu0 }
 0x240   :  { %8551 = vst [vmem:[#allocation14_spill] sm:$0xff] %v6642_v44  ;;  %v6651_v0 = vadd.f32 %v2889_v32, %v6247_v59  ;;  %v4605_v9 = vpop.f32.mrb[51].mxu0  ;;  %v5432_v59 = vld [vmem:[%s8411_s0 + $0x650] ss:$20 sps:$4 sm:$0xff]  }
 0x241   :  { %2684 = vmatmul.mubr.bf16.gmra.mrb[160].mxu1 %v5427_v28  ;;  %v5437_v9 = vld [vmem:[%s8411_s0 + $0x6c4] ss:$20 sps:$4 sm:$0xff]  }
 0x242   :  { %8552 = vst [vmem:[#allocation15_spill] sm:$0xff] %v6651_v0  ;;  %4711 = vmatmul.mubr.bf16.gmra.mrb[156].mxu0 %v5428_v49  ;;  %2691 = vmatprep.mubr.bf16.mxu1 %v5429_v58  ;;  %v5435_v49 = vld [vmem:[%s8411_s0 + $0x698] ss:$20 sps:$4 sm:$0xff]  }
 0x243   :  { %4714 = vmatprep.mubr.msk.bf16.mxu0 %vm5466_vm0, %v5465_v40 }
 0x245   :  { %v2894_v53 = vpop.f32.mrb[52].mxu0 }
 0x246   :  { %v6659_v51 = vadd.f32 %v2894_v53, %v6254_v63  ;;  %v4608_v23 = vpop.f32.mrb[53].mxu0 }
 0x247   :  { %v2897_v43 = vpop.f32.mrb[54].mxu0 }
 0x248   :  { %8553 = vst [vmem:[#allocation16_spill] sm:$0xff] %v6659_v51  ;;  %v6668_v28 = vadd.f32 %v2897_v43, %v6262_v5  ;;  %v4609_v16 = vpop.f32.mrb[55].mxu0  ;;  %v5436_v5 = vld [vmem:[%s8411_s0 + $0x678] ss:$20 sps:$4 sm:$0xff]  }
 0x249   :  { %2692 = vmatmul.mubr.bf16.gmra.mrb[164].mxu1 %v5431_v38  ;;  %v5441_v16 = vld [vmem:[%s8411_s0 + $0x6ec] ss:$20 sps:$4 sm:$0xff]  }
 0x24a   :  { %8554 = vst [vmem:[#allocation17_spill] sm:$0xff] %v6668_v28  ;;  %4715 = vmatmul.mubr.bf16.gmra.mrb[160].mxu0 %v5432_v59  ;;  %2699 = vmatprep.mubr.bf16.mxu1 %v5433_v2  ;;  %v5439_v59 = vld [vmem:[%s8411_s0 + $0x6c0] ss:$20 sps:$4 sm:$0xff]  }
 0x24b   :  { %4718 = vmatprep.mubr.msk.bf16.mxu0 %vm5466_vm0, %v5465_v40 }
 0x24d   :  { %v2902_v63 = vpop.f32.mrb[56].mxu0 }
 0x24e   :  { %v6676_v58 = vadd.f32 %v2902_v63, %v6269_v10  ;;  %v4612_v32 = vpop.f32.mrb[57].mxu0 }
 0x24f   :  { %v2905_v53 = vpop.f32.mrb[58].mxu0 }
 0x250   :  { %8555 = vst [vmem:[#allocation18_spill] sm:$0xff] %v6676_v58  ;;  %v6685_v38 = vadd.f32 %v2905_v53, %v6277_v15  ;;  %v4613_v23 = vpop.f32.mrb[59].mxu0  ;;  %v5440_v15 = vld [vmem:[%s8411_s0 + $0x6a0] ss:$20 sps:$4 sm:$0xff]   ;;  %v5443_v53 = vld [vmem:[%s8411_s0 + $0x6e8] ss:$20 sps:$4 sm:$0xff]  }
 0x251   :  { %2700 = vmatmul.mubr.bf16.gmra.mrb[168].mxu1 %v5435_v49 }
 0x252   :  { %8556 = vst [vmem:[#allocation19_spill] sm:$0xff] %v6685_v38  ;;  %4719 = vmatmul.mubr.bf16.gmra.mrb[164].mxu0 %v5436_v5  ;;  %2707 = vmatprep.mubr.bf16.mxu1 %v5437_v9 }
 0x253   :  { %4722 = vmatprep.mubr.msk.bf16.mxu0 %vm5466_vm0, %v5465_v40 }
 0x255   :  { %v2910_v10 = vpop.f32.mrb[60].mxu0 }
 0x256   :  { %v6693_v2 = vadd.f32 %v2910_v10, %v6284_v19  ;;  %v4616_v43 = vpop.f32.mrb[61].mxu0  ;;  %v3377_v19 = vadd.f32 %v6447_v42, %v6438_v17  ;;  %v5444_v10 = vld [vmem:[%s8411_s0 + $0x6c8] ss:$20 sps:$4 sm:$0xff]  }
 0x257   :  { %v2913_v63 = vpop.f32.mrb[62].mxu0 }
 0x258   :  { %8557 = vst [vmem:[#allocation20_spill] sm:$0xff] %v6693_v2  ;;  %v6702_v49 = vadd.f32 %v2913_v63, %v6292_v25  ;;  %v4617_v32 = vpop.f32.mrb[63].mxu0  ;;  %v3378_v5 = vadd.f32 %v6455_v57, %v3377_v19  ;;  %v5447_v19 = vld [vmem:[%s8411_s0 + $0x710] ss:$20 sps:$4 sm:$0xff]  }
 0x259   :  { %2708 = vmatmul.mubr.bf16.gmra.mrb[172].mxu1 %v5439_v59  ;;  %v5445_v59 = vld [vmem:[%s8411_s0 + $0x714] ss:$20 sps:$4 sm:$0xff]  }
 0x25a   :  { %8558 = vst [vmem:[#allocation21_spill] sm:$0xff] %v6702_v49  ;;  %4723 = vmatmul.mubr.bf16.gmra.mrb[168].mxu0 %v5440_v15  ;;  %2715 = vmatprep.mubr.bf16.mxu1 %v5441_v16  ;;  %v3379_v63 = vadd.f32 %v6464_v14, %v3378_v5  ;;  %v5448_v5 = vld [vmem:[%s8411_s0 + $0x6f0] ss:$20 sps:$4 sm:$0xff]  }
 0x25b   :  { %4726 = vmatprep.mubr.msk.bf16.mxu0 %vm5466_vm0, %v5465_v40 }
 0x25d   :  { %v2918_v9 = vpop.f32.mrb[64].mxu0 }
 0x25e   :  { %v6713_v25 = vadd.f32 %v2918_v9, %v6299_v31  ;;  %v4620_v23 = vpop.f32.mrb[65].mxu0  ;;  %v3380_v31 = vadd.f32 %v6472_v30, %v3379_v63 }
 0x25f   :  { %v2921_v43 = vpop.f32.mrb[66].mxu0 }
 0x260   :  { %8559 = vst [vmem:[#allocation22_spill] sm:$0xff] %v6713_v25  ;;  %v6722_v15 = vadd.f32 %v2921_v43, %v6307_v39  ;;  %v4621_v16 = vpop.f32.mrb[67].mxu0  ;;  %v3381_v23 = vadd.f32 %v6481_v52, %v3380_v31  ;;  %v5451_v31 = vld [vmem:[%s8411_s0 + $0x738] ss:$20 sps:$4 sm:$0xff]  }
 0x261   :  { %2716 = vmatmul.mubr.bf16.gmra.mrb[176].mxu1 %v5443_v53  ;;  %v5449_v53 = vld [vmem:[%s8411_s0 + $0x73c] ss:$20 sps:$4 sm:$0xff]  }
 0x262   :  { %8560 = vst [vmem:[#allocation23_spill] sm:$0xff] %v6722_v15  ;;  %4727 = vmatmul.mubr.bf16.gmra.mrb[172].mxu0 %v5444_v10  ;;  %2723 = vmatprep.mubr.bf16.mxu1 %v5445_v59  ;;  %v3382_v16 = vadd.f32 %v6489_v7, %v3381_v23 }
 0x263   :  { %4730 = vmatprep.mubr.msk.bf16.mxu0 %vm5466_vm0, %v5465_v40 }
 0x265   :  { %v2926_v32 = vpop.f32.mrb[68].mxu0 }
 0x266   :  { %v6732_v9 = vadd.f32 %v2926_v32, %v6314_v46  ;;  %v4624_v39 = vpop.f32.mrb[69].mxu0  ;;  %v3383_v46 = vadd.f32 %v6498_v27, %v3382_v16 }
 0x267   :  { %v2929_v10 = vpop.f32.mrb[70].mxu0  ;;  %v5453_v39 = vld [vmem:[%s8411_s0 + $0x764] ss:$20 sps:$4 sm:$0xff]  }
 0x268   :  { %8561 = vst [vmem:[#allocation24_spill] sm:$0xff] %v6732_v9  ;;  %v6742_v59 = vadd.f32 %v2929_v10, %v6322_v54  ;;  %v4625_v43 = vpop.f32.mrb[71].mxu0 }
 0x269   :  { %2724 = vmatmul.mubr.bf16.gmra.mrb[180].mxu1 %v5447_v19  ;;  %v5452_v19 = vld [vmem:[%s8411_s0 + $0x718] ss:$20 sps:$4 sm:$0xff]  }
 0x26a   :  { %8562 = vst [vmem:[#allocation25_spill] sm:$0xff] %v6742_v59  ;;  %4731 = vmatmul.mubr.bf16.gmra.mrb[176].mxu0 %v5448_v5  ;;  %2731 = vmatprep.mubr.bf16.mxu1 %v5449_v53  ;;  %v3384_v5 = vadd.f32 %v6506_v50, %v3383_v46  ;;  %v5455_v46 = vld [vmem:[%s8411_s0 + $0x760] ss:$20 sps:$4 sm:$0xff]  }
 0x26b   :  { %4734 = vmatprep.mubr.msk.bf16.mxu0 %vm5466_vm0, %v5465_v40 }
 0x26d   :  { %v2934_v63 = vpop.f32.mrb[72].mxu0 }
 0x26e   :  { %v6752_v32 = vadd.f32 %v2934_v63, %v6329_v60  ;;  %v4628_v54 = vpop.f32.mrb[73].mxu0  ;;  %v3385_v60 = vadd.f32 %v6515_v26, %v3384_v5 }
 0x26f   :  { %v2937_v53 = vpop.f32.mrb[74].mxu0  ;;  %v5457_v54 = vld [vmem:[%s8411_s0 + $0x78c] ss:$20 sps:$4 sm:$0xff]  }
 0x270   :  { %8563 = vst [vmem:[#allocation26_spill] sm:$0xff] %v6752_v32  ;;  %v6762_v23 = vadd.f32 %v2937_v53, %v6337_v4  ;;  %v4629_v10 = vpop.f32.mrb[75].mxu0  ;;  %v3386_v43 = vadd.f32 %v6523_v21, %v3385_v60  ;;  %v5459_v60 = vld [vmem:[%s8411_s0 + $0x788] ss:$20 sps:$4 sm:$0xff]  }
 0x271   :  { %2732 = vmatmul.mubr.bf16.gmra.mrb[184].mxu1 %v5451_v31  ;;  %v5456_v31 = vld [vmem:[%s8411_s0 + $0x740] ss:$20 sps:$4 sm:$0xff]  }
 0x272   :  { %8564 = vst [vmem:[#allocation27_spill] sm:$0xff] %v6762_v23  ;;  %4735 = vmatmul.mubr.bf16.gmra.mrb[180].mxu0 %v5452_v19  ;;  %2739 = vmatprep.mubr.bf16.mxu1 %v5453_v39  ;;  %v3387_v53 = vadd.f32 %v6532_v33, %v3386_v43  ;;  %v5460_v43 = vld [vmem:[%s8411_s0 + $0x768] ss:$20 sps:$4 sm:$0xff]  }
 0x273   :  { %4738 = vmatprep.mubr.msk.bf16.mxu0 %vm5466_vm0, %v5465_v40 }
 0x275   :  { %v2942_v16 = vpop.f32.mrb[76].mxu0 }
 0x276   :  { %v6772_v63 = vadd.f32 %v2942_v16, %v6344_v11  ;;  %v4632_v4 = vpop.f32.mrb[77].mxu0  ;;  %v3388_v11 = vadd.f32 %v6540_v3, %v3387_v53 }
 0x277   :  { %v2945_v19 = vpop.f32.mrb[78].mxu0 }
 0x278   :  { %8565 = vst [vmem:[#allocation28_spill] sm:$0xff] %v6772_v63  ;;  %v6781_v39 = vadd.f32 %v2945_v19, %v6352_v18  ;;  %v4633_v5 = vpop.f32.mrb[79].mxu0 }
 0x279   :  { %2740 = vmatmul.mubr.bf16.gmra.mrb[188].mxu1 %v5455_v46  ;;  %v3389_v46 = vadd.f32 %v6549_v41, %v3388_v11 }
 0x27a   :  { %8566 = vst [vmem:[#allocation29_spill] sm:$0xff] %v6781_v39  ;;  %4739 = vmatmul.mubr.bf16.gmra.mrb[184].mxu0 %v5456_v31  ;;  %2747 = vmatprep.mubr.bf16.mxu1 %v5457_v54 }
 0x27b   :  { %4742 = vmatprep.mubr.msk.bf16.mxu0 %vm5466_vm0, %v5465_v40  ;;  %v3390_v19 = vadd.f32 %v6557_v37, %v3389_v46 }
 0x27d   :  { %v2950_v10 = vpop.f32.mrb[80].mxu0 }
 0x27e   :  { %v6791_v16 = vadd.f32 %v2950_v10, %v6359_v24  ;;  %v4636_v18 = vpop.f32.mrb[81].mxu0  ;;  %v3391_v24 = vadd.f32 %v6566_v48, %v3390_v19 }
 0x27f   :  { %v2953_v4 = vpop.f32.mrb[82].mxu0 }
 0x280   :  { %8567 = vst [vmem:[#allocation30_spill] sm:$0xff] %v6791_v16  ;;  %v6798_v31 = vadd.f32 %v2953_v4, %v6367_v35  ;;  %v4637_v54 = vpop.f32.mrb[83].mxu0  ;;  %v5461_v35 = vld [vmem:[%s8411_s0 + $0x790] ss:$20 sps:$4 sm:$0xff]   ;;  %v3392_v11 = vadd.f32 %v6574_v8, %v3391_v24 }
 0x281   :  { %2748 = vmatmul.mubr.bf16.gmra.mrb[192].mxu1 %v5459_v60 }
 0x282   :  { %8568 = vst [vmem:[#allocation31_spill] sm:$0xff] %v6798_v31  ;;  %4743 = vmatmul.mubr.bf16.gmra.mrb[188].mxu0 %v5460_v43 }
 0x283   :  { %4746 = vmatprep.mubr.msk.bf16.mxu0 %vm5466_vm0, %v5465_v40  ;;  %v3393_v40 = vadd.f32 %v6583_v55, %v3392_v11 }
 0x285   :  { %v2958_v5 = vpop.f32.mrb[84].mxu0  ;;  %v3394_v46 = vadd.f32 %v6591_v22, %v3393_v40 }
 0x286   :  { %v6805_v53 = vadd.f32 %v2958_v5, %v6374_v45  ;;  %v4640_v10 = vpop.f32.mrb[85].mxu0 }
 0x287   :  { %v2961_v18 = vpop.f32.mrb[86].mxu0  ;;  %v3395_v10 = vadd.f32 %v6600_v62, %v3394_v46 }
 0x288   :  { %8569 = vst [vmem:[#allocation32_spill] sm:$0xff] %v6805_v53  ;;  %v6812_v60 = vadd.f32 %v2961_v18, %v6382_v56  ;;  %v4641_v43 = vpop.f32.mrb[87].mxu0 }
 0x289   :  { %v3396_v56 = vadd.f32 %v6608_v29, %v3395_v10 }
 0x28a   :  { %8570 = vst [vmem:[#allocation33_spill] sm:$0xff] %v6812_v60  ;;  %4747 = vmatmul.mubr.bf16.gmra.mrb[192].mxu0 %v5461_v35 }
 0x28b   :  { %v3397_v43 = vadd.f32 %v6617_v6, %v3396_v56 }
 0x28d   :  { %v2966_v4 = vpop.f32.mrb[88].mxu0 }
 0x28e   :  { %v6817_v45 = vadd.f32 %v2966_v4, %v6389_v1  ;;  %v4644_v54 = vpop.f32.mrb[89].mxu0 }
 0x28f   :  { %v2969_v19 = vpop.f32.mrb[90].mxu0 }
 0x290   :  { %8571 = vst [vmem:[#allocation34_spill] sm:$0xff] %v6817_v45  ;;  %v6820_v5 = vadd.f32 %v2969_v19, %v6397_v12  ;;  %v4645_v24 = vpop.f32.mrb[91].mxu0  ;;  %v3398_v12 = vadd.f32 %v6625_v36, %v3397_v43 }
 0x292   :  { %8572 = vst [vmem:[#allocation35_spill] sm:$0xff] %v6820_v5  ;;  %v3399_v19 = vadd.f32 %v6634_v13, %v3398_v12 }
 0x295   :  { %v2974_v18 = vpop.f32.mrb[92].mxu0 }
 0x296   :  { %v6825_v35 = vadd.f32 %v2974_v18, %v6404_v20  ;;  %v4648_v11 = vpop.f32.mrb[93].mxu0 }
 0x297   :  { %v2977_v40 = vpop.f32.mrb[94].mxu0  ;;  %v3400_v11 = vadd.f32 %v6642_v44, %v3399_v19 }
 0x298   :  { %8573 = vst [vmem:[#allocation36_spill] sm:$0xff] %v6825_v35  ;;  %v6829_v1 = vadd.f32 %v2977_v40, %v6412_v34  ;;  %v4649_v4 = vpop.f32.mrb[95].mxu0 }
 0x299   :  { %v3401_v43 = vadd.f32 %v6651_v0, %v3400_v11 }
 0x29a   :  { %8574 = vst [vmem:[#allocation37_spill] sm:$0xff] %v6829_v1 }
 0x29b   :  { %v3402_v12 = vadd.f32 %v6659_v51, %v3401_v43 }
 0x29c   :  { %v2565_v54 = vpop.f32.mrb[100].mxu1 }
 0x29d   :  { %v2982_v46 = vpop.f32.mrb[96].mxu0  ;;  %v2567_v24 = vpop.f32.mrb[101].mxu1 }
 0x29e   :  { %v6834_v10 = vadd.f32 %v2982_v46, %v6419_v47  ;;  %v4652_v20 = vpop.f32.mrb[97].mxu0  ;;  %v2568_v18 = vpop.f32.mrb[102].mxu1 }
 0x29f   :  { %v2985_v56 = vpop.f32.mrb[98].mxu0  ;;  %v2570_v6 = vpop.f32.mrb[103].mxu1 }
 0x2a0   :  { %8575 = vst [vmem:[#allocation38_spill] sm:$0xff] %v6834_v10  ;;  %v6838_v34 = vadd.f32 %v2985_v56, %v6427_v61  ;;  %v4653_v40 = vpop.f32.mrb[99].mxu0  ;;  %v3403_v61 = vadd.f32 %v6668_v28, %v3402_v12 }
 0x2a2   :  { %8576 = vst [vmem:[#allocation39_spill] sm:$0xff] %v6838_v34  ;;  %v3404_v56 = vadd.f32 %v6676_v58, %v3403_v61 }
 0x2a4   :  { %v2573_v4 = vpop.f32.mrb[104].mxu1 }
 0x2a5   :  { %v2990_v13 = vpop.f32.mrb[100].mxu0  ;;  %v2575_v24 = vpop.f32.mrb[105].mxu1 }
 0x2a6   :  { %v6842_v36 = vadd.f32 %v2990_v13, %v2565_v54  ;;  %v4656_v47 = vpop.f32.mrb[101].mxu0  ;;  %v2576_v46 = vpop.f32.mrb[106].mxu1  ;;  %v3405_v13 = vadd.f32 %v6685_v38, %v3404_v56 }
 0x2a7   :  { %v2993_v20 = vpop.f32.mrb[102].mxu0  ;;  %v2578_v29 = vpop.f32.mrb[107].mxu1 }
 0x2a8   :  { %8577 = vst [vmem:[#allocation40_spill] sm:$0xff] %v6842_v36  ;;  %v6844_v19 = vadd.f32 %v2993_v20, %v2568_v18  ;;  %v4657_v6 = vpop.f32.mrb[103].mxu0  ;;  %v3406_v18 = vadd.f32 %v6693_v2, %v3405_v13 }
 0x2aa   :  { %8578 = vst [vmem:[#allocation41_spill] sm:$0xff] %v6844_v19  ;;  %v3407_v12 = vadd.f32 %v6702_v49, %v3406_v18 }
 0x2ac   :  { %v2581_v40 = vpop.f32.mrb[108].mxu1 }
 0x2ad   :  { %v2998_v11 = vpop.f32.mrb[104].mxu0  ;;  %v2583_v0 = vpop.f32.mrb[109].mxu1 }
 0x2ae   :  { %v6848_v44 = vadd.f32 %v2998_v11, %v2573_v4  ;;  %v4660_v43 = vpop.f32.mrb[105].mxu0  ;;  %v2584_v24 = vpop.f32.mrb[110].mxu1  ;;  %v3408_v11 = vadd.f32 %v6713_v25, %v3407_v12 }
 0x2af   :  { %v3001_v54 = vpop.f32.mrb[106].mxu0  ;;  %v2586_v47 = vpop.f32.mrb[111].mxu1 }
 0x2b0   :  { %8579 = vst [vmem:[#allocation42_spill] sm:$0xff] %v6848_v44  ;;  %v6851_v51 = vadd.f32 %v3001_v54, %v2576_v46  ;;  %v4661_v29 = vpop.f32.mrb[107].mxu0  ;;  %v3409_v54 = vadd.f32 %v6722_v15, %v3408_v11 }
 0x2b2   :  { %8580 = vst [vmem:[#allocation43_spill] sm:$0xff] %v6851_v51  ;;  %v3410_v13 = vadd.f32 %v6732_v9, %v3409_v54 }
 0x2b4   :  { %v2589_v20 = vpop.f32.mrb[112].mxu1 }
 0x2b5   :  { %v3006_v6 = vpop.f32.mrb[108].mxu0  ;;  %v2591_v61 = vpop.f32.mrb[113].mxu1 }
 0x2b6   :  { %v6855_v58 = vadd.f32 %v3006_v6, %v2581_v40  ;;  %v4664_v0 = vpop.f32.mrb[109].mxu0  ;;  %v2592_v4 = vpop.f32.mrb[114].mxu1 }
 0x2b7   :  { %v3009_v43 = vpop.f32.mrb[110].mxu0  ;;  %v2594_v56 = vpop.f32.mrb[115].mxu1 }
 0x2b8   :  { %8581 = vst [vmem:[#allocation44_spill] sm:$0xff] %v6855_v58  ;;  %v6858_v38 = vadd.f32 %v3009_v43, %v2584_v24  ;;  %v4665_v46 = vpop.f32.mrb[111].mxu0  ;;  %v3411_v24 = vadd.f32 %v6742_v59, %v3410_v13 }
 0x2ba   :  { %8582 = vst [vmem:[#allocation45_spill] sm:$0xff] %v6858_v38  ;;  %v3412_v43 = vadd.f32 %v6752_v32, %v3411_v24 }
 0x2bc   :  { %v2597_v47 = vpop.f32.mrb[116].mxu1 }
 0x2bd   :  { %v3014_v29 = vpop.f32.mrb[112].mxu0  ;;  %v2599_v18 = vpop.f32.mrb[117].mxu1 }
 0x2be   :  { %v6862_v49 = vadd.f32 %v3014_v29, %v2589_v20  ;;  %v4668_v40 = vpop.f32.mrb[113].mxu0  ;;  %v2600_v6 = vpop.f32.mrb[118].mxu1  ;;  %v3413_v20 = vadd.f32 %v6762_v23, %v3412_v43 }
 0x2bf   :  { %v3017_v61 = vpop.f32.mrb[114].mxu0  ;;  %v2602_v0 = vpop.f32.mrb[119].mxu1 }
 0x2c0   :  { %8583 = vst [vmem:[#allocation46_spill] sm:$0xff] %v6862_v49  ;;  %v6864_v2 = vadd.f32 %v3017_v61, %v2592_v4  ;;  %v4669_v12 = vpop.f32.mrb[115].mxu0  ;;  %v3414_v61 = vadd.f32 %v6772_v63, %v3413_v20 }
 0x2c2   :  { %8584 = vst [vmem:[#allocation47_spill] sm:$0xff] %v6864_v2  ;;  %v3415_v13 = vadd.f32 %v6781_v39, %v3414_v61 }
 0x2c4   :  { %v2605_v56 = vpop.f32.mrb[120].mxu1 }
 0x2c5   :  { %v3022_v11 = vpop.f32.mrb[116].mxu0  ;;  %v2607_v46 = vpop.f32.mrb[121].mxu1 }
 0x2c6   :  { %v6868_v15 = vadd.f32 %v3022_v11, %v2597_v47  ;;  %v4672_v54 = vpop.f32.mrb[117].mxu0  ;;  %v2608_v18 = vpop.f32.mrb[122].mxu1  ;;  %v3416_v46 = vadd.f32 %v6791_v16, %v3415_v13 }
 0x2c7   :  { %v3025_v29 = vpop.f32.mrb[118].mxu0  ;;  %v2610_v40 = vpop.f32.mrb[123].mxu1 }
 0x2c8   :  { %8585 = vst [vmem:[#allocation48_spill] sm:$0xff] %v6868_v15  ;;  %v6871_v9 = vadd.f32 %v3025_v29, %v2600_v6  ;;  %v4673_v4 = vpop.f32.mrb[119].mxu0  ;;  %v3417_v29 = vadd.f32 %v6798_v31, %v3416_v46 }
 0x2ca   :  { %8586 = vst [vmem:[#allocation49_spill] sm:$0xff] %v6871_v9  ;;  %v3418_v20 = vadd.f32 %v6805_v53, %v3417_v29 }
 0x2cc   :  { %v2613_v0 = vpop.f32.mrb[124].mxu1 }
 0x2cd   :  { %v3030_v12 = vpop.f32.mrb[120].mxu0  ;;  %v2615_v24 = vpop.f32.mrb[125].mxu1 }
 0x2ce   :  { %v6875_v32 = vadd.f32 %v3030_v12, %v2605_v56  ;;  %v4676_v47 = vpop.f32.mrb[121].mxu0  ;;  %v2616_v11 = vpop.f32.mrb[126].mxu1 }
 0x2cf   :  { %v3033_v54 = vpop.f32.mrb[122].mxu0  ;;  %v2618_v43 = vpop.f32.mrb[127].mxu1 }
 0x2d0   :  { %8587 = vst [vmem:[#allocation50_spill] sm:$0xff] %v6875_v32  ;;  %v6878_v23 = vadd.f32 %v3033_v54, %v2608_v18  ;;  %v4677_v6 = vpop.f32.mrb[123].mxu0  ;;  %v3419_v18 = vadd.f32 %v6812_v60, %v3418_v20 }
 0x2d2   :  { %8588 = vst [vmem:[#allocation51_spill] sm:$0xff] %v6878_v23  ;;  %v3420_v54 = vadd.f32 %v6817_v45, %v3419_v18 }
 0x2d4   :  { %v2621_v40 = vpop.f32.mrb[128].mxu1 }
 0x2d5   :  { %v3038_v4 = vpop.f32.mrb[124].mxu0  ;;  %v2623_v61 = vpop.f32.mrb[129].mxu1 }
 0x2d6   :  { %v6882_v39 = vadd.f32 %v3038_v4, %v2613_v0  ;;  %v4680_v56 = vpop.f32.mrb[125].mxu0  ;;  %v2624_v12 = vpop.f32.mrb[130].mxu1  ;;  %v3421_v0 = vadd.f32 %v6820_v5, %v3420_v54 }
 0x2d7   :  { %v3041_v24 = vpop.f32.mrb[126].mxu0  ;;  %v2626_v47 = vpop.f32.mrb[131].mxu1 }
 0x2d8   :  { %8589 = vst [vmem:[#allocation52_spill] sm:$0xff] %v6882_v39  ;;  %v6884_v63 = vadd.f32 %v3041_v24, %v2616_v11  ;;  %v4681_v13 = vpop.f32.mrb[127].mxu0  ;;  %v3422_v24 = vadd.f32 %v6825_v35, %v3421_v0 }
 0x2da   :  { %8590 = vst [vmem:[#allocation53_spill] sm:$0xff] %v6884_v63  ;;  %v3423_v20 = vadd.f32 %v6829_v1, %v3422_v24 }
 0x2dc   :  { %v2629_v43 = vpop.f32.mrb[132].mxu1 }
 0x2dd   :  { %v3046_v46 = vpop.f32.mrb[128].mxu0  ;;  %v2631_v6 = vpop.f32.mrb[133].mxu1 }
 0x2de   :  { %v6888_v31 = vadd.f32 %v3046_v46, %v2621_v40  ;;  %v4684_v29 = vpop.f32.mrb[129].mxu0  ;;  %v2632_v61 = vpop.f32.mrb[134].mxu1  ;;  %v3424_v6 = vadd.f32 %v6834_v10, %v3423_v20 }
 0x2df   :  { %v3049_v4 = vpop.f32.mrb[130].mxu0  ;;  %v2634_v56 = vpop.f32.mrb[135].mxu1 }
 0x2e0   :  { %8591 = vst [vmem:[#allocation54_spill] sm:$0xff] %v6888_v31  ;;  %v6891_v53 = vadd.f32 %v3049_v4, %v2624_v12  ;;  %v4685_v11 = vpop.f32.mrb[131].mxu0  ;;  %v3425_v4 = vadd.f32 %v6838_v34, %v3424_v6 }
 0x2e2   :  { %8592 = vst [vmem:[#allocation55_spill] sm:$0xff] %v6891_v53  ;;  %v3426_v0 = vadd.f32 %v6842_v36, %v3425_v4 }
 0x2e4   :  { %v2637_v47 = vpop.f32.mrb[136].mxu1 }
 0x2e5   :  { %v3054_v13 = vpop.f32.mrb[132].mxu0  ;;  %v2639_v18 = vpop.f32.mrb[137].mxu1 }
 0x2e6   :  { %v6895_v45 = vadd.f32 %v3054_v13, %v2629_v43  ;;  %v4688_v40 = vpop.f32.mrb[133].mxu0  ;;  %v2640_v46 = vpop.f32.mrb[138].mxu1 }
 0x2e7   :  { %v3057_v29 = vpop.f32.mrb[134].mxu0  ;;  %v2642_v54 = vpop.f32.mrb[139].mxu1 }
 0x2e8   :  { %8593 = vst [vmem:[#allocation56_spill] sm:$0xff] %v6895_v45  ;;  %v6898_v5 = vadd.f32 %v3057_v29, %v2632_v61  ;;  %v4689_v12 = vpop.f32.mrb[135].mxu0  ;;  %v3427_v61 = vadd.f32 %v6844_v19, %v3426_v0 }
 0x2ea   :  { %8594 = vst [vmem:[#allocation57_spill] sm:$0xff] %v6898_v5  ;;  %v3428_v29 = vadd.f32 %v6848_v44, %v3427_v61 }
 0x2ec   :  { %v2645_v56 = vpop.f32.mrb[140].mxu1 }
 0x2ed   :  { %v3062_v11 = vpop.f32.mrb[136].mxu0  ;;  %v2647_v24 = vpop.f32.mrb[141].mxu1 }
 0x2ee   :  { %v6902_v1 = vadd.f32 %v3062_v11, %v2637_v47  ;;  %v4692_v43 = vpop.f32.mrb[137].mxu0  ;;  %v2648_v13 = vpop.f32.mrb[142].mxu1  ;;  %v3429_v47 = vadd.f32 %v6851_v51, %v3428_v29 }
 0x2ef   :  { %v3065_v18 = vpop.f32.mrb[138].mxu0  ;;  %v2650_v40 = vpop.f32.mrb[143].mxu1 }
 0x2f0   :  { %8595 = vst [vmem:[#allocation58_spill] sm:$0xff] %v6902_v1  ;;  %v6904_v35 = vadd.f32 %v3065_v18, %v2640_v46  ;;  %v4693_v20 = vpop.f32.mrb[139].mxu0  ;;  %v3430_v18 = vadd.f32 %v6855_v58, %v3429_v47 }
 0x2f2   :  { %8596 = vst [vmem:[#allocation59_spill] sm:$0xff] %v6904_v35  ;;  %v3431_v0 = vadd.f32 %v6858_v38, %v3430_v18 }
 0x2f4   :  { %v2653_v54 = vpop.f32.mrb[144].mxu1 }
 0x2f5   :  { %v3070_v6 = vpop.f32.mrb[140].mxu0  ;;  %v2655_v12 = vpop.f32.mrb[145].mxu1 }
 0x2f6   :  { %v6908_v34 = vadd.f32 %v3070_v6, %v2645_v56  ;;  %v4696_v4 = vpop.f32.mrb[141].mxu0  ;;  %v2656_v24 = vpop.f32.mrb[146].mxu1  ;;  %v3432_v12 = vadd.f32 %v6862_v49, %v3431_v0 }
 0x2f7   :  { %v3073_v11 = vpop.f32.mrb[142].mxu0  ;;  %v2658_v43 = vpop.f32.mrb[147].mxu1 }
 0x2f8   :  { %8597 = vst [vmem:[#allocation60_spill] sm:$0xff] %v6908_v34  ;;  %v6911_v36 = vadd.f32 %v3073_v11, %v2648_v13  ;;  %v4697_v46 = vpop.f32.mrb[143].mxu0  ;;  %v3433_v11 = vadd.f32 %v6864_v2, %v3432_v12 }
 0x2fa   :  { %8598 = vst [vmem:[#allocation61_spill] sm:$0xff] %v6911_v36  ;;  %v3434_v47 = vadd.f32 %v6868_v15, %v3433_v11 }
 0x2fc   :  { %v2661_v40 = vpop.f32.mrb[148].mxu1 }
 0x2fd   :  { %v3078_v20 = vpop.f32.mrb[144].mxu0  ;;  %v2663_v61 = vpop.f32.mrb[149].mxu1 }
 0x2fe   :  { %v6915_v44 = vadd.f32 %v3078_v20, %v2653_v54  ;;  %v4700_v56 = vpop.f32.mrb[145].mxu0  ;;  %v2664_v6 = vpop.f32.mrb[150].mxu1 }
 0x2ff   :  { %v3081_v4 = vpop.f32.mrb[146].mxu0  ;;  %v2666_v29 = vpop.f32.mrb[151].mxu1 }
 0x300   :  { %8599 = vst [vmem:[#allocation62_spill] sm:$0xff] %v6915_v44  ;;  %v6918_v51 = vadd.f32 %v3081_v4, %v2656_v24  ;;  %v4701_v13 = vpop.f32.mrb[147].mxu0  ;;  %v3435_v24 = vadd.f32 %v6871_v9, %v3434_v47 }
 0x302   :  { %8600 = vst [vmem:[#allocation63_spill] sm:$0xff] %v6918_v51  ;;  %v3436_v4 = vadd.f32 %v6875_v32, %v3435_v24 }
 0x304   :  { %v2669_v43 = vpop.f32.mrb[152].mxu1 }
 0x305   :  { %v3086_v46 = vpop.f32.mrb[148].mxu0  ;;  %v2671_v18 = vpop.f32.mrb[153].mxu1 }
 0x306   :  { %v6922_v38 = vadd.f32 %v3086_v46, %v2661_v40  ;;  %v4704_v54 = vpop.f32.mrb[149].mxu0  ;;  %v2672_v20 = vpop.f32.mrb[154].mxu1  ;;  %v3437_v40 = vadd.f32 %v6878_v23, %v3436_v4 }
 0x307   :  { %v3089_v61 = vpop.f32.mrb[150].mxu0  ;;  %v2674_v56 = vpop.f32.mrb[155].mxu1 }
 0x308   :  { %8601 = vst [vmem:[#allocation64_spill] sm:$0xff] %v6922_v38  ;;  %v6924_v58 = vadd.f32 %v3089_v61, %v2664_v6  ;;  %v4705_v0 = vpop.f32.mrb[151].mxu0  ;;  %v3438_v61 = vadd.f32 %v6882_v39, %v3437_v40 }
 0x30a   :  { %8602 = vst [vmem:[#allocation65_spill] sm:$0xff] %v6924_v58  ;;  %v3439_v47 = vadd.f32 %v6884_v63, %v3438_v61 }
 0x30c   :  { %v2677_v29 = vpop.f32.mrb[156].mxu1 }
 0x30d   :  { %v3094_v12 = vpop.f32.mrb[152].mxu0  ;;  %v2679_v13 = vpop.f32.mrb[157].mxu1 }
 0x30e   :  { %v6928_v2 = vadd.f32 %v3094_v12, %v2669_v43  ;;  %v4708_v11 = vpop.f32.mrb[153].mxu0  ;;  %v2680_v18 = vpop.f32.mrb[158].mxu1  ;;  %v3440_v13 = vadd.f32 %v6888_v31, %v3439_v47 }
 0x30f   :  { %v3097_v46 = vpop.f32.mrb[154].mxu0  ;;  %v2682_v54 = vpop.f32.mrb[159].mxu1 }
 0x310   :  { %8603 = vst [vmem:[#allocation66_spill] sm:$0xff] %v6928_v2  ;;  %v6931_v15 = vadd.f32 %v3097_v46, %v2672_v20  ;;  %v4709_v6 = vpop.f32.mrb[155].mxu0  ;;  %v3441_v46 = vadd.f32 %v6891_v53, %v3440_v13 }
 0x312   :  { %8604 = vst [vmem:[#allocation67_spill] sm:$0xff] %v6931_v15  ;;  %v3442_v40 = vadd.f32 %v6895_v45, %v3441_v46 }
 0x314   :  { %v2685_v56 = vpop.f32.mrb[160].mxu1 }
 0x315   :  { %v3102_v0 = vpop.f32.mrb[156].mxu0  ;;  %v2687_v24 = vpop.f32.mrb[161].mxu1 }
 0x316   :  { %v6935_v32 = vadd.f32 %v3102_v0, %v2677_v29  ;;  %v4712_v43 = vpop.f32.mrb[157].mxu0  ;;  %v2688_v12 = vpop.f32.mrb[162].mxu1 }
 0x317   :  { %v3105_v11 = vpop.f32.mrb[158].mxu0  ;;  %v2690_v4 = vpop.f32.mrb[163].mxu1 }
 0x318   :  { %8605 = vst [vmem:[#allocation68_spill] sm:$0xff] %v6935_v32  ;;  %v6938_v23 = vadd.f32 %v3105_v11, %v2680_v18  ;;  %v4713_v20 = vpop.f32.mrb[159].mxu0  ;;  %v3443_v18 = vadd.f32 %v6898_v5, %v3442_v40 }
 0x31a   :  { %8606 = vst [vmem:[#allocation69_spill] sm:$0xff] %v6938_v23  ;;  %v3444_v11 = vadd.f32 %v6902_v1, %v3443_v18 }
 0x31c   :  { %v2693_v54 = vpop.f32.mrb[164].mxu1 }
 0x31d   :  { %v3110_v6 = vpop.f32.mrb[160].mxu0  ;;  %v2695_v61 = vpop.f32.mrb[165].mxu1 }
 0x31e   :  { %v6942_v63 = vadd.f32 %v3110_v6, %v2685_v56  ;;  %v4716_v29 = vpop.f32.mrb[161].mxu0  ;;  %v2696_v0 = vpop.f32.mrb[166].mxu1  ;;  %v3445_v56 = vadd.f32 %v6904_v35, %v3444_v11 }
 0x31f   :  { %v3113_v24 = vpop.f32.mrb[162].mxu0  ;;  %v2698_v43 = vpop.f32.mrb[167].mxu1 }
 0x320   :  { %v6944_v39 = vadd.f32 %v3113_v24, %v2688_v12  ;;  %v4717_v47 = vpop.f32.mrb[163].mxu0  ;;  %v3446_v24 = vadd.f32 %v6908_v34, %v3445_v56 }
 0x322   :  { %8607 = vst [vmem:[#allocation70_spill] sm:$0xff] %v6944_v39  ;;  %v3447_v40 = vadd.f32 %v6911_v36, %v3446_v24 }
 0x324   :  { %v2701_v4 = vpop.f32.mrb[168].mxu1 }
 0x325   :  { %v3118_v13 = vpop.f32.mrb[164].mxu0  ;;  %v2703_v20 = vpop.f32.mrb[169].mxu1 }
 0x326   :  { %v6948_v53 = vadd.f32 %v3118_v13, %v2693_v54  ;;  %v4720_v46 = vpop.f32.mrb[165].mxu0  ;;  %v2704_v61 = vpop.f32.mrb[170].mxu1  ;;  %v3448_v20 = vadd.f32 %v6915_v44, %v3447_v40 }
 0x327   :  { %v3121_v6 = vpop.f32.mrb[166].mxu0  ;;  %v2706_v29 = vpop.f32.mrb[171].mxu1 }
 0x328   :  { %8608 = vst [vmem:[#allocation71_spill] sm:$0xff] %v6948_v53  ;;  %v6951_v45 = vadd.f32 %v3121_v6, %v2696_v0  ;;  %v4721_v12 = vpop.f32.mrb[167].mxu0  ;;  %v3449_v6 = vadd.f32 %v6918_v51, %v3448_v20 }
 0x32a   :  { %v3450_v56 = vadd.f32 %v6922_v38, %v3449_v6 }
 0x32c   :  { %v2709_v43 = vpop.f32.mrb[172].mxu1 }
 0x32d   :  { %v3126_v47 = vpop.f32.mrb[168].mxu0  ;;  %v2711_v18 = vpop.f32.mrb[173].mxu1 }
 0x32e   :  { %v6955_v1 = vadd.f32 %v3126_v47, %v2701_v4  ;;  %v4724_v54 = vpop.f32.mrb[169].mxu0  ;;  %v2712_v13 = vpop.f32.mrb[174].mxu1 }
 0x32f   :  { %v3129_v46 = vpop.f32.mrb[170].mxu0  ;;  %v2714_v11 = vpop.f32.mrb[175].mxu1 }
 0x330   :  { %v6958_v35 = vadd.f32 %v3129_v46, %v2704_v61  ;;  %v4725_v0 = vpop.f32.mrb[171].mxu0  ;;  %v3451_v61 = vadd.f32 %v6924_v58, %v3450_v56 }
 0x332   :  { %v3452_v46 = vadd.f32 %v6928_v2, %v3451_v61 }
 0x334   :  { %v2717_v29 = vpop.f32.mrb[176].mxu1 }
 0x335   :  { %v3134_v12 = vpop.f32.mrb[172].mxu0  ;;  %v2719_v24 = vpop.f32.mrb[177].mxu1 }
 0x336   :  { %v6962_v36 = vadd.f32 %v3134_v12, %v2709_v43  ;;  %v4728_v4 = vpop.f32.mrb[173].mxu0  ;;  %v2720_v47 = vpop.f32.mrb[178].mxu1  ;;  %v3453_v43 = vadd.f32 %v6931_v15, %v3452_v46 }
 0x337   :  { %v3137_v18 = vpop.f32.mrb[174].mxu0  ;;  %v2722_v54 = vpop.f32.mrb[179].mxu1 }
 0x338   :  { %v6964_v34 = vadd.f32 %v3137_v18, %v2712_v13  ;;  %v4729_v40 = vpop.f32.mrb[175].mxu0  ;;  %v3454_v18 = vadd.f32 %v6935_v32, %v3453_v43 }
 0x33a   :  { %v3455_v56 = vadd.f32 %v6938_v23, %v3454_v18 }
 0x33c   :  { %v2725_v11 = vpop.f32.mrb[180].mxu1 }
 0x33d   :  { %v3142_v20 = vpop.f32.mrb[176].mxu0  ;;  %v2727_v0 = vpop.f32.mrb[181].mxu1 }
 0x33e   :  { %v6968_v51 = vadd.f32 %v3142_v20, %v2717_v29  ;;  %v4732_v6 = vpop.f32.mrb[177].mxu0  ;;  %v2728_v24 = vpop.f32.mrb[182].mxu1  ;;  %v3456_v0 = vadd.f32 %v6942_v63, %v3455_v56 }
 0x33f   :  { %v3145_v12 = vpop.f32.mrb[178].mxu0  ;;  %v2730_v4 = vpop.f32.mrb[183].mxu1 }
 0x340   :  { %v6971_v38 = vadd.f32 %v3145_v12, %v2720_v47  ;;  %v4733_v13 = vpop.f32.mrb[179].mxu0  ;;  %v3457_v12 = vadd.f32 %v6944_v39, %v3456_v0 }
 0x342   :  { %v3458_v43 = vadd.f32 %v6948_v53, %v3457_v12 }
 0x344   :  { %v2733_v54 = vpop.f32.mrb[184].mxu1 }
 0x345   :  { %v3150_v40 = vpop.f32.mrb[180].mxu0  ;;  %v2735_v61 = vpop.f32.mrb[185].mxu1 }
 0x346   :  { %v6975_v2 = vadd.f32 %v3150_v40, %v2725_v11  ;;  %v4736_v29 = vpop.f32.mrb[181].mxu0  ;;  %v2736_v20 = vpop.f32.mrb[186].mxu1 }
 0x347   :  { %v3153_v6 = vpop.f32.mrb[182].mxu0  ;;  %v2738_v46 = vpop.f32.mrb[187].mxu1 }
 0x348   :  { %v6978_v15 = vadd.f32 %v3153_v6, %v2728_v24  ;;  %v4737_v47 = vpop.f32.mrb[183].mxu0  ;;  %v3459_v24 = vadd.f32 %v6951_v45, %v3458_v43 }
 0x34a   :  { %8609 = vst [vmem:[#allocation72_spill] sm:$0xff] %v6978_v15  ;;  %v3460_v6 = vadd.f32 %v6955_v1, %v3459_v24 }
 0x34c   :  { %v2741_v4 = vpop.f32.mrb[188].mxu1 }
 0x34d   :  { %v3158_v13 = vpop.f32.mrb[184].mxu0  ;;  %v2743_v18 = vpop.f32.mrb[189].mxu1 }
 0x34e   :  { %v6982_v23 = vadd.f32 %v3158_v13, %v2733_v54  ;;  %v4740_v11 = vpop.f32.mrb[185].mxu0  ;;  %v2744_v40 = vpop.f32.mrb[190].mxu1  ;;  %v3461_v54 = vadd.f32 %v6958_v35, %v3460_v6 }
 0x34f   :  { %v3161_v61 = vpop.f32.mrb[186].mxu0  ;;  %v2746_v29 = vpop.f32.mrb[191].mxu1 }
 0x350   :  { %8610 = vst [vmem:[#allocation73_spill] sm:$0xff] %v6982_v23  ;;  %v6984_v32 = vadd.f32 %v3161_v61, %v2736_v20  ;;  %v4741_v56 = vpop.f32.mrb[187].mxu0  ;;  %v3462_v61 = vadd.f32 %v6962_v36, %v3461_v54 }
 0x352   :  { %8611 = vst [vmem:[#allocation74_spill] sm:$0xff] %v6984_v32  ;;  %v3463_v43 = vadd.f32 %v6964_v34, %v3462_v61 }
 0x354   :  { %v2749_v46 = vpop.f32.mrb[192].mxu1 }
 0x355   :  { %v3166_v0 = vpop.f32.mrb[188].mxu0  ;;  %v2751_v47 = vpop.f32.mrb[193].mxu1 }
 0x356   :  { %v6988_v39 = vadd.f32 %v3166_v0, %v2741_v4  ;;  %v4744_v12 = vpop.f32.mrb[189].mxu0  ;;  %v2752_v18 = vpop.f32.mrb[194].mxu1  ;;  %v3464_v4 = vadd.f32 %v6968_v51, %v3463_v43 }
 0x357   :  { %v3169_v13 = vpop.f32.mrb[190].mxu0  ;;  %v2754_v11 = vpop.f32.mrb[195].mxu1 }
 0x358   :  { %8612 = vst [vmem:[#allocation75_spill] sm:$0xff] %v6988_v39  ;;  %v6991_v53 = vadd.f32 %v3169_v13, %v2744_v40  ;;  %v4745_v20 = vpop.f32.mrb[191].mxu0  ;;  %v3465_v6 = vadd.f32 %v6971_v38, %v3464_v4 }
 0x35a   :  { %8613 = vst [vmem:[#allocation76_spill] sm:$0xff] %v6991_v53  ;;  %v3466_v40 = vadd.f32 %v6975_v2, %v3465_v6 }
 0x35c   :  { %v3467_v13 = vadd.f32 %v6978_v15, %v3466_v40 }
 0x35d   :  { %v3174_v29 = vpop.f32.mrb[192].mxu0 }
 0x35e   :  { %v6995_v56 = vadd.f32 %v3174_v29, %v2749_v46  ;;  %v4748_v24 = vpop.f32.mrb[193].mxu0  ;;  %v3468_v54 = vadd.f32 %v6982_v23, %v3467_v13 }
 0x35f   :  { %v3177_v0 = vpop.f32.mrb[194].mxu0 }
 0x360   :  { %8614 = vst [vmem:[#allocation77_spill] sm:$0xff] %v6995_v56  ;;  %v6998_v47 = vadd.f32 %v3177_v0, %v2752_v18  ;;  %v4749_v12 = vpop.f32.mrb[195].mxu0  ;;  %v3469_v11 = vadd.f32 %v6984_v32, %v3468_v54 }
 0x362   :  { %v3470_v46 = vadd.f32 %v6988_v39, %v3469_v11 }
 0x364   :  { %v3471_v20 = vadd.f32 %v6991_v53, %v3470_v46 }
 0x366   :  { %v3472_v61 = vadd.f32 %v6995_v56, %v3471_v20 }
 0x368   :  { %v3473_v18 = vadd.f32 %v6998_v47, %v3472_v61 }
 0x36a   :  { %v3474_v43 = vrot.slane %v3473_v18, 4 }
 0x36c   :  { %v3475_v29 = vadd.f32 %v3474_v43, %v3473_v18 }
 0x36e   :  { %v3476_v24 = vrot.slane %v3475_v29, 2 }
 0x370   :  { %v3477_v4 = vadd.f32 %v3476_v24, %v3475_v29 }
 0x372   :  { %v3478_v0 = vrot.slane %v3477_v4, 1 }
 0x374   :  { %v3479_v12 = vadd.f32 %v3478_v0, %v3477_v4 }
 0x376   :  { %v7009_v6 = vmul.f32 0.0012755102, %v3479_v12 }
 0x378   :  { %v3481_v40 = vsub.f32 %v6438_v17, %v7009_v6  ;;  %v3482_v13 = vsub.f32 %v6447_v42, %v7009_v6  ;;  %v3483_v54 = vsub.f32 %v6455_v57, %v7009_v6  ;;  %v3484_v20 = vsub.f32 %v6464_v14, %v7009_v6 }
 0x379   :  { %v3485_v61 = vsub.f32 %v6472_v30, %v7009_v6  ;;  %v3486_v29 = vsub.f32 %v6481_v52, %v7009_v6  ;;  %v3487_v0 = vsub.f32 %v6489_v7, %v7009_v6  ;;  %v3489_v30 = vsub.f32 %v6506_v50, %v7009_v6 }
 0x37a   :  { %v3579_v11 = vmul.f32 %v3481_v40, %v3481_v40  ;;  %v3580_v46 = vmul.f32 %v3482_v13, %v3482_v13  ;;  %v3581_v18 = vmul.f32 %v3483_v54, %v3483_v54  ;;  %v3582_v24 = vmul.f32 %v3484_v20, %v3484_v20 }
 0x37b   :  { %v3583_v12 = vmul.f32 %v3485_v61, %v3485_v61  ;;  %v3488_v40 = vsub.f32 %v6498_v27, %v7009_v6  ;;  %v3584_v13 = vmul.f32 %v3486_v29, %v3486_v29  ;;  %v3585_v54 = vmul.f32 %v3487_v0, %v3487_v0 }
 0x37c   :  { %v3677_v43 = vadd.f32 %v3580_v46, %v3579_v11  ;;  %v3490_v46 = vsub.f32 %v6515_v26, %v7009_v6  ;;  %v3587_v61 = vmul.f32 %v3489_v30, %v3489_v30 }
 0x37d   :  { %v3586_v20 = vmul.f32 %v3488_v40, %v3488_v40 }
 0x37e   :  { %v3678_v4 = vadd.f32 %v3677_v43, %v3581_v18  ;;  %v3491_v43 = vsub.f32 %v6523_v21, %v7009_v6  ;;  %v3588_v29 = vmul.f32 %v3490_v46, %v3490_v46 }
 0x380   :  { %v3679_v57 = vadd.f32 %v3678_v4, %v3582_v24  ;;  %v3492_v4 = vsub.f32 %v6532_v33, %v7009_v6  ;;  %v3589_v0 = vmul.f32 %v3491_v43, %v3491_v43 }
 0x382   :  { %v3680_v14 = vadd.f32 %v3679_v57, %v3583_v12  ;;  %v3493_v12 = vsub.f32 %v6540_v3, %v7009_v6  ;;  %v3590_v40 = vmul.f32 %v3492_v4, %v3492_v4 }
 0x384   :  { %v3681_v11 = vadd.f32 %v3680_v14, %v3584_v13  ;;  %v3494_v13 = vsub.f32 %v6549_v41, %v7009_v6  ;;  %v3591_v30 = vmul.f32 %v3493_v12, %v3493_v12 }
 0x386   :  { %v3682_v18 = vadd.f32 %v3681_v11, %v3585_v54  ;;  %v3495_v11 = vsub.f32 %v6557_v37, %v7009_v6  ;;  %v3592_v46 = vmul.f32 %v3494_v13, %v3494_v13 }
 0x388   :  { %v3683_v24 = vadd.f32 %v3682_v18, %v3586_v20  ;;  %v3496_v18 = vsub.f32 %v6566_v48, %v7009_v6  ;;  %v3593_v43 = vmul.f32 %v3495_v11, %v3495_v11 }
 0x38a   :  { %v3684_v57 = vadd.f32 %v3683_v24, %v3587_v61  ;;  %v3497_v24 = vsub.f32 %v6574_v8, %v7009_v6  ;;  %v3594_v4 = vmul.f32 %v3496_v18, %v3496_v18 }
 0x38c   :  { %v3685_v14 = vadd.f32 %v3684_v57, %v3588_v29  ;;  %v3498_v57 = vsub.f32 %v6583_v55, %v7009_v6  ;;  %v3595_v12 = vmul.f32 %v3497_v24, %v3497_v24 }
 0x38e   :  { %v3686_v54 = vadd.f32 %v3685_v14, %v3589_v0  ;;  %v3499_v14 = vsub.f32 %v6591_v22, %v7009_v6  ;;  %v3596_v13 = vmul.f32 %v3498_v57, %v3498_v57 }
 0x390   :  { %v3687_v20 = vadd.f32 %v3686_v54, %v3590_v40  ;;  %v3500_v54 = vsub.f32 %v6600_v62, %v7009_v6  ;;  %v3597_v11 = vmul.f32 %v3499_v14, %v3499_v14 }
 0x392   :  { %v3688_v61 = vadd.f32 %v3687_v20, %v3591_v30  ;;  %v8615_v20 = vld [vmem:[#allocation10_spill] sm:$0xff]  ;;  %v3598_v18 = vmul.f32 %v3500_v54, %v3500_v54 }
 0x393   :  { %v3501_v8 = vsub.f32 %v8615_v20, %v7009_v6 }
 0x394   :  { %v3689_v29 = vadd.f32 %v3688_v61, %v3592_v46  ;;  %v8616_v61 = vld [vmem:[#allocation11_spill] sm:$0xff] }
 0x395   :  { %v3502_v55 = vsub.f32 %v8616_v61, %v7009_v6  ;;  %v3599_v24 = vmul.f32 %v3501_v8, %v3501_v8 }
 0x396   :  { %v3690_v0 = vadd.f32 %v3689_v29, %v3593_v43  ;;  %v8617_v29 = vld [vmem:[#allocation12_spill] sm:$0xff] }
 0x397   :  { %v3503_v22 = vsub.f32 %v8617_v29, %v7009_v6  ;;  %v3600_v57 = vmul.f32 %v3502_v55, %v3502_v55 }
 0x398   :  { %v3691_v40 = vadd.f32 %v3690_v0, %v3594_v4  ;;  %v8618_v0 = vld [vmem:[#allocation13_spill] sm:$0xff] }
 0x399   :  { %v3504_v62 = vsub.f32 %v8618_v0, %v7009_v6  ;;  %v3601_v14 = vmul.f32 %v3503_v22, %v3503_v22 }
 0x39a   :  { %v3692_v30 = vadd.f32 %v3691_v40, %v3595_v12  ;;  %v8619_v40 = vld [vmem:[#allocation14_spill] sm:$0xff] }
 0x39b   :  { %v3505_v20 = vsub.f32 %v8619_v40, %v7009_v6  ;;  %v3602_v54 = vmul.f32 %v3504_v62, %v3504_v62 }
 0x39c   :  { %v3693_v46 = vadd.f32 %v3692_v30, %v3596_v13  ;;  %v8620_v30 = vld [vmem:[#allocation15_spill] sm:$0xff] }
 0x39d   :  { %v3506_v61 = vsub.f32 %v8620_v30, %v7009_v6  ;;  %v3603_v8 = vmul.f32 %v3505_v20, %v3505_v20 }
 0x39e   :  { %v3694_v43 = vadd.f32 %v3693_v46, %v3597_v11  ;;  %v8621_v46 = vld [vmem:[#allocation16_spill] sm:$0xff] }
 0x39f   :  { %v3507_v29 = vsub.f32 %v8621_v46, %v7009_v6  ;;  %v3604_v55 = vmul.f32 %v3506_v61, %v3506_v61 }
 0x3a0   :  { %v3695_v4 = vadd.f32 %v3694_v43, %v3598_v18  ;;  %v3508_v43 = vsub.f32 %v6668_v28, %v7009_v6 }
 0x3a1   :  { %v3605_v22 = vmul.f32 %v3507_v29, %v3507_v29 }
 0x3a2   :  { %v3696_v12 = vadd.f32 %v3695_v4, %v3599_v24  ;;  %v8622_v4 = vld [vmem:[#allocation18_spill] sm:$0xff]  ;;  %v3606_v62 = vmul.f32 %v3508_v43, %v3508_v43 }
 0x3a3   :  { %v3509_v40 = vsub.f32 %v8622_v4, %v7009_v6 }
 0x3a4   :  { %v3697_v13 = vadd.f32 %v3696_v12, %v3600_v57  ;;  %v8623_v12 = vld [vmem:[#allocation19_spill] sm:$0xff] }
 0x3a5   :  { %v3510_v30 = vsub.f32 %v8623_v12, %v7009_v6  ;;  %v3607_v20 = vmul.f32 %v3509_v40, %v3509_v40 }
 0x3a6   :  { %v3698_v11 = vadd.f32 %v3697_v13, %v3601_v14  ;;  %v8624_v13 = vld [vmem:[#allocation20_spill] sm:$0xff] }
 0x3a7   :  { %v3511_v46 = vsub.f32 %v8624_v13, %v7009_v6  ;;  %v3608_v61 = vmul.f32 %v3510_v30, %v3510_v30 }
 0x3a8   :  { %v3699_v18 = vadd.f32 %v3698_v11, %v3602_v54  ;;  %v8625_v11 = vld [vmem:[#allocation21_spill] sm:$0xff] }
 0x3a9   :  { %v3512_v28 = vsub.f32 %v8625_v11, %v7009_v6  ;;  %v3609_v29 = vmul.f32 %v3511_v46, %v3511_v46 }
 0x3aa   :  { %v3700_v24 = vadd.f32 %v3699_v18, %v3603_v8  ;;  %v3513_v18 = vsub.f32 %v6713_v25, %v7009_v6 }
 0x3ab   :  { %v3610_v43 = vmul.f32 %v3512_v28, %v3512_v28 }
 0x3ac   :  { %v3701_v57 = vadd.f32 %v3700_v24, %v3604_v55  ;;  %v8626_v24 = vld [vmem:[#allocation23_spill] sm:$0xff]  ;;  %v3611_v40 = vmul.f32 %v3513_v18, %v3513_v18 }
 0x3ad   :  { %v3514_v12 = vsub.f32 %v8626_v24, %v7009_v6 }
 0x3ae   :  { %v3702_v14 = vadd.f32 %v3701_v57, %v3605_v22  ;;  %v8627_v57 = vld [vmem:[#allocation24_spill] sm:$0xff] }
 0x3af   :  { %v3515_v13 = vsub.f32 %v8627_v57, %v7009_v6  ;;  %v3612_v30 = vmul.f32 %v3514_v12, %v3514_v12 }
 0x3b0   :  { %v3703_v54 = vadd.f32 %v3702_v14, %v3606_v62  ;;  %v3516_v14 = vsub.f32 %v6742_v59, %v7009_v6 }
 0x3b1   :  { %v3613_v46 = vmul.f32 %v3515_v13, %v3515_v13 }
 0x3b2   :  { %v3704_v8 = vadd.f32 %v3703_v54, %v3607_v20  ;;  %v8628_v54 = vld [vmem:[#allocation26_spill] sm:$0xff]  ;;  %v3614_v28 = vmul.f32 %v3516_v14, %v3516_v14 }
 0x3b3   :  { %v3517_v25 = vsub.f32 %v8628_v54, %v7009_v6 }
 0x3b4   :  { %v3705_v55 = vadd.f32 %v3704_v8, %v3608_v61  ;;  %v8629_v8 = vld [vmem:[#allocation27_spill] sm:$0xff] }
 0x3b5   :  { %v3518_v24 = vsub.f32 %v8629_v8, %v7009_v6  ;;  %v3615_v18 = vmul.f32 %v3517_v25, %v3517_v25 }
 0x3b6   :  { %v3706_v22 = vadd.f32 %v3705_v55, %v3609_v29  ;;  %v8630_v55 = vld [vmem:[#allocation28_spill] sm:$0xff] }
 0x3b7   :  { %v3519_v57 = vsub.f32 %v8630_v55, %v7009_v6  ;;  %v3616_v12 = vmul.f32 %v3518_v24, %v3518_v24 }
 0x3b8   :  { %v3707_v62 = vadd.f32 %v3706_v22, %v3610_v43  ;;  %v8631_v22 = vld [vmem:[#allocation29_spill] sm:$0xff] }
 0x3b9   :  { %v3520_v59 = vsub.f32 %v8631_v22, %v7009_v6  ;;  %v3617_v13 = vmul.f32 %v3519_v57, %v3519_v57 }
 0x3ba   :  { %v3708_v20 = vadd.f32 %v3707_v62, %v3611_v40  ;;  %v3521_v62 = vsub.f32 %v6791_v16, %v7009_v6 }
 0x3bb   :  { %v3618_v14 = vmul.f32 %v3520_v59, %v3520_v59 }
 0x3bc   :  { %v3709_v61 = vadd.f32 %v3708_v20, %v3612_v30  ;;  %v8632_v20 = vld [vmem:[#allocation31_spill] sm:$0xff]  ;;  %v3619_v25 = vmul.f32 %v3521_v62, %v3521_v62 }
 0x3bd   :  { %v3522_v8 = vsub.f32 %v8632_v20, %v7009_v6 }
 0x3be   :  { %v3710_v29 = vadd.f32 %v3709_v61, %v3613_v46  ;;  %v8633_v61 = vld [vmem:[#allocation32_spill] sm:$0xff] }
 0x3bf   :  { %v3523_v55 = vsub.f32 %v8633_v61, %v7009_v6  ;;  %v3620_v24 = vmul.f32 %v3522_v8, %v3522_v8 }
 0x3c0   :  { %v3711_v43 = vadd.f32 %v3710_v29, %v3614_v28  ;;  %v3524_v29 = vsub.f32 %v6812_v60, %v7009_v6 }
 0x3c1   :  { %v3621_v57 = vmul.f32 %v3523_v55, %v3523_v55 }
 0x3c2   :  { %v3712_v40 = vadd.f32 %v3711_v43, %v3615_v18  ;;  %v8634_v43 = vld [vmem:[#allocation34_spill] sm:$0xff]  ;;  %v3622_v59 = vmul.f32 %v3524_v29, %v3524_v29 }
 0x3c3   :  { %v3525_v16 = vsub.f32 %v8634_v43, %v7009_v6 }
 0x3c4   :  { %v3713_v30 = vadd.f32 %v3712_v40, %v3616_v12  ;;  %v8635_v40 = vld [vmem:[#allocation35_spill] sm:$0xff] }
 0x3c5   :  { %v3526_v20 = vsub.f32 %v8635_v40, %v7009_v6  ;;  %v3623_v62 = vmul.f32 %v3525_v16, %v3525_v16 }
 0x3c6   :  { %v3714_v46 = vadd.f32 %v3713_v30, %v3617_v13  ;;  %v8636_v30 = vld [vmem:[#allocation36_spill] sm:$0xff] }
 0x3c7   :  { %v3527_v61 = vsub.f32 %v8636_v30, %v7009_v6  ;;  %v3624_v8 = vmul.f32 %v3526_v20, %v3526_v20 }
 0x3c8   :  { %v3715_v28 = vadd.f32 %v3714_v46, %v3618_v14  ;;  %v8637_v46 = vld [vmem:[#allocation37_spill] sm:$0xff] }
 0x3c9   :  { %v3528_v60 = vsub.f32 %v8637_v46, %v7009_v6  ;;  %v3625_v55 = vmul.f32 %v3527_v61, %v3527_v61 }
 0x3ca   :  { %v3716_v18 = vadd.f32 %v3715_v28, %v3619_v25  ;;  %v3529_v28 = vsub.f32 %v6834_v10, %v7009_v6 }
 0x3cb   :  { %v3626_v29 = vmul.f32 %v3528_v60, %v3528_v60 }
 0x3cc   :  { %v3717_v12 = vadd.f32 %v3716_v18, %v3620_v24  ;;  %v8638_v18 = vld [vmem:[#allocation39_spill] sm:$0xff]  ;;  %v3627_v16 = vmul.f32 %v3529_v28, %v3529_v28 }
 0x3cd   :  { %v3530_v40 = vsub.f32 %v8638_v18, %v7009_v6 }
 0x3ce   :  { %v3718_v13 = vadd.f32 %v3717_v12, %v3621_v57  ;;  %v8639_v12 = vld [vmem:[#allocation40_spill] sm:$0xff] }
 0x3cf   :  { %v3531_v30 = vsub.f32 %v8639_v12, %v7009_v6  ;;  %v3628_v20 = vmul.f32 %v3530_v40, %v3530_v40 }
 0x3d0   :  { %v3719_v14 = vadd.f32 %v3718_v13, %v3622_v59  ;;  %v3532_v13 = vsub.f32 %v6844_v19, %v7009_v6 }
 0x3d1   :  { %v3629_v61 = vmul.f32 %v3531_v30, %v3531_v30 }
 0x3d2   :  { %v3720_v25 = vadd.f32 %v3719_v14, %v3623_v62  ;;  %v8640_v14 = vld [vmem:[#allocation42_spill] sm:$0xff]  ;;  %v3630_v60 = vmul.f32 %v3532_v13, %v3532_v13 }
 0x3d3   :  { %v3533_v10 = vsub.f32 %v8640_v14, %v7009_v6 }
 0x3d4   :  { %v3721_v24 = vadd.f32 %v3720_v25, %v3624_v8  ;;  %v8641_v25 = vld [vmem:[#allocation43_spill] sm:$0xff] }
 0x3d5   :  { %v3534_v18 = vsub.f32 %v8641_v25, %v7009_v6  ;;  %v3631_v28 = vmul.f32 %v3533_v10, %v3533_v10 }
 0x3d6   :  { %v3722_v57 = vadd.f32 %v3721_v24, %v3625_v55  ;;  %v8642_v24 = vld [vmem:[#allocation44_spill] sm:$0xff] }
 0x3d7   :  { %v3535_v12 = vsub.f32 %v8642_v24, %v7009_v6  ;;  %v3632_v40 = vmul.f32 %v3534_v18, %v3534_v18 }
 0x3d8   :  { %v3723_v59 = vadd.f32 %v3722_v57, %v3626_v29  ;;  %v8643_v57 = vld [vmem:[#allocation45_spill] sm:$0xff] }
 0x3d9   :  { %v3536_v19 = vsub.f32 %v8643_v57, %v7009_v6  ;;  %v3633_v30 = vmul.f32 %v3535_v12, %v3535_v12 }
 0x3da   :  { %v3724_v62 = vadd.f32 %v3723_v59, %v3627_v16  ;;  %v3537_v59 = vsub.f32 %v6862_v49, %v7009_v6 }
 0x3db   :  { %v3634_v13 = vmul.f32 %v3536_v19, %v3536_v19 }
 0x3dc   :  { %v3725_v8 = vadd.f32 %v3724_v62, %v3628_v20  ;;  %v8644_v62 = vld [vmem:[#allocation47_spill] sm:$0xff]  ;;  %v3635_v10 = vmul.f32 %v3537_v59, %v3537_v59 }
 0x3dd   :  { %v3538_v25 = vsub.f32 %v8644_v62, %v7009_v6 }
 0x3de   :  { %v3726_v55 = vadd.f32 %v3725_v8, %v3629_v61  ;;  %v8645_v8 = vld [vmem:[#allocation48_spill] sm:$0xff] }
 0x3df   :  { %v3539_v24 = vsub.f32 %v8645_v8, %v7009_v6  ;;  %v3636_v18 = vmul.f32 %v3538_v25, %v3538_v25 }
 0x3e0   :  { %v3727_v29 = vadd.f32 %v3726_v55, %v3630_v60  ;;  %v3540_v55 = vsub.f32 %v6871_v9, %v7009_v6 }
 0x3e1   :  { %v3637_v12 = vmul.f32 %v3539_v24, %v3539_v24 }
 0x3e2   :  { %v3728_v16 = vadd.f32 %v3727_v29, %v3631_v28  ;;  %v8646_v29 = vld [vmem:[#allocation50_spill] sm:$0xff]  ;;  %v3638_v19 = vmul.f32 %v3540_v55, %v3540_v55 }
 0x3e3   :  { %v3541_v49 = vsub.f32 %v8646_v29, %v7009_v6 }
 0x3e4   :  { %v3729_v20 = vadd.f32 %v3728_v16, %v3632_v40  ;;  %v8647_v16 = vld [vmem:[#allocation51_spill] sm:$0xff] }
 0x3e5   :  { %v3542_v62 = vsub.f32 %v8647_v16, %v7009_v6  ;;  %v3639_v59 = vmul.f32 %v3541_v49, %v3541_v49 }
 0x3e6   :  { %v3730_v61 = vadd.f32 %v3729_v20, %v3633_v30  ;;  %v8648_v20 = vld [vmem:[#allocation52_spill] sm:$0xff] }
 0x3e7   :  { %v3543_v8 = vsub.f32 %v8648_v20, %v7009_v6  ;;  %v3640_v25 = vmul.f32 %v3542_v62, %v3542_v62 }
 0x3e8   :  { %v3731_v60 = vadd.f32 %v3730_v61, %v3634_v13  ;;  %v8649_v61 = vld [vmem:[#allocation53_spill] sm:$0xff] }
 0x3e9   :  { %v3544_v9 = vsub.f32 %v8649_v61, %v7009_v6  ;;  %v3641_v24 = vmul.f32 %v3543_v8, %v3543_v8 }
 0x3ea   :  { %v3732_v28 = vadd.f32 %v3731_v60, %v3635_v10  ;;  %v3545_v60 = vsub.f32 %v6888_v31, %v7009_v6 }
 0x3eb   :  { %v3642_v55 = vmul.f32 %v3544_v9, %v3544_v9 }
 0x3ec   :  { %v3733_v40 = vadd.f32 %v3732_v28, %v3636_v18  ;;  %v8650_v28 = vld [vmem:[#allocation55_spill] sm:$0xff]  ;;  %v3643_v49 = vmul.f32 %v3545_v60, %v3545_v60 }
 0x3ed   :  { %v3546_v16 = vsub.f32 %v8650_v28, %v7009_v6 }
 0x3ee   :  { %v3734_v30 = vadd.f32 %v3733_v40, %v3637_v12  ;;  %v8651_v40 = vld [vmem:[#allocation56_spill] sm:$0xff] }
 0x3ef   :  { %v3547_v20 = vsub.f32 %v8651_v40, %v7009_v6  ;;  %v3644_v62 = vmul.f32 %v3546_v16, %v3546_v16 }
 0x3f0   :  { %v3735_v13 = vadd.f32 %v3734_v30, %v3638_v19  ;;  %v3548_v30 = vsub.f32 %v6898_v5, %v7009_v6 }
 0x3f1   :  { %v3645_v8 = vmul.f32 %v3547_v20, %v3547_v20 }
 0x3f2   :  { %v3736_v10 = vadd.f32 %v3735_v13, %v3639_v59  ;;  %v8652_v13 = vld [vmem:[#allocation58_spill] sm:$0xff]  ;;  %v3646_v9 = vmul.f32 %v3548_v30, %v3548_v30 }
 0x3f3   :  { %v3549_v31 = vsub.f32 %v8652_v13, %v7009_v6 }
 0x3f4   :  { %v3737_v18 = vadd.f32 %v3736_v10, %v3640_v25  ;;  %v8653_v10 = vld [vmem:[#allocation59_spill] sm:$0xff] }
 0x3f5   :  { %v3550_v28 = vsub.f32 %v8653_v10, %v7009_v6  ;;  %v3647_v60 = vmul.f32 %v3549_v31, %v3549_v31 }
 0x3f6   :  { %v3738_v12 = vadd.f32 %v3737_v18, %v3641_v24  ;;  %v8654_v18 = vld [vmem:[#allocation60_spill] sm:$0xff] }
 0x3f7   :  { %v3551_v40 = vsub.f32 %v8654_v18, %v7009_v6  ;;  %v3648_v16 = vmul.f32 %v3550_v28, %v3550_v28 }
 0x3f8   :  { %v3739_v19 = vadd.f32 %v3738_v12, %v3642_v55  ;;  %v8655_v12 = vld [vmem:[#allocation61_spill] sm:$0xff] }
 0x3f9   :  { %v3552_v5 = vsub.f32 %v8655_v12, %v7009_v6  ;;  %v3649_v20 = vmul.f32 %v3551_v40, %v3551_v40 }
 0x3fa   :  { %v3740_v59 = vadd.f32 %v3739_v19, %v3643_v49  ;;  %v3553_v19 = vsub.f32 %v6915_v44, %v7009_v6 }
 0x3fb   :  { %v3650_v30 = vmul.f32 %v3552_v5, %v3552_v5 }
 0x3fc   :  { %v3741_v25 = vadd.f32 %v3740_v59, %v3644_v62  ;;  %v8656_v59 = vld [vmem:[#allocation63_spill] sm:$0xff]  ;;  %v3651_v31 = vmul.f32 %v3553_v19, %v3553_v19 }
 0x3fd   :  { %v3554_v10 = vsub.f32 %v8656_v59, %v7009_v6 }
 0x3fe   :  { %v3742_v24 = vadd.f32 %v3741_v25, %v3645_v8  ;;  %v8657_v25 = vld [vmem:[#allocation64_spill] sm:$0xff] }
 0x3ff   :  { %v3555_v18 = vsub.f32 %v8657_v25, %v7009_v6  ;;  %v3652_v28 = vmul.f32 %v3554_v10, %v3554_v10 }
 0x400   :  { %v3743_v55 = vadd.f32 %v3742_v24, %v3646_v9  ;;  %v3556_v24 = vsub.f32 %v6924_v58, %v7009_v6 }
 0x401   :  { %v3653_v40 = vmul.f32 %v3555_v18, %v3555_v18 }
 0x402   :  { %v3744_v49 = vadd.f32 %v3743_v55, %v3647_v60  ;;  %v8658_v55 = vld [vmem:[#allocation66_spill] sm:$0xff]  ;;  %v3654_v5 = vmul.f32 %v3556_v24, %v3556_v24 }
 0x403   :  { %v3557_v44 = vsub.f32 %v8658_v55, %v7009_v6 }
 0x404   :  { %v3745_v62 = vadd.f32 %v3744_v49, %v3648_v16  ;;  %v8659_v49 = vld [vmem:[#allocation67_spill] sm:$0xff] }
 0x405   :  { %v3558_v59 = vsub.f32 %v8659_v49, %v7009_v6  ;;  %v3655_v19 = vmul.f32 %v3557_v44, %v3557_v44 }
 0x406   :  { %v3746_v8 = vadd.f32 %v3745_v62, %v3649_v20  ;;  %v8660_v62 = vld [vmem:[#allocation68_spill] sm:$0xff] }
 0x407   :  { %v3559_v25 = vsub.f32 %v8660_v62, %v7009_v6  ;;  %v3656_v10 = vmul.f32 %v3558_v59, %v3558_v59 }
 0x408   :  { %v3747_v9 = vadd.f32 %v3746_v8, %v3650_v30  ;;  %v8661_v8 = vld [vmem:[#allocation69_spill] sm:$0xff] }
 0x409   :  { %v3560_v58 = vsub.f32 %v8661_v8, %v7009_v6  ;;  %v3657_v18 = vmul.f32 %v3559_v25, %v3559_v25 }
 0x40a   :  { %v3748_v60 = vadd.f32 %v3747_v9, %v3651_v31  ;;  %v3561_v9 = vsub.f32 %v6942_v63, %v7009_v6 }
 0x40b   :  { %v3658_v24 = vmul.f32 %v3560_v58, %v3560_v58 }
 0x40c   :  { %v3749_v16 = vadd.f32 %v3748_v60, %v3652_v28  ;;  %v8662_v60 = vld [vmem:[#allocation70_spill] sm:$0xff]  ;;  %v3659_v44 = vmul.f32 %v3561_v9, %v3561_v9 }
 0x40d   :  { %v3562_v49 = vsub.f32 %v8662_v60, %v7009_v6 }
 0x40e   :  { %v3750_v20 = vadd.f32 %v3749_v16, %v3653_v40  ;;  %v8663_v16 = vld [vmem:[#allocation71_spill] sm:$0xff] }
 0x40f   :  { %v3563_v62 = vsub.f32 %v8663_v16, %v7009_v6  ;;  %v3660_v59 = vmul.f32 %v3562_v49, %v3562_v49 }
 0x410   :  { %v3751_v30 = vadd.f32 %v3750_v20, %v3654_v5  ;;  %v3564_v20 = vsub.f32 %v6951_v45, %v7009_v6 }
 0x411   :  { %v3661_v25 = vmul.f32 %v3563_v62, %v3563_v62 }
 0x412   :  { %v3752_v31 = vadd.f32 %v3751_v30, %v3655_v19  ;;  %v3565_v30 = vsub.f32 %v6955_v1, %v7009_v6  ;;  %v3662_v58 = vmul.f32 %v3564_v20, %v3564_v20 }
 0x414   :  { %v3753_v28 = vadd.f32 %v3752_v31, %v3656_v10  ;;  %v3566_v31 = vsub.f32 %v6958_v35, %v7009_v6  ;;  %v3663_v9 = vmul.f32 %v3565_v30, %v3565_v30 }
 0x416   :  { %v3754_v40 = vadd.f32 %v3753_v28, %v3657_v18  ;;  %v3567_v28 = vsub.f32 %v6962_v36, %v7009_v6  ;;  %v3664_v49 = vmul.f32 %v3566_v31, %v3566_v31 }
 0x418   :  { %v3755_v5 = vadd.f32 %v3754_v40, %v3658_v24  ;;  %v3568_v40 = vsub.f32 %v6964_v34, %v7009_v6  ;;  %v3665_v62 = vmul.f32 %v3567_v28, %v3567_v28 }
 0x41a   :  { %v3756_v19 = vadd.f32 %v3755_v5, %v3659_v44  ;;  %v3569_v5 = vsub.f32 %v6968_v51, %v7009_v6  ;;  %v3666_v20 = vmul.f32 %v3568_v40, %v3568_v40 }
 0x41c   :  { %v3757_v10 = vadd.f32 %v3756_v19, %v3660_v59  ;;  %v3570_v19 = vsub.f32 %v6971_v38, %v7009_v6  ;;  %v3667_v30 = vmul.f32 %v3569_v5, %v3569_v5 }
 0x41e   :  { %v3758_v18 = vadd.f32 %v3757_v10, %v3661_v25  ;;  %v3571_v10 = vsub.f32 %v6975_v2, %v7009_v6  ;;  %v3668_v31 = vmul.f32 %v3570_v19, %v3570_v19 }
 0x420   :  { %v3759_v24 = vadd.f32 %v3758_v18, %v3662_v58  ;;  %v3572_v18 = vsub.f32 %v6978_v15, %v7009_v6  ;;  %v3669_v28 = vmul.f32 %v3571_v10, %v3571_v10 }
 0x422   :  { %v3760_v44 = vadd.f32 %v3759_v24, %v3663_v9  ;;  %v3573_v24 = vsub.f32 %v6982_v23, %v7009_v6  ;;  %v3670_v40 = vmul.f32 %v3572_v18, %v3572_v18 }
 0x424   :  { %v3761_v59 = vadd.f32 %v3760_v44, %v3664_v49  ;;  %v3574_v44 = vsub.f32 %v6984_v32, %v7009_v6  ;;  %v3671_v5 = vmul.f32 %v3573_v24, %v3573_v24 }
 0x426   :  { %v3762_v25 = vadd.f32 %v3761_v59, %v3665_v62  ;;  %v3575_v59 = vsub.f32 %v6988_v39, %v7009_v6  ;;  %v3672_v19 = vmul.f32 %v3574_v44, %v3574_v44 }
 0x428   :  { %v3763_v58 = vadd.f32 %v3762_v25, %v3666_v20  ;;  %v3576_v25 = vsub.f32 %v6991_v53, %v7009_v6  ;;  %v3673_v10 = vmul.f32 %v3575_v59, %v3575_v59  ;;  %v3789_v59 = vlaneseq }
 0x42a   :  { %v3764_v9 = vadd.f32 %v3763_v58, %v3667_v30  ;;  %v3577_v58 = vsub.f32 %v6995_v56, %v7009_v6  ;;  %v3674_v18 = vmul.f32 %v3576_v25, %v3576_v25  ;;  %v3781_v25 = vld [vmem:[%s8412_s2] sm:$0x1] }
 0x42c   :  { %v3765_v49 = vadd.f32 %v3764_v9, %v3668_v31  ;;  %v3578_v9 = vsub.f32 %v6998_v47, %v7009_v6 }
 0x42e   :  { %v3766_v62 = vadd.f32 %v3765_v49, %v3669_v28  ;;  %v3675_v49 = vmul.f32 %v3577_v58, %v3577_v58  ;;  %v3676_v39 = vmul.f32 %v3578_v9, %v3578_v9 }
 0x430   :  { %v3767_v20 = vadd.f32 %v3766_v62, %v3670_v40 }
 0x432   :  { %v3768_v30 = vadd.f32 %v3767_v20, %v3671_v5 }
 0x434   :  { %v3769_v31 = vadd.f32 %v3768_v30, %v3672_v19  ;;  %v7207_v19 = vshrl.u32 %v3789_v59, 7  ;;  %v8670_v59 = vld [vmem:[#allocation9_spill] sm:$0xff] }
 0x436   :  { %v3770_v28 = vadd.f32 %v3769_v31, %v3673_v10  ;;  %v8539_v30 = vsub.s32 0, %v7207_v19  ;;  %v8664_v31 = vld [vmem:[#allocation3_spill] sm:$0xff] }
 0x438   :  { %v3771_v32 = vadd.f32 %v3770_v28, %v3674_v18  ;;  %v8666_v28 = vld [vmem:[#allocation5_spill] sm:$0xff] }
 0x43a   :  { %v3772_v24 = vadd.f32 %v3771_v32, %v3675_v49 }
 0x43c   :  { %v3773_v40 = vadd.f32 %v3772_v24, %v3676_v39 }
 0x43e   :  { %v3774_v62 = vrot.slane %v3773_v40, 4 }
 0x440   :  { %v3775_v23 = vadd.f32 %v3774_v62, %v3773_v40 }
 0x442   :  { %v3776_v53 = vrot.slane %v3775_v23, 2 }
 0x444   :  { %v3777_v44 = vadd.f32 %v3776_v53, %v3775_v23  ;;  %v7216_v23 = vld [vmem:[%s8413_s3] sm:$0x1] }
 0x446   :  { %v3778_v5 = vrot.slane %v3777_v44, 1 }
 0x448   :  { %v3779_v20 = vadd.f32 %v3778_v5, %v3777_v44  ;;  %v8667_v44 = vld [vmem:[#allocation6_spill] sm:$0xff]  ;;  %v8668_v5 = vld [vmem:[#allocation7_spill] sm:$0xff] }
 0x44a   :  { %v3780_v15 = vmul.f32 0.0012755102, %v3779_v20  ;;  %v8669_v20 = vld [vmem:[#allocation8_spill] sm:$0xff] }
 0x44c   :  { %v3782_v56 = vadd.f32 1e-05, %v3780_v15 }
 0x44e   :  { %5462 = vrsqrt.f32 %v3782_v56  ;;  %v8679_v56 = vld [vmem:[#allocation17_spill] sm:$0xff] }
 0x458   :  { %v5463_v32 = vpop.eup %5462 }
 0x459   :  { %v3784_v39 = vmul.f32 %v5463_v32, %v3781_v25  ;;  %v8671_v25 = vld [vmem:[#allocation10_spill] sm:$0xff]  ;;  %v8672_v32 = vld [vmem:[#allocation11_spill] sm:$0xff] }
 0x45b   :  { %v7219_v53 = vmul.f32 %v3784_v39, %v7009_v6  ;;  %v7223_v15 = vrot.slane %v3784_v39, %v8539_v30  ;;  %v8665_v6 = vld [vmem:[#allocation4_spill] sm:$0xff]  ;;  %v8682_v30 = vld [vmem:[#allocation19_spill] sm:$0xff] }
 0x45d   :  { %v7229_v58 = vmul.f32 %v6438_v17, %v7223_v15  ;;  %v7233_v10 = vmul.f32 %v6447_v42, %v7223_v15  ;;  %v7237_v9 = vmul.f32 %v8664_v31, %v7223_v15  ;;  %v7241_v18 = vmul.f32 %v8665_v6, %v7223_v15  ;;  %v8673_v31 = vld [vmem:[#allocation12_spill] sm:$0xff] }
 0x45e   :  { %v7245_v49 = vmul.f32 %v8666_v28, %v7223_v15  ;;  %v7249_v17 = vmul.f32 %v6481_v52, %v7223_v15  ;;  %v7253_v42 = vmul.f32 %v6489_v7, %v7223_v15  ;;  %v7257_v24 = vmul.f32 %v6498_v27, %v7223_v15 }
 0x45f   :  { %v7261_v40 = vmul.f32 %v6506_v50, %v7223_v15  ;;  %v7265_v62 = vmul.f32 %v6515_v26, %v7223_v15  ;;  %v7269_v52 = vmul.f32 %v6523_v21, %v7223_v15  ;;  %v7273_v7 = vmul.f32 %v6532_v33, %v7223_v15 }
 0x460   :  { %v7277_v27 = vmul.f32 %v6540_v3, %v7223_v15  ;;  %v7281_v50 = vmul.f32 %v6549_v41, %v7223_v15  ;;  %v7285_v26 = vmul.f32 %v6557_v37, %v7223_v15  ;;  %v7289_v21 = vmul.f32 %v6566_v48, %v7223_v15 }
 0x461   :  { %v7293_v33 = vmul.f32 %v8667_v44, %v7223_v15  ;;  %v7297_v3 = vmul.f32 %v8668_v5, %v7223_v15  ;;  %v7301_v41 = vmul.f32 %v8669_v20, %v7223_v15  ;;  %v7305_v37 = vmul.f32 %v8670_v59, %v7223_v15  ;;  %v8674_v44 = vld [vmem:[#allocation14_spill] sm:$0xff]  ;;  %v8676_v20 = vld [vmem:[#allocation15_spill] sm:$0xff] }
 0x462   :  { %v7309_v48 = vmul.f32 %v8671_v25, %v7223_v15  ;;  %v7313_v39 = vmul.f32 %v8672_v32, %v7223_v15  ;;  %v7317_v6 = vmul.f32 %v8673_v31, %v7223_v15  ;;  %v7321_v28 = vmul.f32 %v8618_v0, %v7223_v15  ;;  %v8677_v25 = vld [vmem:[#allocation16_spill] sm:$0xff] }
 0x463   :  { %v7325_v5 = vmul.f32 %v8674_v44, %v7223_v15  ;;  %v7329_v59 = vmul.f32 %v8676_v20, %v7223_v15  ;;  %v7333_v32 = vmul.f32 %v8677_v25, %v7223_v15  ;;  %v7337_v31 = vmul.f32 %v8679_v56, %v7223_v15 }
 0x464   :  { %v7341_v0 = vmul.f32 %v8622_v4, %v7223_v15  ;;  %v7345_v44 = vmul.f32 %v8682_v30, %v7223_v15  ;;  %v7353_v25 = vmul.f32 %v8625_v11, %v7223_v15  ;;  %v7373_v11 = vmul.f32 %v8628_v54, %v7223_v15 }
 0x465   :  { %8675 = vst [vmem:[#allocation13_spill] sm:$0xff] %v7325_v5  ;;  %8678 = vst [vmem:[#allocation18_spill] sm:$0xff] %v7333_v32  ;;  %v8684_v5 = vld [vmem:[#allocation20_spill] sm:$0xff]  ;;  %v8686_v32 = vld [vmem:[#allocation22_spill] sm:$0xff] }
 0x466   :  { %8680 = vst [vmem:[#allocation21_spill] sm:$0xff] %v7337_v31  ;;  %8681 = vst [vmem:[#allocation26_spill] sm:$0xff] %v7341_v0  ;;  %v7349_v20 = vmul.f32 %v8684_v5, %v7223_v15  ;;  %v7357_v56 = vmul.f32 %v8686_v32, %v7223_v15  ;;  %v8688_v31 = vld [vmem:[#allocation23_spill] sm:$0xff]  ;;  %v8689_v0 = vld [vmem:[#allocation24_spill] sm:$0xff] }
 0x467   :  { %8683 = vst [vmem:[#allocation29_spill] sm:$0xff] %v7345_v44  ;;  %8685 = vst [vmem:[#allocation34_spill] sm:$0xff] %v7353_v25  ;;  %v7361_v4 = vmul.f32 %v8688_v31, %v7223_v15  ;;  %v7365_v30 = vmul.f32 %v8689_v0, %v7223_v15  ;;  %v8691_v44 = vld [vmem:[#allocation25_spill] sm:$0xff]  ;;  %v8694_v25 = vld [vmem:[#allocation27_spill] sm:$0xff]  ;;  %v7385_v0 = vmul.f32 %v8631_v22, %v7223_v15 }
 0x468   :  { %8687 = vst [vmem:[#allocation37_spill] sm:$0xff] %v7357_v56  ;;  %v7369_v5 = vmul.f32 %v8691_v44, %v7223_v15  ;;  %8693 = vst [vmem:[#allocation50_spill] sm:$0xff] %v7373_v11  ;;  %v7377_v32 = vmul.f32 %v8694_v25, %v7223_v15  ;;  %v8696_v56 = vld [vmem:[#allocation28_spill] sm:$0xff]  ;;  %v7405_v22 = vmul.f32 %v8634_v43, %v7223_v15 }
 0x469   :  { %8690 = vst [vmem:[#allocation42_spill] sm:$0xff] %v7365_v30  ;;  %v7381_v31 = vmul.f32 %v8696_v56, %v7223_v15  ;;  %8697 = vst [vmem:[#allocation58_spill] sm:$0xff] %v7385_v0  ;;  %v8698_v30 = vld [vmem:[#allocation30_spill] sm:$0xff]  ;;  %v8701_v11 = vld [vmem:[#allocation32_spill] sm:$0xff] }
 0x46a   :  { %8692 = vst [vmem:[#allocation45_spill] sm:$0xff] %v7369_v5  ;;  %8695 = vst [vmem:[#allocation53_spill] sm:$0xff] %v7377_v32  ;;  %v7389_v44 = vmul.f32 %v8698_v30, %v7223_v15  ;;  %v8700_v5 = vld [vmem:[#allocation31_spill] sm:$0xff]  ;;  %v7397_v25 = vmul.f32 %v8701_v11, %v7223_v15  ;;  %v8703_v32 = vld [vmem:[#allocation33_spill] sm:$0xff]  ;;  %v7417_v11 = vmul.f32 %v8637_v46, %v7223_v15 }
 0x46b   :  { %v7393_v54 = vmul.f32 %v8700_v5, %v7223_v15  ;;  %v7401_v56 = vmul.f32 %v8703_v32, %v7223_v15  ;;  %8705 = vst [vmem:[#allocation70_spill] sm:$0xff] %v7405_v22  ;;  %v8706_v0 = vld [vmem:[#allocation35_spill] sm:$0xff]  ;;  %v8713_v22 = vld [vmem:[#allocation40_spill] sm:$0xff]  ;;  %v7437_v46 = vmul.f32 %v8640_v14, %v7223_v15 }
 0x46c   :  { %8699 = vst [vmem:[#allocation61_spill] sm:$0xff] %v7389_v44  ;;  %8702 = vst [vmem:[#allocation66_spill] sm:$0xff] %v7397_v25  ;;  %v7409_v30 = vmul.f32 %v8706_v0, %v7223_v15  ;;  %v8708_v44 = vld [vmem:[#allocation36_spill] sm:$0xff]  ;;  %v8710_v25 = vld [vmem:[#allocation38_spill] sm:$0xff]  ;;  %v7429_v0 = vmul.f32 %v8713_v22, %v7223_v15  ;;  %v7449_v22 = vmul.f32 %v8643_v57, %v7223_v15 }
 0x46d   :  { %8704 = vst [vmem:[#allocation69_spill] sm:$0xff] %v7401_v56  ;;  %v7413_v5 = vmul.f32 %v8708_v44, %v7223_v15  ;;  %8709 = vst [vmem:[#allocation3_spill] sm:$0xff] %v7417_v11  ;;  %v7421_v32 = vmul.f32 %v8710_v25, %v7223_v15  ;;  %v8712_v56 = vld [vmem:[#allocation39_spill] sm:$0xff]  ;;  %v7469_v57 = vmul.f32 %v8646_v29, %v7223_v15 }
 0x46e   :  { %8707 = vst [vmem:[#allocation71_spill] sm:$0xff] %v7409_v30  ;;  %v7425_v43 = vmul.f32 %v8712_v56, %v7223_v15  ;;  %8714 = vst [vmem:[#allocation5_spill] sm:$0xff] %v7429_v0  ;;  %v8715_v30 = vld [vmem:[#allocation41_spill] sm:$0xff]  ;;  %v8718_v11 = vld [vmem:[#allocation43_spill] sm:$0xff] }
 0x46f   :  { %8711 = vst [vmem:[#allocation4_spill] sm:$0xff] %v7421_v32  ;;  %v7433_v44 = vmul.f32 %v8715_v30, %v7223_v15  ;;  %8717 = vst [vmem:[#allocation7_spill] sm:$0xff] %v7437_v46  ;;  %v7441_v25 = vmul.f32 %v8718_v11, %v7223_v15  ;;  %v8720_v32 = vld [vmem:[#allocation44_spill] sm:$0xff]  ;;  %v8722_v0 = vld [vmem:[#allocation46_spill] sm:$0xff] }
 0x470   :  { %v7445_v56 = vmul.f32 %v8720_v32, %v7223_v15  ;;  %8721 = vst [vmem:[#allocation9_spill] sm:$0xff] %v7449_v22  ;;  %v7453_v30 = vmul.f32 %v8722_v0, %v7223_v15  ;;  %v8725_v46 = vld [vmem:[#allocation48_spill] sm:$0xff]  ;;  %8729 = vst [vmem:[#allocation14_spill] sm:$0xff] %v7469_v57  ;;  %v8730_v22 = vld [vmem:[#allocation51_spill] sm:$0xff] }
 0x471   :  { %8716 = vst [vmem:[#allocation6_spill] sm:$0xff] %v7433_v44  ;;  %8719 = vst [vmem:[#allocation8_spill] sm:$0xff] %v7441_v25  ;;  %v8724_v44 = vld [vmem:[#allocation47_spill] sm:$0xff]  ;;  %v7461_v11 = vmul.f32 %v8725_v46, %v7223_v15  ;;  %v8727_v25 = vld [vmem:[#allocation49_spill] sm:$0xff]  ;;  %v7473_v0 = vmul.f32 %v8730_v22, %v7223_v15  ;;  %v7481_v46 = vmul.f32 %v8649_v61, %v7223_v15 }
 0x472   :  { %8723 = vst [vmem:[#allocation10_spill] sm:$0xff] %v7453_v30  ;;  %v7457_v14 = vmul.f32 %v8724_v44, %v7223_v15  ;;  %v7465_v32 = vmul.f32 %v8727_v25, %v7223_v15  ;;  %v8732_v30 = vld [vmem:[#allocation52_spill] sm:$0xff]  ;;  %v7501_v61 = vmul.f32 %v8652_v13, %v7223_v15 }
 0x473   :  { %8726 = vst [vmem:[#allocation11_spill] sm:$0xff] %v7461_v11  ;;  %8731 = vst [vmem:[#allocation15_spill] sm:$0xff] %v7473_v0  ;;  %v7477_v44 = vmul.f32 %v8732_v30, %v7223_v15  ;;  %v8734_v11 = vld [vmem:[#allocation54_spill] sm:$0xff]  ;;  %v8737_v57 = vld [vmem:[#allocation56_spill] sm:$0xff] }
 0x474   :  { %8728 = vst [vmem:[#allocation12_spill] sm:$0xff] %v7465_v32  ;;  %8733 = vst [vmem:[#allocation16_spill] sm:$0xff] %v7481_v46  ;;  %v7485_v25 = vmul.f32 %v8734_v11, %v7223_v15  ;;  %v8736_v32 = vld [vmem:[#allocation55_spill] sm:$0xff]  ;;  %v7493_v22 = vmul.f32 %v8737_v57, %v7223_v15  ;;  %v8739_v0 = vld [vmem:[#allocation57_spill] sm:$0xff]  ;;  %v7513_v57 = vmul.f32 %v8655_v12, %v7223_v15 }
 0x475   :  { %v7489_v29 = vmul.f32 %v8736_v32, %v7223_v15  ;;  %v7497_v30 = vmul.f32 %v8739_v0, %v7223_v15  ;;  %8741 = vst [vmem:[#allocation22_spill] sm:$0xff] %v7501_v61  ;;  %v8742_v46 = vld [vmem:[#allocation59_spill] sm:$0xff]  ;;  %v8749_v61 = vld [vmem:[#allocation64_spill] sm:$0xff]  ;;  %v7533_v12 = vmul.f32 %v8658_v55, %v7223_v15  ;;  %v7553_v55 = vmul.f32 %v8662_v60, %v7223_v15 }
 0x476   :  { %8735 = vst [vmem:[#allocation17_spill] sm:$0xff] %v7485_v25  ;;  %8738 = vst [vmem:[#allocation19_spill] sm:$0xff] %v7493_v22  ;;  %v7505_v11 = vmul.f32 %v8742_v46, %v7223_v15  ;;  %v8744_v25 = vld [vmem:[#allocation60_spill] sm:$0xff]  ;;  %v8746_v22 = vld [vmem:[#allocation62_spill] sm:$0xff]  ;;  %v7525_v46 = vmul.f32 %v8749_v61, %v7223_v15  ;;  %v7545_v61 = vmul.f32 %v8661_v8, %v7223_v15 }
 0x477   :  { %8740 = vst [vmem:[#allocation20_spill] sm:$0xff] %v7497_v30  ;;  %v7509_v32 = vmul.f32 %v8744_v25, %v7223_v15  ;;  %8745 = vst [vmem:[#allocation24_spill] sm:$0xff] %v7513_v57  ;;  %v7517_v0 = vmul.f32 %v8746_v22, %v7223_v15  ;;  %v8748_v30 = vld [vmem:[#allocation63_spill] sm:$0xff]  ;;  %v7565_v8 = vmul.f32 %v6955_v1, %v7223_v15 }
 0x478   :  { %8743 = vst [vmem:[#allocation23_spill] sm:$0xff] %v7505_v11  ;;  %v7521_v13 = vmul.f32 %v8748_v30, %v7223_v15  ;;  %v8750_v11 = vld [vmem:[#allocation65_spill] sm:$0xff]  ;;  %v8751_v57 = vld [vmem:[#allocation67_spill] sm:$0xff]  ;;  %v7573_v60 = vmul.f32 %v6962_v36, %v7223_v15  ;;  %v7585_v1 = vmul.f32 %v6971_v38, %v7223_v15  ;;  %v8765_v38 = vsub.f32 %v7216_v23, %v7219_v53 }
 0x479   :  { %8747 = vst [vmem:[#allocation25_spill] sm:$0xff] %v7517_v0  ;;  %v7529_v25 = vmul.f32 %v8750_v11, %v7223_v15  ;;  %v7537_v22 = vmul.f32 %v8751_v57, %v7223_v15  ;;  %v8752_v0 = vld [vmem:[#allocation68_spill] sm:$0xff]  ;;  %v7549_v11 = vmul.f32 %v6942_v63, %v7223_v15  ;;  %v7557_v57 = vmul.f32 %v8663_v16, %v7223_v15 }
 0x47a   :  { %v7541_v30 = vmul.f32 %v8752_v0, %v7223_v15  ;;  %v7561_v0 = vmul.f32 %v6951_v45, %v7223_v15  ;;  %v7569_v63 = vmul.f32 %v6958_v35, %v7223_v15  ;;  %8754 = vst [vmem:[#allocation28_spill] sm:$0xff] %v7573_v60  ;;  %v7577_v16 = vmul.f32 %v6964_v34, %v7223_v15  ;;  %v8761_v60 = vld [vmem:[#allocation73_spill] sm:$0xff] }
 0x47b   :  { %v7581_v45 = vmul.f32 %v6968_v51, %v7223_v15  ;;  %8757 = vst [vmem:[#allocation32_spill] sm:$0xff] %v7585_v1  ;;  %v7589_v35 = vmul.f32 %v6975_v2, %v7223_v15  ;;  %v7597_v34 = vmul.f32 %v8761_v60, %v7223_v15  ;;  %v8766_v2 = vld [vmem:[#allocation75_spill] sm:$0xff]  ;;  %v8768_v60 = vld [vmem:[#allocation77_spill] sm:$0xff] }
 0x47c   :  { %8753 = vst [vmem:[#allocation27_spill] sm:$0xff] %v7569_v63  ;;  %8755 = vst [vmem:[#allocation30_spill] sm:$0xff] %v7577_v16  ;;  %v8759_v63 = vld [vmem:[#allocation72_spill] sm:$0xff]  ;;  %v8763_v16 = vld [vmem:[#allocation74_spill] sm:$0xff] }
 0x47d   :  { %8756 = vst [vmem:[#allocation31_spill] sm:$0xff] %v7581_v45  ;;  %8758 = vst [vmem:[#allocation33_spill] sm:$0xff] %v7589_v35  ;;  %v7593_v36 = vmul.f32 %v8759_v63, %v7223_v15  ;;  %v7601_v51 = vmul.f32 %v8763_v16, %v7223_v15  ;;  %v8764_v45 = vsub.s32 0, %v7207_v19  ;;  %v7612_v35 = vmul.f32 %v8766_v2, %v7223_v15  ;;  %v8767_v63 = vld [vmem:[#allocation76_spill] sm:$0xff]  ;;  %v8773_v2 = vld [vmem:[#allocation21_spill] sm:$0xff] }
 0x47e   :  { %8762 = vst [vmem:[#allocation36_spill] sm:$0xff] %v7597_v34  ;;  %v7620_v34 = vmul.f32 %v8768_v60, %v7223_v15  ;;  %v7624_v19 = vmul.f32 %v6998_v47, %v7223_v15  ;;  %v8776_v60 = vld [vmem:[#allocation29_spill] sm:$0xff] }
 0x47f   :  { %8760 = vst [vmem:[#allocation35_spill] sm:$0xff] %v7593_v36  ;;  %v7608_v1 = vrot.slane %v8765_v38, %v8764_v45  ;;  %v7616_v36 = vmul.f32 %v8767_v63, %v7223_v15  ;;  %v8771_v38 = vld [vmem:[#allocation18_spill] sm:$0xff] }
 0x480   :  { %v8774_v63 = vld [vmem:[#allocation26_spill] sm:$0xff] }
 0x481   :  { %v7628_v23 = vadd.f32 %v7608_v1, %v7229_v58  ;;  %v7632_v53 = vadd.f32 %v7608_v1, %v7233_v10  ;;  %v7636_v16 = vadd.f32 %v7608_v1, %v7237_v9  ;;  %v7640_v45 = vadd.f32 %v7608_v1, %v7241_v18 }
 0x482   :  { %v7644_v47 = vadd.f32 %v7608_v1, %v7245_v49  ;;  %v7648_v15 = vadd.f32 %v7608_v1, %v7249_v17  ;;  %v7652_v58 = vadd.f32 %v7608_v1, %v7253_v42  ;;  %v7656_v10 = vadd.f32 %v7608_v1, %v7257_v24 }
 0x483   :  { %v7660_v9 = vadd.f32 %v7608_v1, %v7261_v40  ;;  %v7664_v18 = vadd.f32 %v7608_v1, %v7265_v62  ;;  %v7668_v49 = vadd.f32 %v7608_v1, %v7269_v52  ;;  %v7672_v17 = vadd.f32 %v7608_v1, %v7273_v7 }
 0x484   :  { %v7676_v42 = vadd.f32 %v7608_v1, %v7277_v27  ;;  %v7680_v24 = vadd.f32 %v7608_v1, %v7281_v50  ;;  %v7684_v40 = vadd.f32 %v7608_v1, %v7285_v26  ;;  %v7688_v62 = vadd.f32 %v7608_v1, %v7289_v21 }
 0x485   :  { %v7692_v52 = vadd.f32 %v7608_v1, %v7293_v33  ;;  %v7696_v7 = vadd.f32 %v7608_v1, %v7297_v3  ;;  %v7700_v27 = vadd.f32 %v7608_v1, %v7301_v41  ;;  %v7704_v50 = vadd.f32 %v7608_v1, %v7305_v37  ;;  %v8769_v41 = vld [vmem:[#allocation13_spill] sm:$0xff] }
 0x486   :  { %v7708_v26 = vadd.f32 %v7608_v1, %v7309_v48  ;;  %v7712_v21 = vadd.f32 %v7608_v1, %v7313_v39  ;;  %v7716_v33 = vadd.f32 %v7608_v1, %v7317_v6  ;;  %v7720_v3 = vadd.f32 %v7608_v1, %v7321_v28 }
 0x487   :  { %v7724_v37 = vadd.f32 %v7608_v1, %v8769_v41  ;;  %v7728_v48 = vadd.f32 %v7608_v1, %v7329_v59  ;;  %v7732_v39 = vadd.f32 %v7608_v1, %v8771_v38  ;;  %v7736_v6 = vadd.f32 %v7608_v1, %v8773_v2 }
 0x488   :  { %v7740_v28 = vadd.f32 %v7608_v1, %v8774_v63  ;;  %v7744_v41 = vadd.f32 %v7608_v1, %v8776_v60  ;;  %v7748_v59 = vadd.f32 %v7608_v1, %v7349_v20  ;;  %v7760_v63 = vadd.f32 %v7608_v1, %v7361_v4 }
 0x489   :  { %8770 = vst [vmem:[#allocation38_spill] sm:$0xff] %v7728_v48  ;;  %8772 = vst [vmem:[#allocation39_spill] sm:$0xff] %v7732_v39  ;;  %v8779_v48 = vld [vmem:[#allocation34_spill] sm:$0xff]  ;;  %v8781_v39 = vld [vmem:[#allocation37_spill] sm:$0xff]  ;;  %v7780_v4 = vadd.f32 %v7608_v1, %v7381_v31 }
 0x48a   :  { %8775 = vst [vmem:[#allocation40_spill] sm:$0xff] %v7740_v28  ;;  %8777 = vst [vmem:[#allocation41_spill] sm:$0xff] %v7744_v41  ;;  %v7752_v38 = vadd.f32 %v7608_v1, %v8779_v48  ;;  %v7756_v2 = vadd.f32 %v7608_v1, %v8781_v39  ;;  %v8783_v28 = vld [vmem:[#allocation42_spill] sm:$0xff]  ;;  %v8785_v41 = vld [vmem:[#allocation45_spill] sm:$0xff] }
 0x48b   :  { %8778 = vst [vmem:[#allocation43_spill] sm:$0xff] %v7748_v59  ;;  %8782 = vst [vmem:[#allocation46_spill] sm:$0xff] %v7760_v63  ;;  %v7764_v60 = vadd.f32 %v7608_v1, %v8783_v28  ;;  %v7768_v20 = vadd.f32 %v7608_v1, %v8785_v41  ;;  %v8786_v59 = vld [vmem:[#allocation50_spill] sm:$0xff] }
 0x48c   :  { %8780 = vst [vmem:[#allocation44_spill] sm:$0xff] %v7752_v38  ;;  %v7772_v48 = vadd.f32 %v7608_v1, %v8786_v59  ;;  %v8788_v38 = vld [vmem:[#allocation53_spill] sm:$0xff]  ;;  %8790 = vst [vmem:[#allocation51_spill] sm:$0xff] %v7780_v4  ;;  %v8791_v63 = vld [vmem:[#allocation58_spill] sm:$0xff]  ;;  %v7792_v59 = vadd.f32 %v7608_v1, %v7393_v54  ;;  %v7812_v54 = vadd.f32 %v7608_v1, %v7413_v5 }
 0x48d   :  { %8784 = vst [vmem:[#allocation47_spill] sm:$0xff] %v7764_v60  ;;  %v7776_v39 = vadd.f32 %v7608_v1, %v8788_v38  ;;  %v7784_v28 = vadd.f32 %v7608_v1, %v8791_v63  ;;  %v8793_v60 = vld [vmem:[#allocation61_spill] sm:$0xff]  ;;  %v8798_v4 = vld [vmem:[#allocation70_spill] sm:$0xff] }
 0x48e   :  { %8787 = vst [vmem:[#allocation48_spill] sm:$0xff] %v7772_v48  ;;  %v7788_v41 = vadd.f32 %v7608_v1, %v8793_v60  ;;  %8794 = vst [vmem:[#allocation54_spill] sm:$0xff] %v7792_v59  ;;  %v8795_v48 = vld [vmem:[#allocation66_spill] sm:$0xff]  ;;  %v7804_v63 = vadd.f32 %v7608_v1, %v8798_v4  ;;  %v8803_v59 = vld [vmem:[#allocation3_spill] sm:$0xff]  ;;  %v7824_v4 = vadd.f32 %v7608_v1, %v7425_v43 }
 0x48f   :  { %8789 = vst [vmem:[#allocation49_spill] sm:$0xff] %v7776_v39  ;;  %8792 = vst [vmem:[#allocation52_spill] sm:$0xff] %v7784_v28  ;;  %v7796_v38 = vadd.f32 %v7608_v1, %v8795_v48  ;;  %v8797_v39 = vld [vmem:[#allocation69_spill] sm:$0xff]  ;;  %v8800_v28 = vld [vmem:[#allocation71_spill] sm:$0xff]  ;;  %v7816_v48 = vadd.f32 %v7608_v1, %v8803_v59  ;;  %v7844_v43 = vadd.f32 %v7608_v1, %v7445_v56 }
 0x490   :  { %v7800_v31 = vadd.f32 %v7608_v1, %v8797_v39  ;;  %8799 = vst [vmem:[#allocation56_spill] sm:$0xff] %v7804_v63  ;;  %v7808_v60 = vadd.f32 %v7608_v1, %v8800_v28  ;;  %8802 = vst [vmem:[#allocation59_spill] sm:$0xff] %v7812_v54  ;;  %v8807_v63 = vld [vmem:[#allocation5_spill] sm:$0xff]  ;;  %v8810_v54 = vld [vmem:[#allocation7_spill] sm:$0xff] }
 0x491   :  { %8796 = vst [vmem:[#allocation55_spill] sm:$0xff] %v7796_v38  ;;  %8804 = vst [vmem:[#allocation60_spill] sm:$0xff] %v7816_v48  ;;  %v8805_v38 = vld [vmem:[#allocation4_spill] sm:$0xff]  ;;  %v7828_v28 = vadd.f32 %v7608_v1, %v8807_v63  ;;  %v7836_v59 = vadd.f32 %v7608_v1, %v8810_v54  ;;  %v7856_v54 = vadd.f32 %v7608_v1, %v7457_v14 }
 0x492   :  { %8801 = vst [vmem:[#allocation57_spill] sm:$0xff] %v7808_v60  ;;  %v7820_v39 = vadd.f32 %v7608_v1, %v8805_v38  ;;  %8806 = vst [vmem:[#allocation62_spill] sm:$0xff] %v7824_v4  ;;  %v8809_v60 = vld [vmem:[#allocation6_spill] sm:$0xff]  ;;  %v8812_v48 = vld [vmem:[#allocation8_spill] sm:$0xff]  ;;  %v7876_v14 = vadd.f32 %v7608_v1, %v7477_v44 }
 0x493   :  { %8808 = vst [vmem:[#allocation63_spill] sm:$0xff] %v7828_v28  ;;  %v7832_v5 = vadd.f32 %v7608_v1, %v8809_v60  ;;  %8811 = vst [vmem:[#allocation64_spill] sm:$0xff] %v7836_v59  ;;  %v7840_v38 = vadd.f32 %v7608_v1, %v8812_v48  ;;  %v8815_v4 = vld [vmem:[#allocation9_spill] sm:$0xff]  ;;  %v8817_v28 = vld [vmem:[#allocation10_spill] sm:$0xff] }
 0x494   :  { %8814 = vst [vmem:[#allocation67_spill] sm:$0xff] %v7844_v43  ;;  %v7848_v63 = vadd.f32 %v7608_v1, %v8815_v4  ;;  %v7852_v60 = vadd.f32 %v7608_v1, %v8817_v28  ;;  %8818 = vst [vmem:[#allocation72_spill] sm:$0xff] %v7856_v54  ;;  %v8819_v59 = vld [vmem:[#allocation11_spill] sm:$0xff]  ;;  %v8822_v43 = vld [vmem:[#allocation14_spill] sm:$0xff] }
 0x495   :  { %8813 = vst [vmem:[#allocation65_spill] sm:$0xff] %v7840_v38  ;;  %v7860_v48 = vadd.f32 %v7608_v1, %v8819_v59  ;;  %v8821_v38 = vld [vmem:[#allocation12_spill] sm:$0xff]  ;;  %v7868_v4 = vadd.f32 %v7608_v1, %v8822_v43  ;;  %8826 = vst [vmem:[#allocation76_spill] sm:$0xff] %v7876_v14  ;;  %v7888_v43 = vadd.f32 %v7608_v1, %v7489_v29  ;;  %v8834_v14 = vld [vmem:[#allocation22_spill] sm:$0xff] }
 0x496   :  { %8816 = vst [vmem:[#allocation68_spill] sm:$0xff] %v7848_v63  ;;  %v7864_v56 = vadd.f32 %v7608_v1, %v8821_v38  ;;  %v8824_v63 = vld [vmem:[#allocation15_spill] sm:$0xff]  ;;  %v8827_v54 = vld [vmem:[#allocation16_spill] sm:$0xff]  ;;  %v7908_v29 = vadd.f32 %v7608_v1, %v7509_v32  ;;  %v7928_v32 = vadd.f32 %v7608_v1, %v7529_v25  ;;  %v7948_v25 = vadd.f32 %v7608_v1, %v7549_v11 }
 0x497   :  { %8820 = vst [vmem:[#allocation73_spill] sm:$0xff] %v7860_v48  ;;  %8823 = vst [vmem:[#allocation74_spill] sm:$0xff] %v7868_v4  ;;  %v7872_v28 = vadd.f32 %v7608_v1, %v8824_v63  ;;  %v7880_v59 = vadd.f32 %v7608_v1, %v8827_v54  ;;  %v8829_v48 = vld [vmem:[#allocation17_spill] sm:$0xff]  ;;  %v8831_v4 = vld [vmem:[#allocation19_spill] sm:$0xff]  ;;  %v7900_v54 = vadd.f32 %v7608_v1, %v8834_v14 }
 0x498   :  { %v7884_v38 = vadd.f32 %v7608_v1, %v8829_v48  ;;  %8830 = vst [vmem:[#allocation13_spill] sm:$0xff] %v7888_v43  ;;  %v7892_v63 = vadd.f32 %v7608_v1, %v8831_v4  ;;  %v8836_v43 = vld [vmem:[#allocation24_spill] sm:$0xff]  ;;  %v7920_v14 = vadd.f32 %v7608_v1, %v7521_v13  ;;  %v7940_v13 = vadd.f32 %v7608_v1, %v7541_v30 }
 0x499   :  { %8825 = vst [vmem:[#allocation75_spill] sm:$0xff] %v7872_v28  ;;  %8828 = vst [vmem:[#allocation77_spill] sm:$0xff] %v7880_v59  ;;  %v8833_v28 = vld [vmem:[#allocation20_spill] sm:$0xff]  ;;  %v8835_v59 = vld [vmem:[#allocation23_spill] sm:$0xff]  ;;  %v7912_v4 = vadd.f32 %v7608_v1, %v8836_v43  ;;  %v7932_v43 = vadd.f32 %v7608_v1, %v7533_v12  ;;  %v7952_v12 = vadd.f32 %v7608_v1, %v7553_v55 }
 0x49a   :  { %8832 = vst [vmem:[#allocation18_spill] sm:$0xff] %v7892_v63  ;;  %v7896_v44 = vadd.f32 %v7608_v1, %v8833_v28  ;;  %v7904_v48 = vadd.f32 %v7608_v1, %v8835_v59  ;;  %v8837_v63 = vld [vmem:[#allocation25_spill] sm:$0xff]  ;;  %v7924_v59 = vadd.f32 %v7608_v1, %v7525_v46  ;;  %v7944_v46 = vadd.f32 %v7608_v1, %v7545_v61 }
 0x49b   :  { %v7916_v28 = vadd.f32 %v7608_v1, %v8837_v63  ;;  %v7936_v63 = vadd.f32 %v7608_v1, %v7537_v22  ;;  %8839 = vst [vmem:[#allocation26_spill] sm:$0xff] %v7948_v25  ;;  %8840 = vst [vmem:[#allocation29_spill] sm:$0xff] %v7952_v12  ;;  %v7956_v22 = vadd.f32 %v7608_v1, %v7557_v57  ;;  %v8846_v25 = vld [vmem:[#allocation28_spill] sm:$0xff]  ;;  %v8848_v12 = vld [vmem:[#allocation30_spill] sm:$0xff] }
 0x49c   :  { %8838 = vst [vmem:[#allocation21_spill] sm:$0xff] %v7944_v46  ;;  %v7960_v30 = vadd.f32 %v7608_v1, %v7561_v0  ;;  %v7964_v61 = vadd.f32 %v7608_v1, %v7565_v8  ;;  %v8844_v46 = vld [vmem:[#allocation27_spill] sm:$0xff]  ;;  %v7972_v55 = vadd.f32 %v7608_v1, %v8846_v25  ;;  %v7976_v57 = vadd.f32 %v7608_v1, %v8848_v12 }
 0x49d   :  { %8841 = vst [vmem:[#allocation34_spill] sm:$0xff] %v7956_v22  ;;  %v7968_v11 = vadd.f32 %v7608_v1, %v8844_v46  ;;  %v8849_v22 = vld [vmem:[#allocation31_spill] sm:$0xff] }
 0x49e   :  { %8842 = vst [vmem:[#allocation37_spill] sm:$0xff] %v7960_v30  ;;  %8843 = vst [vmem:[#allocation42_spill] sm:$0xff] %v7964_v61  ;;  %v7980_v0 = vadd.f32 %v7608_v1, %v8849_v22  ;;  %v8850_v30 = vld [vmem:[#allocation32_spill] sm:$0xff]  ;;  %v8851_v61 = vld [vmem:[#allocation33_spill] sm:$0xff]  ;;  %v8000_v22 = vadd.f32 %v7608_v1, %v7601_v51  ;;  %v3997_v51 = vmax.f32 %v7632_v53, 0.0  ;;  %v4008_v53 = vmax.f32 %v7676_v42, 0.0 }
 0x49f   :  { %8845 = vst [vmem:[#allocation45_spill] sm:$0xff] %v7968_v11  ;;  %8847 = vst [vmem:[#allocation50_spill] sm:$0xff] %v7972_v55  ;;  %v7984_v8 = vadd.f32 %v7608_v1, %v8850_v30  ;;  %v7988_v46 = vadd.f32 %v7608_v1, %v8851_v61  ;;  %v8852_v11 = vld [vmem:[#allocation35_spill] sm:$0xff]  ;;  %v8853_v55 = vld [vmem:[#allocation36_spill] sm:$0xff]  ;;  %v8004_v30 = vadd.f32 %v7608_v1, %v7612_v35  ;;  %v3999_v35 = vmax.f32 %v7640_v45, 0.0 }
 0x4a0   :  { %v7992_v25 = vadd.f32 %v7608_v1, %v8852_v11  ;;  %v7996_v12 = vadd.f32 %v7608_v1, %v8853_v55  ;;  %8855 = vst [vmem:[#allocation58_spill] sm:$0xff] %v8000_v22  ;;  %v8008_v61 = vadd.f32 %v7608_v1, %v7616_v36  ;;  %v8012_v11 = vadd.f32 %v7608_v1, %v7620_v34 }
 0x4a1   :  { %8856 = vst [vmem:[#allocation61_spill] sm:$0xff] %v8004_v30  ;;  %v8016_v55 = vadd.f32 %v7608_v1, %v7624_v19  ;;  %v3998_v22 = vmax.f32 %v7636_v16, 0.0  ;;  %v4000_v30 = vmax.f32 %v7644_v47, 0.0  ;;  %v4001_v36 = vmax.f32 %v7648_v15, 0.0  ;;  %4095 = vst [vmem:[%s8414_s4 + $0x8] sm:$0xff] %v3997_v51 }
 0x4a2   :  { %8854 = vst [vmem:[#allocation53_spill] sm:$0xff] %v7996_v12  ;;  %8857 = vst [vmem:[#allocation66_spill] sm:$0xff] %v8008_v61  ;;  %v3996_v12 = vmax.f32 %v7628_v23, 0.0  ;;  %v4002_v61 = vmax.f32 %v7652_v58, 0.0  ;;  %v4003_v34 = vmax.f32 %v7656_v10, 0.0  ;;  %v4005_v1 = vmax.f32 %v7664_v18, 0.0 }
 0x4a3   :  { %8858 = vst [vmem:[#allocation69_spill] sm:$0xff] %v8012_v11  ;;  %v4004_v11 = vmax.f32 %v7660_v9, 0.0  ;;  %v4006_v19 = vmax.f32 %v7668_v49, 0.0  ;;  %v4007_v23 = vmax.f32 %v7672_v17, 0.0  ;;  %v4009_v16 = vmax.f32 %v7680_v24, 0.0  ;;  %4096 = vst [vmem:[%s8414_s4 + $0x10] sm:$0xff] %v3998_v22 }
 0x4a4   :  { %4094 = vst [vmem:[%s8414_s4] sm:$0xff] %v3996_v12  ;;  %4097 = vst [vmem:[%s8414_s4 + $0x18] sm:$0xff] %v3999_v35  ;;  %v4010_v45 = vmax.f32 %v7684_v40, 0.0  ;;  %v4011_v47 = vmax.f32 %v7688_v62, 0.0  ;;  %v4012_v15 = vmax.f32 %v7692_v52, 0.0  ;;  %v4013_v58 = vmax.f32 %v7696_v7, 0.0  ;;  %v8859_v40 = vld [vmem:[#allocation38_spill] sm:$0xff] }
 0x4a5   :  { %4098 = vst [vmem:[%s8414_s4 + $0x20] sm:$0xff] %v4000_v30  ;;  %4099 = vst [vmem:[%s8414_s4 + $0x28] sm:$0xff] %v4001_v36  ;;  %v4014_v10 = vmax.f32 %v7700_v27, 0.0  ;;  %v4015_v9 = vmax.f32 %v7704_v50, 0.0  ;;  %v4016_v18 = vmax.f32 %v7708_v26, 0.0  ;;  %v4017_v49 = vmax.f32 %v7712_v21, 0.0 }
 0x4a6   :  { %4100 = vst [vmem:[%s8414_s4 + $0x30] sm:$0xff] %v4002_v61  ;;  %4101 = vst [vmem:[%s8414_s4 + $0x38] sm:$0xff] %v4003_v34  ;;  %v4018_v17 = vmax.f32 %v7716_v33, 0.0  ;;  %v4019_v42 = vmax.f32 %v7720_v3, 0.0  ;;  %v4020_v24 = vmax.f32 %v7724_v37, 0.0  ;;  %v4021_v62 = vmax.f32 %v8859_v40, 0.0 }
 0x4a7   :  { %4102 = vst [vmem:[%s8414_s4 + $0x40] sm:$0xff] %v4004_v11  ;;  %4103 = vst [vmem:[%s8414_s4 + $0x48] sm:$0xff] %v4005_v1  ;;  %v8860_v52 = vld [vmem:[#allocation39_spill] sm:$0xff]  ;;  %v4023_v27 = vmax.f32 %v7736_v6, 0.0  ;;  %v8861_v50 = vld [vmem:[#allocation40_spill] sm:$0xff]  ;;  %v4028_v22 = vmax.f32 %v7756_v2, 0.0 }
 0x4a8   :  { %4104 = vst [vmem:[%s8414_s4 + $0x50] sm:$0xff] %v4006_v19  ;;  %4105 = vst [vmem:[%s8414_s4 + $0x58] sm:$0xff] %v4007_v23  ;;  %v4022_v7 = vmax.f32 %v8860_v52, 0.0  ;;  %v4024_v26 = vmax.f32 %v8861_v50, 0.0  ;;  %v8862_v21 = vld [vmem:[#allocation41_spill] sm:$0xff]  ;;  %v8863_v3 = vld [vmem:[#allocation43_spill] sm:$0xff] }
 0x4a9   :  { %4106 = vst [vmem:[%s8414_s4 + $0x60] sm:$0xff] %v4008_v53  ;;  %4107 = vst [vmem:[%s8414_s4 + $0x68] sm:$0xff] %v4009_v16  ;;  %v4025_v33 = vmax.f32 %v8862_v21, 0.0  ;;  %v4026_v37 = vmax.f32 %v8863_v3, 0.0  ;;  %v8864_v6 = vld [vmem:[#allocation44_spill] sm:$0xff]  ;;  %v8865_v30 = vld [vmem:[#allocation46_spill] sm:$0xff] }
 0x4aa   :  { %4108 = vst [vmem:[%s8414_s4 + $0x70] sm:$0xff] %v4010_v45  ;;  %4109 = vst [vmem:[%s8414_s4 + $0x78] sm:$0xff] %v4011_v47  ;;  %v4027_v12 = vmax.f32 %v8864_v6, 0.0  ;;  %v4029_v61 = vmax.f32 %v8865_v30, 0.0  ;;  %v8866_v11 = vld [vmem:[#allocation47_spill] sm:$0xff]  ;;  %v4031_v51 = vmax.f32 %v7768_v20, 0.0 }
 0x4ab   :  { %4110 = vst [vmem:[%s8414_s4 + $0x80] sm:$0xff] %v4012_v15  ;;  %4111 = vst [vmem:[%s8414_s4 + $0x88] sm:$0xff] %v4013_v58  ;;  %v4030_v2 = vmax.f32 %v8866_v11, 0.0  ;;  %v8867_v35 = vld [vmem:[#allocation48_spill] sm:$0xff]  ;;  %v8868_v34 = vld [vmem:[#allocation49_spill] sm:$0xff]  ;;  %v4036_v16 = vmax.f32 %v7788_v41, 0.0 }
 0x4ac   :  { %4112 = vst [vmem:[%s8414_s4 + $0x90] sm:$0xff] %v4014_v10  ;;  %4113 = vst [vmem:[%s8414_s4 + $0x98] sm:$0xff] %v4015_v9  ;;  %v4032_v36 = vmax.f32 %v8867_v35, 0.0  ;;  %v4033_v1 = vmax.f32 %v8868_v34, 0.0  ;;  %v8869_v20 = vld [vmem:[#allocation51_spill] sm:$0xff]  ;;  %v8870_v23 = vld [vmem:[#allocation52_spill] sm:$0xff] }
 0x4ad   :  { %4114 = vst [vmem:[%s8414_s4 + $0xa0] sm:$0xff] %v4016_v18  ;;  %4115 = vst [vmem:[%s8414_s4 + $0xa8] sm:$0xff] %v4017_v49  ;;  %v4034_v19 = vmax.f32 %v8869_v20, 0.0  ;;  %v4035_v53 = vmax.f32 %v8870_v23, 0.0  ;;  %v8871_v45 = vld [vmem:[#allocation54_spill] sm:$0xff]  ;;  %v8872_v15 = vld [vmem:[#allocation55_spill] sm:$0xff] }
 0x4ae   :  { %4116 = vst [vmem:[%s8414_s4 + $0xb0] sm:$0xff] %v4018_v17  ;;  %4117 = vst [vmem:[%s8414_s4 + $0xb8] sm:$0xff] %v4019_v42  ;;  %v4037_v47 = vmax.f32 %v8871_v45, 0.0  ;;  %v4038_v41 = vmax.f32 %v8872_v15, 0.0  ;;  %v4039_v58 = vmax.f32 %v7800_v31, 0.0  ;;  %v8873_v10 = vld [vmem:[#allocation56_spill] sm:$0xff] }
 0x4af   :  { %4118 = vst [vmem:[%s8414_s4 + $0xc0] sm:$0xff] %v4020_v24  ;;  %4119 = vst [vmem:[%s8414_s4 + $0xc8] sm:$0xff] %v4021_v62  ;;  %v4040_v9 = vmax.f32 %v8873_v10, 0.0  ;;  %v8874_v18 = vld [vmem:[#allocation57_spill] sm:$0xff]  ;;  %v8875_v31 = vld [vmem:[#allocation59_spill] sm:$0xff]  ;;  %v4044_v40 = vmax.f32 %v7820_v39, 0.0 }
 0x4b0   :  { %4120 = vst [vmem:[%s8414_s4 + $0xd0] sm:$0xff] %v4022_v7  ;;  %4121 = vst [vmem:[%s8414_s4 + $0xd8] sm:$0xff] %v4023_v27  ;;  %v4041_v49 = vmax.f32 %v8874_v18, 0.0  ;;  %v4042_v17 = vmax.f32 %v8875_v31, 0.0  ;;  %v8876_v42 = vld [vmem:[#allocation60_spill] sm:$0xff]  ;;  %v8877_v62 = vld [vmem:[#allocation62_spill] sm:$0xff] }
 0x4b1   :  { %4122 = vst [vmem:[%s8414_s4 + $0xe0] sm:$0xff] %v4024_v26  ;;  %4123 = vst [vmem:[%s8414_s4 + $0xe8] sm:$0xff] %v4025_v33  ;;  %v4043_v24 = vmax.f32 %v8876_v42, 0.0  ;;  %v4045_v52 = vmax.f32 %v8877_v62, 0.0  ;;  %v8878_v7 = vld [vmem:[#allocation63_spill] sm:$0xff]  ;;  %v4047_v27 = vmax.f32 %v7832_v5, 0.0 }
 0x4b2   :  { %4124 = vst [vmem:[%s8414_s4 + $0xf0] sm:$0xff] %v4026_v37  ;;  %4125 = vst [vmem:[%s8414_s4 + $0xf8] sm:$0xff] %v4027_v12  ;;  %v4046_v39 = vmax.f32 %v8878_v7, 0.0  ;;  %v8879_v50 = vld [vmem:[#allocation64_spill] sm:$0xff]  ;;  %v8880_v21 = vld [vmem:[#allocation65_spill] sm:$0xff]  ;;  %v4052_v12 = vmax.f32 %v7852_v60, 0.0 }
 0x4b3   :  { %4126 = vst [vmem:[%s8414_s4 + $0x100] sm:$0xff] %v4028_v22  ;;  %4127 = vst [vmem:[%s8414_s4 + $0x108] sm:$0xff] %v4029_v61  ;;  %v4048_v26 = vmax.f32 %v8879_v50, 0.0  ;;  %v4049_v33 = vmax.f32 %v8880_v21, 0.0  ;;  %v8881_v5 = vld [vmem:[#allocation67_spill] sm:$0xff]  ;;  %v8882_v37 = vld [vmem:[#allocation68_spill] sm:$0xff] }
 0x4b4   :  { %4128 = vst [vmem:[%s8414_s4 + $0x110] sm:$0xff] %v4030_v2  ;;  %4129 = vst [vmem:[%s8414_s4 + $0x118] sm:$0xff] %v4031_v51  ;;  %v4050_v3 = vmax.f32 %v8881_v5, 0.0  ;;  %v4051_v6 = vmax.f32 %v8882_v37, 0.0  ;;  %v8883_v22 = vld [vmem:[#allocation72_spill] sm:$0xff]  ;;  %v8884_v61 = vld [vmem:[#allocation73_spill] sm:$0xff] }
 0x4b5   :  { %4130 = vst [vmem:[%s8414_s4 + $0x120] sm:$0xff] %v4032_v36  ;;  %4131 = vst [vmem:[%s8414_s4 + $0x128] sm:$0xff] %v4033_v1  ;;  %v4053_v30 = vmax.f32 %v8883_v22, 0.0  ;;  %v4054_v60 = vmax.f32 %v8884_v61, 0.0  ;;  %v4055_v11 = vmax.f32 %v7864_v56, 0.0  ;;  %v8885_v2 = vld [vmem:[#allocation74_spill] sm:$0xff] }
 0x4b6   :  { %4132 = vst [vmem:[%s8414_s4 + $0x130] sm:$0xff] %v4034_v19  ;;  %4133 = vst [vmem:[%s8414_s4 + $0x138] sm:$0xff] %v4035_v53  ;;  %v4056_v51 = vmax.f32 %v8885_v2, 0.0  ;;  %v8886_v35 = vld [vmem:[#allocation75_spill] sm:$0xff]  ;;  %v8887_v56 = vld [vmem:[#allocation76_spill] sm:$0xff]  ;;  %v4060_v19 = vmax.f32 %v7884_v38, 0.0 }
 0x4b7   :  { %4134 = vst [vmem:[%s8414_s4 + $0x140] sm:$0xff] %v4036_v16  ;;  %4135 = vst [vmem:[%s8414_s4 + $0x148] sm:$0xff] %v4037_v47  ;;  %v4057_v36 = vmax.f32 %v8886_v35, 0.0  ;;  %v4058_v34 = vmax.f32 %v8887_v56, 0.0  ;;  %v8888_v1 = vld [vmem:[#allocation77_spill] sm:$0xff]  ;;  %v8890_v16 = vld [vmem:[#allocation18_spill] sm:$0xff] }
 0x4b8   :  { %4136 = vst [vmem:[%s8414_s4 + $0x150] sm:$0xff] %v4038_v41  ;;  %4137 = vst [vmem:[%s8414_s4 + $0x158] sm:$0xff] %v4039_v58  ;;  %v4059_v20 = vmax.f32 %v8888_v1, 0.0  ;;  %v8889_v23 = vld [vmem:[#allocation13_spill] sm:$0xff]  ;;  %v4062_v38 = vmax.f32 %v8890_v16, 0.0  ;;  %v4063_v45 = vmax.f32 %v7896_v44, 0.0 }
 0x4b9   :  { %4138 = vst [vmem:[%s8414_s4 + $0x160] sm:$0xff] %v4040_v9  ;;  %4139 = vst [vmem:[%s8414_s4 + $0x168] sm:$0xff] %v4041_v49  ;;  %v4061_v53 = vmax.f32 %v8889_v23, 0.0  ;;  %v4064_v47 = vmax.f32 %v7900_v54, 0.0  ;;  %v4065_v15 = vmax.f32 %v7904_v48, 0.0  ;;  %v4066_v44 = vmax.f32 %v7908_v29, 0.0 }
 0x4ba   :  { %4140 = vst [vmem:[%s8414_s4 + $0x170] sm:$0xff] %v4042_v17  ;;  %4141 = vst [vmem:[%s8414_s4 + $0x178] sm:$0xff] %v4043_v24  ;;  %v4067_v54 = vmax.f32 %v7912_v4, 0.0  ;;  %v4068_v48 = vmax.f32 %v7916_v28, 0.0  ;;  %v4069_v41 = vmax.f32 %v7920_v14, 0.0  ;;  %v4070_v29 = vmax.f32 %v7924_v59, 0.0 }
 0x4bb   :  { %4142 = vst [vmem:[%s8414_s4 + $0x180] sm:$0xff] %v4044_v40  ;;  %4143 = vst [vmem:[%s8414_s4 + $0x188] sm:$0xff] %v4045_v52  ;;  %v4071_v4 = vmax.f32 %v7928_v32, 0.0  ;;  %v4072_v28 = vmax.f32 %v7932_v43, 0.0  ;;  %v4073_v14 = vmax.f32 %v7936_v63, 0.0  ;;  %v4074_v59 = vmax.f32 %v7940_v13, 0.0 }
 0x4bc   :  { %4144 = vst [vmem:[%s8414_s4 + $0x190] sm:$0xff] %v4046_v39  ;;  %4145 = vst [vmem:[%s8414_s4 + $0x198] sm:$0xff] %v4047_v27  ;;  %v8891_v32 = vld [vmem:[#allocation21_spill] sm:$0xff]  ;;  %v8892_v63 = vld [vmem:[#allocation26_spill] sm:$0xff]  ;;  %v4083_v7 = vmax.f32 %v7976_v57, 0.0  ;;  %v4084_v39 = vmax.f32 %v7980_v0, 0.0 }
 0x4bd   :  { %4146 = vst [vmem:[%s8414_s4 + $0x1a0] sm:$0xff] %v4048_v26  ;;  %4147 = vst [vmem:[%s8414_s4 + $0x1a8] sm:$0xff] %v4049_v33  ;;  %v4075_v43 = vmax.f32 %v8891_v32, 0.0  ;;  %v4076_v58 = vmax.f32 %v8892_v63, 0.0  ;;  %v8893_v10 = vld [vmem:[#allocation29_spill] sm:$0xff]  ;;  %v8894_v13 = vld [vmem:[#allocation34_spill] sm:$0xff] }
 0x4be   :  { %4148 = vst [vmem:[%s8414_s4 + $0x1b0] sm:$0xff] %v4050_v3  ;;  %4149 = vst [vmem:[%s8414_s4 + $0x1b8] sm:$0xff] %v4051_v6  ;;  %v4077_v9 = vmax.f32 %v8893_v10, 0.0  ;;  %v4078_v18 = vmax.f32 %v8894_v13, 0.0  ;;  %v8895_v49 = vld [vmem:[#allocation37_spill] sm:$0xff]  ;;  %v8896_v17 = vld [vmem:[#allocation42_spill] sm:$0xff] }
 0x4bf   :  { %4150 = vst [vmem:[%s8414_s4 + $0x1c0] sm:$0xff] %v4052_v12  ;;  %4151 = vst [vmem:[%s8414_s4 + $0x1c8] sm:$0xff] %v4053_v30  ;;  %v4079_v31 = vmax.f32 %v8895_v49, 0.0  ;;  %v4080_v42 = vmax.f32 %v8896_v17, 0.0  ;;  %v8897_v24 = vld [vmem:[#allocation45_spill] sm:$0xff]  ;;  %v8898_v62 = vld [vmem:[#allocation50_spill] sm:$0xff] }
 0x4c0   :  { %4152 = vst [vmem:[%s8414_s4 + $0x1d0] sm:$0xff] %v4054_v60  ;;  %4153 = vst [vmem:[%s8414_s4 + $0x1d8] sm:$0xff] %v4055_v11  ;;  %v4081_v40 = vmax.f32 %v8897_v24, 0.0  ;;  %v4082_v52 = vmax.f32 %v8898_v62, 0.0  ;;  %v4085_v27 = vmax.f32 %v7984_v8, 0.0  ;;  %v4086_v57 = vmax.f32 %v7988_v46, 0.0 }
 0x4c1   :  { %4154 = vst [vmem:[%s8414_s4 + $0x1e0] sm:$0xff] %v4056_v51  ;;  %4155 = vst [vmem:[%s8414_s4 + $0x1e8] sm:$0xff] %v4057_v36  ;;  %v4087_v0 = vmax.f32 %v7992_v25, 0.0  ;;  %v8899_v8 = vld [vmem:[#allocation53_spill] sm:$0xff]  ;;  %v8900_v26 = vld [vmem:[#allocation58_spill] sm:$0xff]  ;;  %v4093_v6 = vmax.f32 %v8016_v55, 0.0 }
 0x4c2   :  { %4156 = vst [vmem:[%s8414_s4 + $0x1f0] sm:$0xff] %v4058_v34  ;;  %4157 = vst [vmem:[%s8414_s4 + $0x1f8] sm:$0xff] %v4059_v20  ;;  %v4088_v50 = vmax.f32 %v8899_v8, 0.0  ;;  %v4089_v21 = vmax.f32 %v8900_v26, 0.0  ;;  %v8901_v46 = vld [vmem:[#allocation61_spill] sm:$0xff]  ;;  %v8902_v33 = vld [vmem:[#allocation66_spill] sm:$0xff] }
 0x4c3   :  { %4158 = vst [vmem:[%s8414_s4 + $0x200] sm:$0xff] %v4060_v19  ;;  %4159 = vst [vmem:[%s8414_s4 + $0x208] sm:$0xff] %v4061_v53  ;;  %v4090_v25 = vmax.f32 %v8901_v46, 0.0  ;;  %v4091_v5 = vmax.f32 %v8902_v33, 0.0  ;;  %v8903_v3 = vld [vmem:[#allocation69_spill] sm:$0xff] }
 0x4c4   :  { %4160 = vst [vmem:[%s8414_s4 + $0x210] sm:$0xff] %v4062_v38  ;;  %4161 = vst [vmem:[%s8414_s4 + $0x218] sm:$0xff] %v4063_v45  ;;  %v4092_v37 = vmax.f32 %v8903_v3, 0.0 }
 0x4c5   :  { %4162 = vst [vmem:[%s8414_s4 + $0x220] sm:$0xff] %v4064_v47  ;;  %4163 = vst [vmem:[%s8414_s4 + $0x228] sm:$0xff] %v4065_v15 }
 0x4c6   :  { %4164 = vst [vmem:[%s8414_s4 + $0x230] sm:$0xff] %v4066_v44  ;;  %4165 = vst [vmem:[%s8414_s4 + $0x238] sm:$0xff] %v4067_v54 }
 0x4c7   :  { %4166 = vst [vmem:[%s8414_s4 + $0x240] sm:$0xff] %v4068_v48  ;;  %4167 = vst [vmem:[%s8414_s4 + $0x248] sm:$0xff] %v4069_v41 }
 0x4c8   :  { %4168 = vst [vmem:[%s8414_s4 + $0x250] sm:$0xff] %v4070_v29  ;;  %4169 = vst [vmem:[%s8414_s4 + $0x258] sm:$0xff] %v4071_v4 }
 0x4c9   :  { %4170 = vst [vmem:[%s8414_s4 + $0x260] sm:$0xff] %v4072_v28  ;;  %4171 = vst [vmem:[%s8414_s4 + $0x268] sm:$0xff] %v4073_v14 }
 0x4ca   :  { %4172 = vst [vmem:[%s8414_s4 + $0x270] sm:$0xff] %v4074_v59  ;;  %4173 = vst [vmem:[%s8414_s4 + $0x278] sm:$0xff] %v4075_v43 }
 0x4cb   :  { %4174 = vst [vmem:[%s8414_s4 + $0x280] sm:$0xff] %v4076_v58  ;;  %4175 = vst [vmem:[%s8414_s4 + $0x288] sm:$0xff] %v4077_v9 }
 0x4cc   :  { %4176 = vst [vmem:[%s8414_s4 + $0x290] sm:$0xff] %v4078_v18  ;;  %4177 = vst [vmem:[%s8414_s4 + $0x298] sm:$0xff] %v4079_v31 }
 0x4cd   :  { %4178 = vst [vmem:[%s8414_s4 + $0x2a0] sm:$0xff] %v4080_v42  ;;  %4179 = vst [vmem:[%s8414_s4 + $0x2a8] sm:$0xff] %v4081_v40 }
 0x4ce   :  { %4180 = vst [vmem:[%s8414_s4 + $0x2b0] sm:$0xff] %v4082_v52  ;;  %4181 = vst [vmem:[%s8414_s4 + $0x2b8] sm:$0xff] %v4083_v7 }
 0x4cf   :  { %4182 = vst [vmem:[%s8414_s4 + $0x2c0] sm:$0xff] %v4084_v39  ;;  %4183 = vst [vmem:[%s8414_s4 + $0x2c8] sm:$0xff] %v4085_v27 }
 0x4d0   :  { %4184 = vst [vmem:[%s8414_s4 + $0x2d0] sm:$0xff] %v4086_v57  ;;  %4185 = vst [vmem:[%s8414_s4 + $0x2d8] sm:$0xff] %v4087_v0 }
 0x4d1   :  { %4186 = vst [vmem:[%s8414_s4 + $0x2e0] sm:$0xff] %v4088_v50  ;;  %4187 = vst [vmem:[%s8414_s4 + $0x2e8] sm:$0xff] %v4089_v21 }
 0x4d2   :  { %4188 = vst [vmem:[%s8414_s4 + $0x2f0] sm:$0xff] %v4090_v25  ;;  %4189 = vst [vmem:[%s8414_s4 + $0x2f8] sm:$0xff] %v4091_v5 }
 0x4d3   :  { %4190 = vst [vmem:[%s8414_s4 + $0x300] sm:$0xff] %v4092_v37  ;;  %4191 = vst [vmem:[%s8414_s4 + $0x308] sm:$0xff] %v4093_v6 }

</bundles_post_ra>
